<compile_context>
chip_gen: v7x
topology: tpu7x:2x2x1
jax: 0.10.0
libtpu: 0.0.40
codegen_flags: <defaults>
</compile_context>

<pallas_src>
import jax
import jax.numpy as jnp
from jax import lax
from jax.experimental import pallas as pl
from jax.experimental.pallas import tpu as pltpu
import numpy as np

HIDDEN = 128
INPUT_LEN = 1
NUM_CLASSES = 10
NUM_LAYERS = 2          # hard-coded as two stacked cells below
OUT_PAD = 128           # lane-dense padded head output width


def lstm_kernel(x_ref, wih0_ref, b0_ref, wblk_ref, b1_ref, wout_ref, bout_ref,
                out_ref):
    T, B, _ = x_ref.shape
    H = HIDDEN

    # Hoisted broadcasts (JAX does not CSE broadcast_in_dim inside the loop).
    wih0_b = jnp.broadcast_to(wih0_ref[...], (B, 4 * H))
    b0_b = jnp.broadcast_to(b0_ref[...], (B, 4 * H))
    b1_b = jnp.broadcast_to(b1_ref[...], (B, 4 * H))

    def sigmoid(v):
        # One EUP tanh per gate instead of exp + divide.
        return 0.5 * jnp.tanh(0.5 * v) + 0.5

    def cell(g, c):
        i = sigmoid(g[:, 0 * H:1 * H])
        f = sigmoid(g[:, 1 * H:2 * H])
        g_t = jnp.tanh(g[:, 2 * H:3 * H])
        o = sigmoid(g[:, 3 * H:4 * H])
        c_new = f * c + i * g_t
        h_new = o * jnp.tanh(c_new)
        return h_new, c_new

    def step(t, carry):
        r0, c0, h1, c1 = carry

        # Layer 0, step t: the recurrent part r0 = h0_{t-1} @ whh0 was produced
        # by the previous iteration's fused dot; the input projection is a pure
        # VPU broadcast multiply because input_len == 1.
        g0 = x_ref[t] * wih0_b + b0_b + r0
        h0, c0 = cell(g0, c0)

        # Single fused MXU issue per step (K = 2H = 256, N = 8H = 1024):
        #   left  4H cols -> h0_t @ whh0            (layer-0 recurrent, step t+1)
        #   right 4H cols -> [h0_t|h1_{t-1}] @ w1   (layer-1 gates, step t)
        hcat = jnp.concatenate([h0, h1], axis=-1).astype(jnp.bfloat16)
        big = jnp.dot(hcat, wblk_ref[...],
                      preferred_element_type=jnp.float32)
        g1 = big[:, 4 * H:] + b1_b
        h1, c1 = cell(g1, c1)

        return (big[:, :4 * H], c0, h1, c1)

    zh = jnp.zeros((B, H), jnp.float32)      # matches torch.zeros init states
    zg = jnp.zeros((B, 4 * H), jnp.float32)  # r0 for t=0 (h0_{-1} == 0)
    _, _, h1, _ = lax.fori_loop(0, T, step, (zg, zh, zh, zh), unroll=True)

    # Linear head on the last step's top-layer hidden state (lane-dense store).
    out_ref[...] = (jnp.dot(h1.astype(jnp.bfloat16), wout_ref[...],
                            preferred_element_type=jnp.float32)
                    + bout_ref[...]).astype(out_ref.dtype)


@jax.jit
def lstm_forward(x, kparams):
    """x: (B, T, input_len) batch-first, like the PyTorch module."""
    wih0, b0, wblk, b1, wout, bout = kparams
    B, T, _ = x.shape
    B_pad = ((B + 7) // 8) * 8                  # f32 sublane width
    x_tm = jnp.transpose(x, (1, 0, 2))          # (T, B, I) time-major
    if B_pad != B:
        x_tm = jnp.pad(x_tm, ((0, 0), (0, B_pad - B), (0, 0)))

    vmem = pl.BlockSpec(memory_space=pltpu.MemorySpace.VMEM)
    out = pl.pallas_call(
        lstm_kernel,
        out_shape=jax.ShapeDtypeStruct((B_pad, OUT_PAD), jnp.float32),
        in_specs=[vmem] * 7,
        out_specs=vmem,
    )(x_tm, wih0, b0, wblk, b1, wout, bout)

    return out[:B, :NUM_CLASSES]


def init_params(key):
    """PyTorch-shaped raw parameters, uniform(-1/sqrt(H), 1/sqrt(H))."""
    k = 1.0 / np.sqrt(HIDDEN)
    keys = jax.random.split(key, 10)

    def u(kk, shape):
        return jax.random.uniform(kk, shape, jnp.float32, -k, k)

    return dict(
        w_ih0=u(keys[0], (4 * HIDDEN, INPUT_LEN)),
        w_hh0=u(keys[1], (4 * HIDDEN, HIDDEN)),
        b_ih0=u(keys[2], (4 * HIDDEN,)),
        b_hh0=u(keys[3], (4 * HIDDEN,)),
        w_ih1=u(keys[4], (4 * HIDDEN, HIDDEN)),
        w_hh1=u(keys[5], (4 * HIDDEN, HIDDEN)),
        b_ih1=u(keys[6], (4 * HIDDEN,)),
        b_hh1=u(keys[7], (4 * HIDDEN,)),
        w_out=u(keys[8], (NUM_CLASSES, HIDDEN)),
        b_out=u(keys[9], (NUM_CLASSES,)),
    )


def pack_params(raw):
    """Pre-transpose / fuse / pad weights into the kernel layout."""
    H = HIDDEN
    wih0 = raw["w_ih0"].T                                    # (I, 4H) f32
    b0 = (raw["b_ih0"] + raw["b_hh0"])[None, :]              # (1, 4H) fused bias
    b1 = (raw["b_ih1"] + raw["b_hh1"])[None, :]              # (1, 4H)
    # Layer-skew block weight (bf16 for the MXU):
    #   [h0 | h1] @ [[whh0, wih1^T], [0, whh1^T]]  -> (2H, 8H)
    top = jnp.concatenate([raw["w_hh0"].T, raw["w_ih1"].T], axis=1)    # (H, 8H)
    bot = jnp.concatenate([jnp.zeros((H, 4 * H), jnp.float32),
                           raw["w_hh1"].T], axis=1)                    # (H, 8H)
    wblk = jnp.concatenate([top, bot], axis=0).astype(jnp.bfloat16)    # (2H, 8H)
    # Lane-padded head (bf16 weight, f32 bias).
    wout = jnp.zeros((H, OUT_PAD), jnp.float32)
    wout = wout.at[:, :NUM_CLASSES].set(raw["w_out"].T).astype(jnp.bfloat16)
    bout = jnp.zeros((1, OUT_PAD), jnp.float32)
    bout = bout.at[:, :NUM_CLASSES].set(raw["b_out"][None, :])
    return (wih0, b0, wblk, b1, wout, bout)


def lstm_ref(x, raw):
    """Pure-JAX f32 reference mirroring nn.LSTM (gate order i,f,g,o) + Linear."""
    H = HIDDEN
    B, T, _ = x.shape
    wih0, whh0 = raw["w_ih0"].T, raw["w_hh0"].T
    b0 = raw["b_ih0"] + raw["b_hh0"]
    wih1, whh1 = raw["w_ih1"].T, raw["w_hh1"].T
    b1 = raw["b_ih1"] + raw["b_hh1"]
    wout, bout = raw["w_out"].T, raw["b_out"]

    def cell(x_t, h, c, wih, whh, b):
        g = x_t @ wih + h @ whh + b
        i = jax.nn.sigmoid(g[:, :H])
        f = jax.nn.sigmoid(g[:, H:2 * H])
        gg = jnp.tanh(g[:, 2 * H:3 * H])
        o = jax.nn.sigmoid(g[:, 3 * H:])
        c = f * c + i * gg
        h = o * jnp.tanh(c)
        return h, c

    h0 = jnp.zeros((B, H), jnp.float32)
    c0 = jnp.zeros((B, H), jnp.float32)
    h1 = jnp.zeros((B, H), jnp.float32)
    c1 = jnp.zeros((B, H), jnp.float32)
    for t in range(T):
        h0, c0 = cell(x[:, t, :], h0, c0, wih0, whh0, b0)
        h1, c1 = cell(h0, h1, c1, wih1, whh1, b1)
    return h1 @ wout + bout


if __name__ == "__main__":
    key = jax.random.PRNGKey(0)
    kp, kx = jax.random.split(key)

    raw = init_params(kp)
    kparams = pack_params(raw)

    B, T = 2, 8
    x = jax.random.normal(kx, (B, T, INPUT_LEN), jnp.float32)

    out = jax.block_until_ready(lstm_forward(x, kparams))

    ref = lstm_ref(x, raw)
    # bf16 MXU operands -> relaxed tolerance vs the f32 reference.
    np.testing.assert_allclose(np.asarray(out), np.asarray(ref),
                               rtol=1e-2, atol=1e-2)

    print("KERNEL_OK")
</pallas_src>

<mosaic_0001>
module attributes {stable_mosaic.version = 11 : i64} {
  func.func @lstm_kernel(%arg0: memref<8x8x1xf32, #tpu.memory_space<vmem>>, %arg1: memref<1x512xf32, #tpu.memory_space<vmem>>, %arg2: memref<1x512xf32, #tpu.memory_space<vmem>>, %arg3: memref<256x1024xbf16, #tpu.memory_space<vmem>>, %arg4: memref<1x512xf32, #tpu.memory_space<vmem>>, %arg5: memref<128x128xbf16, #tpu.memory_space<vmem>>, %arg6: memref<1x128xf32, #tpu.memory_space<vmem>>, %arg7: memref<8x128xf32, #tpu.memory_space<vmem>>) attributes {dimension_semantics = [], scalar_prefetch = 0 : i64, scratch_operands = 0 : i64, tpu.core_type = #tpu.core_type<tc>} {
    %c0 = arith.constant 0 : index
    %c0_0 = arith.constant 0 : index
    %0 = vector.load %arg1[%c0, %c0_0] : memref<1x512xf32, #tpu.memory_space<vmem>>, vector<1x512xf32>
    %1 = vector.shape_cast %0 : vector<1x512xf32> to vector<1x512xf32>
    %2 = vector.broadcast %1 : vector<1x512xf32> to vector<8x512xf32>
    %c0_1 = arith.constant 0 : index
    %c0_2 = arith.constant 0 : index
    %3 = vector.load %arg2[%c0_1, %c0_2] : memref<1x512xf32, #tpu.memory_space<vmem>>, vector<1x512xf32>
    %4 = vector.shape_cast %3 : vector<1x512xf32> to vector<1x512xf32>
    %5 = vector.broadcast %4 : vector<1x512xf32> to vector<8x512xf32>
    %c0_3 = arith.constant 0 : index
    %c0_4 = arith.constant 0 : index
    %6 = vector.load %arg4[%c0_3, %c0_4] : memref<1x512xf32, #tpu.memory_space<vmem>>, vector<1x512xf32>
    %7 = vector.shape_cast %6 : vector<1x512xf32> to vector<1x512xf32>
    %8 = vector.broadcast %7 : vector<1x512xf32> to vector<8x512xf32>
    %cst = arith.constant 0.000000e+00 : f32
    %9 = vector.broadcast %cst : f32 to vector<8x128xf32>
    %cst_5 = arith.constant 0.000000e+00 : f32
    %10 = vector.broadcast %cst_5 : f32 to vector<8x512xf32>
    %c0_i32 = arith.constant 0 : i32
    %11 = arith.index_cast %c0_i32 : i32 to index
    %c0_6 = arith.constant 0 : index
    %c0_7 = arith.constant 0 : index
    %12 = vector.load %arg0[%11, %c0_6, %c0_7] : memref<8x8x1xf32, #tpu.memory_space<vmem>>, vector<1x8x1xf32>
    %13 = vector.shape_cast %12 : vector<1x8x1xf32> to vector<8x1xf32>
    %14 = vector.broadcast %13 : vector<8x1xf32> to vector<8x512xf32>
    %15 = arith.mulf %14, %2 : vector<8x512xf32>
    %16 = arith.addf %15, %5 : vector<8x512xf32>
    %17 = arith.addf %16, %10 : vector<8x512xf32>
    %18 = vector.extract_strided_slice %17 {offsets = [0, 0], sizes = [8, 128], strides = [1, 1]} : vector<8x512xf32> to vector<8x128xf32>
    %cst_8 = arith.constant 5.000000e-01 : f32
    %19 = vector.broadcast %cst_8 : f32 to vector<8x128xf32>
    %20 = arith.mulf %19, %18 : vector<8x128xf32>
    %21 = math.tanh %20 : vector<8x128xf32>
    %cst_9 = arith.constant 5.000000e-01 : f32
    %22 = vector.broadcast %cst_9 : f32 to vector<8x128xf32>
    %23 = arith.mulf %22, %21 : vector<8x128xf32>
    %cst_10 = arith.constant 5.000000e-01 : f32
    %24 = vector.broadcast %cst_10 : f32 to vector<8x128xf32>
    %25 = arith.addf %23, %24 : vector<8x128xf32>
    %26 = vector.extract_strided_slice %17 {offsets = [0, 128], sizes = [8, 128], strides = [1, 1]} : vector<8x512xf32> to vector<8x128xf32>
    %cst_11 = arith.constant 5.000000e-01 : f32
    %27 = vector.broadcast %cst_11 : f32 to vector<8x128xf32>
    %28 = arith.mulf %27, %26 : vector<8x128xf32>
    %29 = math.tanh %28 : vector<8x128xf32>
    %cst_12 = arith.constant 5.000000e-01 : f32
    %30 = vector.broadcast %cst_12 : f32 to vector<8x128xf32>
    %31 = arith.mulf %30, %29 : vector<8x128xf32>
    %cst_13 = arith.constant 5.000000e-01 : f32
    %32 = vector.broadcast %cst_13 : f32 to vector<8x128xf32>
    %33 = arith.addf %31, %32 : vector<8x128xf32>
    %34 = vector.extract_strided_slice %17 {offsets = [0, 256], sizes = [8, 128], strides = [1, 1]} : vector<8x512xf32> to vector<8x128xf32>
    %35 = math.tanh %34 : vector<8x128xf32>
    %36 = vector.extract_strided_slice %17 {offsets = [0, 384], sizes = [8, 128], strides = [1, 1]} : vector<8x512xf32> to vector<8x128xf32>
    %cst_14 = arith.constant 5.000000e-01 : f32
    %37 = vector.broadcast %cst_14 : f32 to vector<8x128xf32>
    %38 = arith.mulf %37, %36 : vector<8x128xf32>
    %39 = math.tanh %38 : vector<8x128xf32>
    %cst_15 = arith.constant 5.000000e-01 : f32
    %40 = vector.broadcast %cst_15 : f32 to vector<8x128xf32>
    %41 = arith.mulf %40, %39 : vector<8x128xf32>
    %cst_16 = arith.constant 5.000000e-01 : f32
    %42 = vector.broadcast %cst_16 : f32 to vector<8x128xf32>
    %43 = arith.addf %41, %42 : vector<8x128xf32>
    %44 = arith.mulf %33, %9 : vector<8x128xf32>
    %45 = arith.mulf %25, %35 : vector<8x128xf32>
    %46 = arith.addf %44, %45 : vector<8x128xf32>
    %47 = math.tanh %46 : vector<8x128xf32>
    %48 = arith.mulf %43, %47 : vector<8x128xf32>
    %49 = tpu.concatenate %48, %9 in 1 : vector<8x128xf32>, vector<8x128xf32> -> vector<8x256xf32>
    %50 = arith.truncf %49 : vector<8x256xf32> to vector<8x256xbf16>
    %c0_17 = arith.constant 0 : index
    %c0_18 = arith.constant 0 : index
    %51 = vector.load %arg3[%c0_17, %c0_18] : memref<256x1024xbf16, #tpu.memory_space<vmem>>, vector<256x1024xbf16>
    %cst_19 = arith.constant dense<0.000000e+00> : vector<8x1024xf32>
    %52 = tpu.matmul %50, %51, %cst_19 {dimension_numbers = #tpu.dot_dimension_numbers<[1], [0], [0], [1], [0, 0, 1, 1], [], []>} : vector<8x256xbf16>, vector<256x1024xbf16>, vector<8x1024xf32> -> vector<8x1024xf32>
    %53 = vector.extract_strided_slice %52 {offsets = [0, 512], sizes = [8, 512], strides = [1, 1]} : vector<8x1024xf32> to vector<8x512xf32>
    %54 = arith.addf %53, %8 : vector<8x512xf32>
    %55 = vector.extract_strided_slice %54 {offsets = [0, 0], sizes = [8, 128], strides = [1, 1]} : vector<8x512xf32> to vector<8x128xf32>
    %cst_20 = arith.constant 5.000000e-01 : f32
    %56 = vector.broadcast %cst_20 : f32 to vector<8x128xf32>
    %57 = arith.mulf %56, %55 : vector<8x128xf32>
    %58 = math.tanh %57 : vector<8x128xf32>
    %cst_21 = arith.constant 5.000000e-01 : f32
    %59 = vector.broadcast %cst_21 : f32 to vector<8x128xf32>
    %60 = arith.mulf %59, %58 : vector<8x128xf32>
    %cst_22 = arith.constant 5.000000e-01 : f32
    %61 = vector.broadcast %cst_22 : f32 to vector<8x128xf32>
    %62 = arith.addf %60, %61 : vector<8x128xf32>
    %63 = vector.extract_strided_slice %54 {offsets = [0, 128], sizes = [8, 128], strides = [1, 1]} : vector<8x512xf32> to vector<8x128xf32>
    %cst_23 = arith.constant 5.000000e-01 : f32
    %64 = vector.broadcast %cst_23 : f32 to vector<8x128xf32>
    %65 = arith.mulf %64, %63 : vector<8x128xf32>
    %66 = math.tanh %65 : vector<8x128xf32>
    %cst_24 = arith.constant 5.000000e-01 : f32
    %67 = vector.broadcast %cst_24 : f32 to vector<8x128xf32>
    %68 = arith.mulf %67, %66 : vector<8x128xf32>
    %cst_25 = arith.constant 5.000000e-01 : f32
    %69 = vector.broadcast %cst_25 : f32 to vector<8x128xf32>
    %70 = arith.addf %68, %69 : vector<8x128xf32>
    %71 = vector.extract_strided_slice %54 {offsets = [0, 256], sizes = [8, 128], strides = [1, 1]} : vector<8x512xf32> to vector<8x128xf32>
    %72 = math.tanh %71 : vector<8x128xf32>
    %73 = vector.extract_strided_slice %54 {offsets = [0, 384], sizes = [8, 128], strides = [1, 1]} : vector<8x512xf32> to vector<8x128xf32>
    %cst_26 = arith.constant 5.000000e-01 : f32
    %74 = vector.broadcast %cst_26 : f32 to vector<8x128xf32>
    %75 = arith.mulf %74, %73 : vector<8x128xf32>
    %76 = math.tanh %75 : vector<8x128xf32>
    %cst_27 = arith.constant 5.000000e-01 : f32
    %77 = vector.broadcast %cst_27 : f32 to vector<8x128xf32>
    %78 = arith.mulf %77, %76 : vector<8x128xf32>
    %cst_28 = arith.constant 5.000000e-01 : f32
    %79 = vector.broadcast %cst_28 : f32 to vector<8x128xf32>
    %80 = arith.addf %78, %79 : vector<8x128xf32>
    %81 = arith.mulf %70, %9 : vector<8x128xf32>
    %82 = arith.mulf %62, %72 : vector<8x128xf32>
    %83 = arith.addf %81, %82 : vector<8x128xf32>
    %84 = math.tanh %83 : vector<8x128xf32>
    %85 = arith.mulf %80, %84 : vector<8x128xf32>
    %86 = vector.extract_strided_slice %52 {offsets = [0, 0], sizes = [8, 512], strides = [1, 1]} : vector<8x1024xf32> to vector<8x512xf32>
    %c1_i32 = arith.constant 1 : i32
    %87 = arith.index_cast %c1_i32 : i32 to index
    %c0_29 = arith.constant 0 : index
    %c0_30 = arith.constant 0 : index
    %88 = vector.load %arg0[%87, %c0_29, %c0_30] : memref<8x8x1xf32, #tpu.memory_space<vmem>>, vector<1x8x1xf32>
    %89 = vector.shape_cast %88 : vector<1x8x1xf32> to vector<8x1xf32>
    %90 = vector.broadcast %89 : vector<8x1xf32> to vector<8x512xf32>
    %91 = arith.mulf %90, %2 : vector<8x512xf32>
    %92 = arith.addf %91, %5 : vector<8x512xf32>
    %93 = arith.addf %92, %86 : vector<8x512xf32>
    %94 = vector.extract_strided_slice %93 {offsets = [0, 0], sizes = [8, 128], strides = [1, 1]} : vector<8x512xf32> to vector<8x128xf32>
    %cst_31 = arith.constant 5.000000e-01 : f32
    %95 = vector.broadcast %cst_31 : f32 to vector<8x128xf32>
    %96 = arith.mulf %95, %94 : vector<8x128xf32>
    %97 = math.tanh %96 : vector<8x128xf32>
    %cst_32 = arith.constant 5.000000e-01 : f32
    %98 = vector.broadcast %cst_32 : f32 to vector<8x128xf32>
    %99 = arith.mulf %98, %97 : vector<8x128xf32>
    %cst_33 = arith.constant 5.000000e-01 : f32
    %100 = vector.broadcast %cst_33 : f32 to vector<8x128xf32>
    %101 = arith.addf %99, %100 : vector<8x128xf32>
    %102 = vector.extract_strided_slice %93 {offsets = [0, 128], sizes = [8, 128], strides = [1, 1]} : vector<8x512xf32> to vector<8x128xf32>
    %cst_34 = arith.constant 5.000000e-01 : f32
    %103 = vector.broadcast %cst_34 : f32 to vector<8x128xf32>
    %104 = arith.mulf %103, %102 : vector<8x128xf32>
    %105 = math.tanh %104 : vector<8x128xf32>
    %cst_35 = arith.constant 5.000000e-01 : f32
    %106 = vector.broadcast %cst_35 : f32 to vector<8x128xf32>
    %107 = arith.mulf %106, %105 : vector<8x128xf32>
    %cst_36 = arith.constant 5.000000e-01 : f32
    %108 = vector.broadcast %cst_36 : f32 to vector<8x128xf32>
    %109 = arith.addf %107, %108 : vector<8x128xf32>
    %110 = vector.extract_strided_slice %93 {offsets = [0, 256], sizes = [8, 128], strides = [1, 1]} : vector<8x512xf32> to vector<8x128xf32>
    %111 = math.tanh %110 : vector<8x128xf32>
    %112 = vector.extract_strided_slice %93 {offsets = [0, 384], sizes = [8, 128], strides = [1, 1]} : vector<8x512xf32> to vector<8x128xf32>
    %cst_37 = arith.constant 5.000000e-01 : f32
    %113 = vector.broadcast %cst_37 : f32 to vector<8x128xf32>
    %114 = arith.mulf %113, %112 : vector<8x128xf32>
    %115 = math.tanh %114 : vector<8x128xf32>
    %cst_38 = arith.constant 5.000000e-01 : f32
    %116 = vector.broadcast %cst_38 : f32 to vector<8x128xf32>
    %117 = arith.mulf %116, %115 : vector<8x128xf32>
    %cst_39 = arith.constant 5.000000e-01 : f32
    %118 = vector.broadcast %cst_39 : f32 to vector<8x128xf32>
    %119 = arith.addf %117, %118 : vector<8x128xf32>
    %120 = arith.mulf %109, %46 : vector<8x128xf32>
    %121 = arith.mulf %101, %111 : vector<8x128xf32>
    %122 = arith.addf %120, %121 : vector<8x128xf32>
    %123 = math.tanh %122 : vector<8x128xf32>
    %124 = arith.mulf %119, %123 : vector<8x128xf32>
    %125 = tpu.concatenate %124, %85 in 1 : vector<8x128xf32>, vector<8x128xf32> -> vector<8x256xf32>
    %126 = arith.truncf %125 : vector<8x256xf32> to vector<8x256xbf16>
    %c0_40 = arith.constant 0 : index
    %c0_41 = arith.constant 0 : index
    %127 = vector.load %arg3[%c0_40, %c0_41] : memref<256x1024xbf16, #tpu.memory_space<vmem>>, vector<256x1024xbf16>
    %cst_42 = arith.constant dense<0.000000e+00> : vector<8x1024xf32>
    %128 = tpu.matmul %126, %127, %cst_42 {dimension_numbers = #tpu.dot_dimension_numbers<[1], [0], [0], [1], [0, 0, 1, 1], [], []>} : vector<8x256xbf16>, vector<256x1024xbf16>, vector<8x1024xf32> -> vector<8x1024xf32>
    %129 = vector.extract_strided_slice %128 {offsets = [0, 512], sizes = [8, 512], strides = [1, 1]} : vector<8x1024xf32> to vector<8x512xf32>
    %130 = arith.addf %129, %8 : vector<8x512xf32>
    %131 = vector.extract_strided_slice %130 {offsets = [0, 0], sizes = [8, 128], strides = [1, 1]} : vector<8x512xf32> to vector<8x128xf32>
    %cst_43 = arith.constant 5.000000e-01 : f32
    %132 = vector.broadcast %cst_43 : f32 to vector<8x128xf32>
    %133 = arith.mulf %132, %131 : vector<8x128xf32>
    %134 = math.tanh %133 : vector<8x128xf32>
    %cst_44 = arith.constant 5.000000e-01 : f32
    %135 = vector.broadcast %cst_44 : f32 to vector<8x128xf32>
    %136 = arith.mulf %135, %134 : vector<8x128xf32>
    %cst_45 = arith.constant 5.000000e-01 : f32
    %137 = vector.broadcast %cst_45 : f32 to vector<8x128xf32>
    %138 = arith.addf %136, %137 : vector<8x128xf32>
    %139 = vector.extract_strided_slice %130 {offsets = [0, 128], sizes = [8, 128], strides = [1, 1]} : vector<8x512xf32> to vector<8x128xf32>
    %cst_46 = arith.constant 5.000000e-01 : f32
    %140 = vector.broadcast %cst_46 : f32 to vector<8x128xf32>
    %141 = arith.mulf %140, %139 : vector<8x128xf32>
    %142 = math.tanh %141 : vector<8x128xf32>
    %cst_47 = arith.constant 5.000000e-01 : f32
    %143 = vector.broadcast %cst_47 : f32 to vector<8x128xf32>
    %144 = arith.mulf %143, %142 : vector<8x128xf32>
    %cst_48 = arith.constant 5.000000e-01 : f32
    %145 = vector.broadcast %cst_48 : f32 to vector<8x128xf32>
    %146 = arith.addf %144, %145 : vector<8x128xf32>
    %147 = vector.extract_strided_slice %130 {offsets = [0, 256], sizes = [8, 128], strides = [1, 1]} : vector<8x512xf32> to vector<8x128xf32>
    %148 = math.tanh %147 : vector<8x128xf32>
    %149 = vector.extract_strided_slice %130 {offsets = [0, 384], sizes = [8, 128], strides = [1, 1]} : vector<8x512xf32> to vector<8x128xf32>
    %cst_49 = arith.constant 5.000000e-01 : f32
    %150 = vector.broadcast %cst_49 : f32 to vector<8x128xf32>
    %151 = arith.mulf %150, %149 : vector<8x128xf32>
    %152 = math.tanh %151 : vector<8x128xf32>
    %cst_50 = arith.constant 5.000000e-01 : f32
    %153 = vector.broadcast %cst_50 : f32 to vector<8x128xf32>
    %154 = arith.mulf %153, %152 : vector<8x128xf32>
    %cst_51 = arith.constant 5.000000e-01 : f32
    %155 = vector.broadcast %cst_51 : f32 to vector<8x128xf32>
    %156 = arith.addf %154, %155 : vector<8x128xf32>
    %157 = arith.mulf %146, %83 : vector<8x128xf32>
    %158 = arith.mulf %138, %148 : vector<8x128xf32>
    %159 = arith.addf %157, %158 : vector<8x128xf32>
    %160 = math.tanh %159 : vector<8x128xf32>
    %161 = arith.mulf %156, %160 : vector<8x128xf32>
    %162 = vector.extract_strided_slice %128 {offsets = [0, 0], sizes = [8, 512], strides = [1, 1]} : vector<8x1024xf32> to vector<8x512xf32>
    %c2_i32 = arith.constant 2 : i32
    %163 = arith.index_cast %c2_i32 : i32 to index
    %c0_52 = arith.constant 0 : index
    %c0_53 = arith.constant 0 : index
    %164 = vector.load %arg0[%163, %c0_52, %c0_53] : memref<8x8x1xf32, #tpu.memory_space<vmem>>, vector<1x8x1xf32>
    %165 = vector.shape_cast %164 : vector<1x8x1xf32> to vector<8x1xf32>
    %166 = vector.broadcast %165 : vector<8x1xf32> to vector<8x512xf32>
    %167 = arith.mulf %166, %2 : vector<8x512xf32>
    %168 = arith.addf %167, %5 : vector<8x512xf32>
    %169 = arith.addf %168, %162 : vector<8x512xf32>
    %170 = vector.extract_strided_slice %169 {offsets = [0, 0], sizes = [8, 128], strides = [1, 1]} : vector<8x512xf32> to vector<8x128xf32>
    %cst_54 = arith.constant 5.000000e-01 : f32
    %171 = vector.broadcast %cst_54 : f32 to vector<8x128xf32>
    %172 = arith.mulf %171, %170 : vector<8x128xf32>
    %173 = math.tanh %172 : vector<8x128xf32>
    %cst_55 = arith.constant 5.000000e-01 : f32
    %174 = vector.broadcast %cst_55 : f32 to vector<8x128xf32>
    %175 = arith.mulf %174, %173 : vector<8x128xf32>
    %cst_56 = arith.constant 5.000000e-01 : f32
    %176 = vector.broadcast %cst_56 : f32 to vector<8x128xf32>
    %177 = arith.addf %175, %176 : vector<8x128xf32>
    %178 = vector.extract_strided_slice %169 {offsets = [0, 128], sizes = [8, 128], strides = [1, 1]} : vector<8x512xf32> to vector<8x128xf32>
    %cst_57 = arith.constant 5.000000e-01 : f32
    %179 = vector.broadcast %cst_57 : f32 to vector<8x128xf32>
    %180 = arith.mulf %179, %178 : vector<8x128xf32>
    %181 = math.tanh %180 : vector<8x128xf32>
    %cst_58 = arith.constant 5.000000e-01 : f32
    %182 = vector.broadcast %cst_58 : f32 to vector<8x128xf32>
    %183 = arith.mulf %182, %181 : vector<8x128xf32>
    %cst_59 = arith.constant 5.000000e-01 : f32
    %184 = vector.broadcast %cst_59 : f32 to vector<8x128xf32>
    %185 = arith.addf %183, %184 : vector<8x128xf32>
    %186 = vector.extract_strided_slice %169 {offsets = [0, 256], sizes = [8, 128], strides = [1, 1]} : vector<8x512xf32> to vector<8x128xf32>
    %187 = math.tanh %186 : vector<8x128xf32>
    %188 = vector.extract_strided_slice %169 {offsets = [0, 384], sizes = [8, 128], strides = [1, 1]} : vector<8x512xf32> to vector<8x128xf32>
    %cst_60 = arith.constant 5.000000e-01 : f32
    %189 = vector.broadcast %cst_60 : f32 to vector<8x128xf32>
    %190 = arith.mulf %189, %188 : vector<8x128xf32>
    %191 = math.tanh %190 : vector<8x128xf32>
    %cst_61 = arith.constant 5.000000e-01 : f32
    %192 = vector.broadcast %cst_61 : f32 to vector<8x128xf32>
    %193 = arith.mulf %192, %191 : vector<8x128xf32>
    %cst_62 = arith.constant 5.000000e-01 : f32
    %194 = vector.broadcast %cst_62 : f32 to vector<8x128xf32>
    %195 = arith.addf %193, %194 : vector<8x128xf32>
    %196 = arith.mulf %185, %122 : vector<8x128xf32>
    %197 = arith.mulf %177, %187 : vector<8x128xf32>
    %198 = arith.addf %196, %197 : vector<8x128xf32>
    %199 = math.tanh %198 : vector<8x128xf32>
    %200 = arith.mulf %195, %199 : vector<8x128xf32>
    %201 = tpu.concatenate %200, %161 in 1 : vector<8x128xf32>, vector<8x128xf32> -> vector<8x256xf32>
    %202 = arith.truncf %201 : vector<8x256xf32> to vector<8x256xbf16>
    %c0_63 = arith.constant 0 : index
    %c0_64 = arith.constant 0 : index
    %203 = vector.load %arg3[%c0_63, %c0_64] : memref<256x1024xbf16, #tpu.memory_space<vmem>>, vector<256x1024xbf16>
    %cst_65 = arith.constant dense<0.000000e+00> : vector<8x1024xf32>
    %204 = tpu.matmul %202, %203, %cst_65 {dimension_numbers = #tpu.dot_dimension_numbers<[1], [0], [0], [1], [0, 0, 1, 1], [], []>} : vector<8x256xbf16>, vector<256x1024xbf16>, vector<8x1024xf32> -> vector<8x1024xf32>
    %205 = vector.extract_strided_slice %204 {offsets = [0, 512], sizes = [8, 512], strides = [1, 1]} : vector<8x1024xf32> to vector<8x512xf32>
    %206 = arith.addf %205, %8 : vector<8x512xf32>
    %207 = vector.extract_strided_slice %206 {offsets = [0, 0], sizes = [8, 128], strides = [1, 1]} : vector<8x512xf32> to vector<8x128xf32>
    %cst_66 = arith.constant 5.000000e-01 : f32
    %208 = vector.broadcast %cst_66 : f32 to vector<8x128xf32>
    %209 = arith.mulf %208, %207 : vector<8x128xf32>
    %210 = math.tanh %209 : vector<8x128xf32>
    %cst_67 = arith.constant 5.000000e-01 : f32
    %211 = vector.broadcast %cst_67 : f32 to vector<8x128xf32>
    %212 = arith.mulf %211, %210 : vector<8x128xf32>
    %cst_68 = arith.constant 5.000000e-01 : f32
    %213 = vector.broadcast %cst_68 : f32 to vector<8x128xf32>
    %214 = arith.addf %212, %213 : vector<8x128xf32>
    %215 = vector.extract_strided_slice %206 {offsets = [0, 128], sizes = [8, 128], strides = [1, 1]} : vector<8x512xf32> to vector<8x128xf32>
    %cst_69 = arith.constant 5.000000e-01 : f32
    %216 = vector.broadcast %cst_69 : f32 to vector<8x128xf32>
    %217 = arith.mulf %216, %215 : vector<8x128xf32>
    %218 = math.tanh %217 : vector<8x128xf32>
    %cst_70 = arith.constant 5.000000e-01 : f32
    %219 = vector.broadcast %cst_70 : f32 to vector<8x128xf32>
    %220 = arith.mulf %219, %218 : vector<8x128xf32>
    %cst_71 = arith.constant 5.000000e-01 : f32
    %221 = vector.broadcast %cst_71 : f32 to vector<8x128xf32>
    %222 = arith.addf %220, %221 : vector<8x128xf32>
    %223 = vector.extract_strided_slice %206 {offsets = [0, 256], sizes = [8, 128], strides = [1, 1]} : vector<8x512xf32> to vector<8x128xf32>
    %224 = math.tanh %223 : vector<8x128xf32>
    %225 = vector.extract_strided_slice %206 {offsets = [0, 384], sizes = [8, 128], strides = [1, 1]} : vector<8x512xf32> to vector<8x128xf32>
    %cst_72 = arith.constant 5.000000e-01 : f32
    %226 = vector.broadcast %cst_72 : f32 to vector<8x128xf32>
    %227 = arith.mulf %226, %225 : vector<8x128xf32>
    %228 = math.tanh %227 : vector<8x128xf32>
    %cst_73 = arith.constant 5.000000e-01 : f32
    %229 = vector.broadcast %cst_73 : f32 to vector<8x128xf32>
    %230 = arith.mulf %229, %228 : vector<8x128xf32>
    %cst_74 = arith.constant 5.000000e-01 : f32
    %231 = vector.broadcast %cst_74 : f32 to vector<8x128xf32>
    %232 = arith.addf %230, %231 : vector<8x128xf32>
    %233 = arith.mulf %222, %159 : vector<8x128xf32>
    %234 = arith.mulf %214, %224 : vector<8x128xf32>
    %235 = arith.addf %233, %234 : vector<8x128xf32>
    %236 = math.tanh %235 : vector<8x128xf32>
    %237 = arith.mulf %232, %236 : vector<8x128xf32>
    %238 = vector.extract_strided_slice %204 {offsets = [0, 0], sizes = [8, 512], strides = [1, 1]} : vector<8x1024xf32> to vector<8x512xf32>
    %c3_i32 = arith.constant 3 : i32
    %239 = arith.index_cast %c3_i32 : i32 to index
    %c0_75 = arith.constant 0 : index
    %c0_76 = arith.constant 0 : index
    %240 = vector.load %arg0[%239, %c0_75, %c0_76] : memref<8x8x1xf32, #tpu.memory_space<vmem>>, vector<1x8x1xf32>
    %241 = vector.shape_cast %240 : vector<1x8x1xf32> to vector<8x1xf32>
    %242 = vector.broadcast %241 : vector<8x1xf32> to vector<8x512xf32>
    %243 = arith.mulf %242, %2 : vector<8x512xf32>
    %244 = arith.addf %243, %5 : vector<8x512xf32>
    %245 = arith.addf %244, %238 : vector<8x512xf32>
    %246 = vector.extract_strided_slice %245 {offsets = [0, 0], sizes = [8, 128], strides = [1, 1]} : vector<8x512xf32> to vector<8x128xf32>
    %cst_77 = arith.constant 5.000000e-01 : f32
    %247 = vector.broadcast %cst_77 : f32 to vector<8x128xf32>
    %248 = arith.mulf %247, %246 : vector<8x128xf32>
    %249 = math.tanh %248 : vector<8x128xf32>
    %cst_78 = arith.constant 5.000000e-01 : f32
    %250 = vector.broadcast %cst_78 : f32 to vector<8x128xf32>
    %251 = arith.mulf %250, %249 : vector<8x128xf32>
    %cst_79 = arith.constant 5.000000e-01 : f32
    %252 = vector.broadcast %cst_79 : f32 to vector<8x128xf32>
    %253 = arith.addf %251, %252 : vector<8x128xf32>
    %254 = vector.extract_strided_slice %245 {offsets = [0, 128], sizes = [8, 128], strides = [1, 1]} : vector<8x512xf32> to vector<8x128xf32>
    %cst_80 = arith.constant 5.000000e-01 : f32
    %255 = vector.broadcast %cst_80 : f32 to vector<8x128xf32>
    %256 = arith.mulf %255, %254 : vector<8x128xf32>
    %257 = math.tanh %256 : vector<8x128xf32>
    %cst_81 = arith.constant 5.000000e-01 : f32
    %258 = vector.broadcast %cst_81 : f32 to vector<8x128xf32>
    %259 = arith.mulf %258, %257 : vector<8x128xf32>
    %cst_82 = arith.constant 5.000000e-01 : f32
    %260 = vector.broadcast %cst_82 : f32 to vector<8x128xf32>
    %261 = arith.addf %259, %260 : vector<8x128xf32>
    %262 = vector.extract_strided_slice %245 {offsets = [0, 256], sizes = [8, 128], strides = [1, 1]} : vector<8x512xf32> to vector<8x128xf32>
    %263 = math.tanh %262 : vector<8x128xf32>
    %264 = vector.extract_strided_slice %245 {offsets = [0, 384], sizes = [8, 128], strides = [1, 1]} : vector<8x512xf32> to vector<8x128xf32>
    %cst_83 = arith.constant 5.000000e-01 : f32
    %265 = vector.broadcast %cst_83 : f32 to vector<8x128xf32>
    %266 = arith.mulf %265, %264 : vector<8x128xf32>
    %267 = math.tanh %266 : vector<8x128xf32>
    %cst_84 = arith.constant 5.000000e-01 : f32
    %268 = vector.broadcast %cst_84 : f32 to vector<8x128xf32>
    %269 = arith.mulf %268, %267 : vector<8x128xf32>
    %cst_85 = arith.constant 5.000000e-01 : f32
    %270 = vector.broadcast %cst_85 : f32 to vector<8x128xf32>
    %271 = arith.addf %269, %270 : vector<8x128xf32>
    %272 = arith.mulf %261, %198 : vector<8x128xf32>
    %273 = arith.mulf %253, %263 : vector<8x128xf32>
    %274 = arith.addf %272, %273 : vector<8x128xf32>
    %275 = math.tanh %274 : vector<8x128xf32>
    %276 = arith.mulf %271, %275 : vector<8x128xf32>
    %277 = tpu.concatenate %276, %237 in 1 : vector<8x128xf32>, vector<8x128xf32> -> vector<8x256xf32>
    %278 = arith.truncf %277 : vector<8x256xf32> to vector<8x256xbf16>
    %c0_86 = arith.constant 0 : index
    %c0_87 = arith.constant 0 : index
    %279 = vector.load %arg3[%c0_86, %c0_87] : memref<256x1024xbf16, #tpu.memory_space<vmem>>, vector<256x1024xbf16>
    %cst_88 = arith.constant dense<0.000000e+00> : vector<8x1024xf32>
    %280 = tpu.matmul %278, %279, %cst_88 {dimension_numbers = #tpu.dot_dimension_numbers<[1], [0], [0], [1], [0, 0, 1, 1], [], []>} : vector<8x256xbf16>, vector<256x1024xbf16>, vector<8x1024xf32> -> vector<8x1024xf32>
    %281 = vector.extract_strided_slice %280 {offsets = [0, 512], sizes = [8, 512], strides = [1, 1]} : vector<8x1024xf32> to vector<8x512xf32>
    %282 = arith.addf %281, %8 : vector<8x512xf32>
    %283 = vector.extract_strided_slice %282 {offsets = [0, 0], sizes = [8, 128], strides = [1, 1]} : vector<8x512xf32> to vector<8x128xf32>
    %cst_89 = arith.constant 5.000000e-01 : f32
    %284 = vector.broadcast %cst_89 : f32 to vector<8x128xf32>
    %285 = arith.mulf %284, %283 : vector<8x128xf32>
    %286 = math.tanh %285 : vector<8x128xf32>
    %cst_90 = arith.constant 5.000000e-01 : f32
    %287 = vector.broadcast %cst_90 : f32 to vector<8x128xf32>
    %288 = arith.mulf %287, %286 : vector<8x128xf32>
    %cst_91 = arith.constant 5.000000e-01 : f32
    %289 = vector.broadcast %cst_91 : f32 to vector<8x128xf32>
    %290 = arith.addf %288, %289 : vector<8x128xf32>
    %291 = vector.extract_strided_slice %282 {offsets = [0, 128], sizes = [8, 128], strides = [1, 1]} : vector<8x512xf32> to vector<8x128xf32>
    %cst_92 = arith.constant 5.000000e-01 : f32
    %292 = vector.broadcast %cst_92 : f32 to vector<8x128xf32>
    %293 = arith.mulf %292, %291 : vector<8x128xf32>
    %294 = math.tanh %293 : vector<8x128xf32>
    %cst_93 = arith.constant 5.000000e-01 : f32
    %295 = vector.broadcast %cst_93 : f32 to vector<8x128xf32>
    %296 = arith.mulf %295, %294 : vector<8x128xf32>
    %cst_94 = arith.constant 5.000000e-01 : f32
    %297 = vector.broadcast %cst_94 : f32 to vector<8x128xf32>
    %298 = arith.addf %296, %297 : vector<8x128xf32>
    %299 = vector.extract_strided_slice %282 {offsets = [0, 256], sizes = [8, 128], strides = [1, 1]} : vector<8x512xf32> to vector<8x128xf32>
    %300 = math.tanh %299 : vector<8x128xf32>
    %301 = vector.extract_strided_slice %282 {offsets = [0, 384], sizes = [8, 128], strides = [1, 1]} : vector<8x512xf32> to vector<8x128xf32>
    %cst_95 = arith.constant 5.000000e-01 : f32
    %302 = vector.broadcast %cst_95 : f32 to vector<8x128xf32>
    %303 = arith.mulf %302, %301 : vector<8x128xf32>
    %304 = math.tanh %303 : vector<8x128xf32>
    %cst_96 = arith.constant 5.000000e-01 : f32
    %305 = vector.broadcast %cst_96 : f32 to vector<8x128xf32>
    %306 = arith.mulf %305, %304 : vector<8x128xf32>
    %cst_97 = arith.constant 5.000000e-01 : f32
    %307 = vector.broadcast %cst_97 : f32 to vector<8x128xf32>
    %308 = arith.addf %306, %307 : vector<8x128xf32>
    %309 = arith.mulf %298, %235 : vector<8x128xf32>
    %310 = arith.mulf %290, %300 : vector<8x128xf32>
    %311 = arith.addf %309, %310 : vector<8x128xf32>
    %312 = math.tanh %311 : vector<8x128xf32>
    %313 = arith.mulf %308, %312 : vector<8x128xf32>
    %314 = vector.extract_strided_slice %280 {offsets = [0, 0], sizes = [8, 512], strides = [1, 1]} : vector<8x1024xf32> to vector<8x512xf32>
    %c4_i32 = arith.constant 4 : i32
    %315 = arith.index_cast %c4_i32 : i32 to index
    %c0_98 = arith.constant 0 : index
    %c0_99 = arith.constant 0 : index
    %316 = vector.load %arg0[%315, %c0_98, %c0_99] : memref<8x8x1xf32, #tpu.memory_space<vmem>>, vector<1x8x1xf32>
    %317 = vector.shape_cast %316 : vector<1x8x1xf32> to vector<8x1xf32>
    %318 = vector.broadcast %317 : vector<8x1xf32> to vector<8x512xf32>
    %319 = arith.mulf %318, %2 : vector<8x512xf32>
    %320 = arith.addf %319, %5 : vector<8x512xf32>
    %321 = arith.addf %320, %314 : vector<8x512xf32>
    %322 = vector.extract_strided_slice %321 {offsets = [0, 0], sizes = [8, 128], strides = [1, 1]} : vector<8x512xf32> to vector<8x128xf32>
    %cst_100 = arith.constant 5.000000e-01 : f32
    %323 = vector.broadcast %cst_100 : f32 to vector<8x128xf32>
    %324 = arith.mulf %323, %322 : vector<8x128xf32>
    %325 = math.tanh %324 : vector<8x128xf32>
    %cst_101 = arith.constant 5.000000e-01 : f32
    %326 = vector.broadcast %cst_101 : f32 to vector<8x128xf32>
    %327 = arith.mulf %326, %325 : vector<8x128xf32>
    %cst_102 = arith.constant 5.000000e-01 : f32
    %328 = vector.broadcast %cst_102 : f32 to vector<8x128xf32>
    %329 = arith.addf %327, %328 : vector<8x128xf32>
    %330 = vector.extract_strided_slice %321 {offsets = [0, 128], sizes = [8, 128], strides = [1, 1]} : vector<8x512xf32> to vector<8x128xf32>
    %cst_103 = arith.constant 5.000000e-01 : f32
    %331 = vector.broadcast %cst_103 : f32 to vector<8x128xf32>
    %332 = arith.mulf %331, %330 : vector<8x128xf32>
    %333 = math.tanh %332 : vector<8x128xf32>
    %cst_104 = arith.constant 5.000000e-01 : f32
    %334 = vector.broadcast %cst_104 : f32 to vector<8x128xf32>
    %335 = arith.mulf %334, %333 : vector<8x128xf32>
    %cst_105 = arith.constant 5.000000e-01 : f32
    %336 = vector.broadcast %cst_105 : f32 to vector<8x128xf32>
    %337 = arith.addf %335, %336 : vector<8x128xf32>
    %338 = vector.extract_strided_slice %321 {offsets = [0, 256], sizes = [8, 128], strides = [1, 1]} : vector<8x512xf32> to vector<8x128xf32>
    %339 = math.tanh %338 : vector<8x128xf32>
    %340 = vector.extract_strided_slice %321 {offsets = [0, 384], sizes = [8, 128], strides = [1, 1]} : vector<8x512xf32> to vector<8x128xf32>
    %cst_106 = arith.constant 5.000000e-01 : f32
    %341 = vector.broadcast %cst_106 : f32 to vector<8x128xf32>
    %342 = arith.mulf %341, %340 : vector<8x128xf32>
    %343 = math.tanh %342 : vector<8x128xf32>
    %cst_107 = arith.constant 5.000000e-01 : f32
    %344 = vector.broadcast %cst_107 : f32 to vector<8x128xf32>
    %345 = arith.mulf %344, %343 : vector<8x128xf32>
    %cst_108 = arith.constant 5.000000e-01 : f32
    %346 = vector.broadcast %cst_108 : f32 to vector<8x128xf32>
    %347 = arith.addf %345, %346 : vector<8x128xf32>
    %348 = arith.mulf %337, %274 : vector<8x128xf32>
    %349 = arith.mulf %329, %339 : vector<8x128xf32>
    %350 = arith.addf %348, %349 : vector<8x128xf32>
    %351 = math.tanh %350 : vector<8x128xf32>
    %352 = arith.mulf %347, %351 : vector<8x128xf32>
    %353 = tpu.concatenate %352, %313 in 1 : vector<8x128xf32>, vector<8x128xf32> -> vector<8x256xf32>
    %354 = arith.truncf %353 : vector<8x256xf32> to vector<8x256xbf16>
    %c0_109 = arith.constant 0 : index
    %c0_110 = arith.constant 0 : index
    %355 = vector.load %arg3[%c0_109, %c0_110] : memref<256x1024xbf16, #tpu.memory_space<vmem>>, vector<256x1024xbf16>
    %cst_111 = arith.constant dense<0.000000e+00> : vector<8x1024xf32>
    %356 = tpu.matmul %354, %355, %cst_111 {dimension_numbers = #tpu.dot_dimension_numbers<[1], [0], [0], [1], [0, 0, 1, 1], [], []>} : vector<8x256xbf16>, vector<256x1024xbf16>, vector<8x1024xf32> -> vector<8x1024xf32>
    %357 = vector.extract_strided_slice %356 {offsets = [0, 512], sizes = [8, 512], strides = [1, 1]} : vector<8x1024xf32> to vector<8x512xf32>
    %358 = arith.addf %357, %8 : vector<8x512xf32>
    %359 = vector.extract_strided_slice %358 {offsets = [0, 0], sizes = [8, 128], strides = [1, 1]} : vector<8x512xf32> to vector<8x128xf32>
    %cst_112 = arith.constant 5.000000e-01 : f32
    %360 = vector.broadcast %cst_112 : f32 to vector<8x128xf32>
    %361 = arith.mulf %360, %359 : vector<8x128xf32>
    %362 = math.tanh %361 : vector<8x128xf32>
    %cst_113 = arith.constant 5.000000e-01 : f32
    %363 = vector.broadcast %cst_113 : f32 to vector<8x128xf32>
    %364 = arith.mulf %363, %362 : vector<8x128xf32>
    %cst_114 = arith.constant 5.000000e-01 : f32
    %365 = vector.broadcast %cst_114 : f32 to vector<8x128xf32>
    %366 = arith.addf %364, %365 : vector<8x128xf32>
    %367 = vector.extract_strided_slice %358 {offsets = [0, 128], sizes = [8, 128], strides = [1, 1]} : vector<8x512xf32> to vector<8x128xf32>
    %cst_115 = arith.constant 5.000000e-01 : f32
    %368 = vector.broadcast %cst_115 : f32 to vector<8x128xf32>
    %369 = arith.mulf %368, %367 : vector<8x128xf32>
    %370 = math.tanh %369 : vector<8x128xf32>
    %cst_116 = arith.constant 5.000000e-01 : f32
    %371 = vector.broadcast %cst_116 : f32 to vector<8x128xf32>
    %372 = arith.mulf %371, %370 : vector<8x128xf32>
    %cst_117 = arith.constant 5.000000e-01 : f32
    %373 = vector.broadcast %cst_117 : f32 to vector<8x128xf32>
    %374 = arith.addf %372, %373 : vector<8x128xf32>
    %375 = vector.extract_strided_slice %358 {offsets = [0, 256], sizes = [8, 128], strides = [1, 1]} : vector<8x512xf32> to vector<8x128xf32>
    %376 = math.tanh %375 : vector<8x128xf32>
    %377 = vector.extract_strided_slice %358 {offsets = [0, 384], sizes = [8, 128], strides = [1, 1]} : vector<8x512xf32> to vector<8x128xf32>
    %cst_118 = arith.constant 5.000000e-01 : f32
    %378 = vector.broadcast %cst_118 : f32 to vector<8x128xf32>
    %379 = arith.mulf %378, %377 : vector<8x128xf32>
    %380 = math.tanh %379 : vector<8x128xf32>
    %cst_119 = arith.constant 5.000000e-01 : f32
    %381 = vector.broadcast %cst_119 : f32 to vector<8x128xf32>
    %382 = arith.mulf %381, %380 : vector<8x128xf32>
    %cst_120 = arith.constant 5.000000e-01 : f32
    %383 = vector.broadcast %cst_120 : f32 to vector<8x128xf32>
    %384 = arith.addf %382, %383 : vector<8x128xf32>
    %385 = arith.mulf %374, %311 : vector<8x128xf32>
    %386 = arith.mulf %366, %376 : vector<8x128xf32>
    %387 = arith.addf %385, %386 : vector<8x128xf32>
    %388 = math.tanh %387 : vector<8x128xf32>
    %389 = arith.mulf %384, %388 : vector<8x128xf32>
    %390 = vector.extract_strided_slice %356 {offsets = [0, 0], sizes = [8, 512], strides = [1, 1]} : vector<8x1024xf32> to vector<8x512xf32>
    %c5_i32 = arith.constant 5 : i32
    %391 = arith.index_cast %c5_i32 : i32 to index
    %c0_121 = arith.constant 0 : index
    %c0_122 = arith.constant 0 : index
    %392 = vector.load %arg0[%391, %c0_121, %c0_122] : memref<8x8x1xf32, #tpu.memory_space<vmem>>, vector<1x8x1xf32>
    %393 = vector.shape_cast %392 : vector<1x8x1xf32> to vector<8x1xf32>
    %394 = vector.broadcast %393 : vector<8x1xf32> to vector<8x512xf32>
    %395 = arith.mulf %394, %2 : vector<8x512xf32>
    %396 = arith.addf %395, %5 : vector<8x512xf32>
    %397 = arith.addf %396, %390 : vector<8x512xf32>
    %398 = vector.extract_strided_slice %397 {offsets = [0, 0], sizes = [8, 128], strides = [1, 1]} : vector<8x512xf32> to vector<8x128xf32>
    %cst_123 = arith.constant 5.000000e-01 : f32
    %399 = vector.broadcast %cst_123 : f32 to vector<8x128xf32>
    %400 = arith.mulf %399, %398 : vector<8x128xf32>
    %401 = math.tanh %400 : vector<8x128xf32>
    %cst_124 = arith.constant 5.000000e-01 : f32
    %402 = vector.broadcast %cst_124 : f32 to vector<8x128xf32>
    %403 = arith.mulf %402, %401 : vector<8x128xf32>
    %cst_125 = arith.constant 5.000000e-01 : f32
    %404 = vector.broadcast %cst_125 : f32 to vector<8x128xf32>
    %405 = arith.addf %403, %404 : vector<8x128xf32>
    %406 = vector.extract_strided_slice %397 {offsets = [0, 128], sizes = [8, 128], strides = [1, 1]} : vector<8x512xf32> to vector<8x128xf32>
    %cst_126 = arith.constant 5.000000e-01 : f32
    %407 = vector.broadcast %cst_126 : f32 to vector<8x128xf32>
    %408 = arith.mulf %407, %406 : vector<8x128xf32>
    %409 = math.tanh %408 : vector<8x128xf32>
    %cst_127 = arith.constant 5.000000e-01 : f32
    %410 = vector.broadcast %cst_127 : f32 to vector<8x128xf32>
    %411 = arith.mulf %410, %409 : vector<8x128xf32>
    %cst_128 = arith.constant 5.000000e-01 : f32
    %412 = vector.broadcast %cst_128 : f32 to vector<8x128xf32>
    %413 = arith.addf %411, %412 : vector<8x128xf32>
    %414 = vector.extract_strided_slice %397 {offsets = [0, 256], sizes = [8, 128], strides = [1, 1]} : vector<8x512xf32> to vector<8x128xf32>
    %415 = math.tanh %414 : vector<8x128xf32>
    %416 = vector.extract_strided_slice %397 {offsets = [0, 384], sizes = [8, 128], strides = [1, 1]} : vector<8x512xf32> to vector<8x128xf32>
    %cst_129 = arith.constant 5.000000e-01 : f32
    %417 = vector.broadcast %cst_129 : f32 to vector<8x128xf32>
    %418 = arith.mulf %417, %416 : vector<8x128xf32>
    %419 = math.tanh %418 : vector<8x128xf32>
    %cst_130 = arith.constant 5.000000e-01 : f32
    %420 = vector.broadcast %cst_130 : f32 to vector<8x128xf32>
    %421 = arith.mulf %420, %419 : vector<8x128xf32>
    %cst_131 = arith.constant 5.000000e-01 : f32
    %422 = vector.broadcast %cst_131 : f32 to vector<8x128xf32>
    %423 = arith.addf %421, %422 : vector<8x128xf32>
    %424 = arith.mulf %413, %350 : vector<8x128xf32>
    %425 = arith.mulf %405, %415 : vector<8x128xf32>
    %426 = arith.addf %424, %425 : vector<8x128xf32>
    %427 = math.tanh %426 : vector<8x128xf32>
    %428 = arith.mulf %423, %427 : vector<8x128xf32>
    %429 = tpu.concatenate %428, %389 in 1 : vector<8x128xf32>, vector<8x128xf32> -> vector<8x256xf32>
    %430 = arith.truncf %429 : vector<8x256xf32> to vector<8x256xbf16>
    %c0_132 = arith.constant 0 : index
    %c0_133 = arith.constant 0 : index
    %431 = vector.load %arg3[%c0_132, %c0_133] : memref<256x1024xbf16, #tpu.memory_space<vmem>>, vector<256x1024xbf16>
    %cst_134 = arith.constant dense<0.000000e+00> : vector<8x1024xf32>
    %432 = tpu.matmul %430, %431, %cst_134 {dimension_numbers = #tpu.dot_dimension_numbers<[1], [0], [0], [1], [0, 0, 1, 1], [], []>} : vector<8x256xbf16>, vector<256x1024xbf16>, vector<8x1024xf32> -> vector<8x1024xf32>
    %433 = vector.extract_strided_slice %432 {offsets = [0, 512], sizes = [8, 512], strides = [1, 1]} : vector<8x1024xf32> to vector<8x512xf32>
    %434 = arith.addf %433, %8 : vector<8x512xf32>
    %435 = vector.extract_strided_slice %434 {offsets = [0, 0], sizes = [8, 128], strides = [1, 1]} : vector<8x512xf32> to vector<8x128xf32>
    %cst_135 = arith.constant 5.000000e-01 : f32
    %436 = vector.broadcast %cst_135 : f32 to vector<8x128xf32>
    %437 = arith.mulf %436, %435 : vector<8x128xf32>
    %438 = math.tanh %437 : vector<8x128xf32>
    %cst_136 = arith.constant 5.000000e-01 : f32
    %439 = vector.broadcast %cst_136 : f32 to vector<8x128xf32>
    %440 = arith.mulf %439, %438 : vector<8x128xf32>
    %cst_137 = arith.constant 5.000000e-01 : f32
    %441 = vector.broadcast %cst_137 : f32 to vector<8x128xf32>
    %442 = arith.addf %440, %441 : vector<8x128xf32>
    %443 = vector.extract_strided_slice %434 {offsets = [0, 128], sizes = [8, 128], strides = [1, 1]} : vector<8x512xf32> to vector<8x128xf32>
    %cst_138 = arith.constant 5.000000e-01 : f32
    %444 = vector.broadcast %cst_138 : f32 to vector<8x128xf32>
    %445 = arith.mulf %444, %443 : vector<8x128xf32>
    %446 = math.tanh %445 : vector<8x128xf32>
    %cst_139 = arith.constant 5.000000e-01 : f32
    %447 = vector.broadcast %cst_139 : f32 to vector<8x128xf32>
    %448 = arith.mulf %447, %446 : vector<8x128xf32>
    %cst_140 = arith.constant 5.000000e-01 : f32
    %449 = vector.broadcast %cst_140 : f32 to vector<8x128xf32>
    %450 = arith.addf %448, %449 : vector<8x128xf32>
    %451 = vector.extract_strided_slice %434 {offsets = [0, 256], sizes = [8, 128], strides = [1, 1]} : vector<8x512xf32> to vector<8x128xf32>
    %452 = math.tanh %451 : vector<8x128xf32>
    %453 = vector.extract_strided_slice %434 {offsets = [0, 384], sizes = [8, 128], strides = [1, 1]} : vector<8x512xf32> to vector<8x128xf32>
    %cst_141 = arith.constant 5.000000e-01 : f32
    %454 = vector.broadcast %cst_141 : f32 to vector<8x128xf32>
    %455 = arith.mulf %454, %453 : vector<8x128xf32>
    %456 = math.tanh %455 : vector<8x128xf32>
    %cst_142 = arith.constant 5.000000e-01 : f32
    %457 = vector.broadcast %cst_142 : f32 to vector<8x128xf32>
    %458 = arith.mulf %457, %456 : vector<8x128xf32>
    %cst_143 = arith.constant 5.000000e-01 : f32
    %459 = vector.broadcast %cst_143 : f32 to vector<8x128xf32>
    %460 = arith.addf %458, %459 : vector<8x128xf32>
    %461 = arith.mulf %450, %387 : vector<8x128xf32>
    %462 = arith.mulf %442, %452 : vector<8x128xf32>
    %463 = arith.addf %461, %462 : vector<8x128xf32>
    %464 = math.tanh %463 : vector<8x128xf32>
    %465 = arith.mulf %460, %464 : vector<8x128xf32>
    %466 = vector.extract_strided_slice %432 {offsets = [0, 0], sizes = [8, 512], strides = [1, 1]} : vector<8x1024xf32> to vector<8x512xf32>
    %c6_i32 = arith.constant 6 : i32
    %467 = arith.index_cast %c6_i32 : i32 to index
    %c0_144 = arith.constant 0 : index
    %c0_145 = arith.constant 0 : index
    %468 = vector.load %arg0[%467, %c0_144, %c0_145] : memref<8x8x1xf32, #tpu.memory_space<vmem>>, vector<1x8x1xf32>
    %469 = vector.shape_cast %468 : vector<1x8x1xf32> to vector<8x1xf32>
    %470 = vector.broadcast %469 : vector<8x1xf32> to vector<8x512xf32>
    %471 = arith.mulf %470, %2 : vector<8x512xf32>
    %472 = arith.addf %471, %5 : vector<8x512xf32>
    %473 = arith.addf %472, %466 : vector<8x512xf32>
    %474 = vector.extract_strided_slice %473 {offsets = [0, 0], sizes = [8, 128], strides = [1, 1]} : vector<8x512xf32> to vector<8x128xf32>
    %cst_146 = arith.constant 5.000000e-01 : f32
    %475 = vector.broadcast %cst_146 : f32 to vector<8x128xf32>
    %476 = arith.mulf %475, %474 : vector<8x128xf32>
    %477 = math.tanh %476 : vector<8x128xf32>
    %cst_147 = arith.constant 5.000000e-01 : f32
    %478 = vector.broadcast %cst_147 : f32 to vector<8x128xf32>
    %479 = arith.mulf %478, %477 : vector<8x128xf32>
    %cst_148 = arith.constant 5.000000e-01 : f32
    %480 = vector.broadcast %cst_148 : f32 to vector<8x128xf32>
    %481 = arith.addf %479, %480 : vector<8x128xf32>
    %482 = vector.extract_strided_slice %473 {offsets = [0, 128], sizes = [8, 128], strides = [1, 1]} : vector<8x512xf32> to vector<8x128xf32>
    %cst_149 = arith.constant 5.000000e-01 : f32
    %483 = vector.broadcast %cst_149 : f32 to vector<8x128xf32>
    %484 = arith.mulf %483, %482 : vector<8x128xf32>
    %485 = math.tanh %484 : vector<8x128xf32>
    %cst_150 = arith.constant 5.000000e-01 : f32
    %486 = vector.broadcast %cst_150 : f32 to vector<8x128xf32>
    %487 = arith.mulf %486, %485 : vector<8x128xf32>
    %cst_151 = arith.constant 5.000000e-01 : f32
    %488 = vector.broadcast %cst_151 : f32 to vector<8x128xf32>
    %489 = arith.addf %487, %488 : vector<8x128xf32>
    %490 = vector.extract_strided_slice %473 {offsets = [0, 256], sizes = [8, 128], strides = [1, 1]} : vector<8x512xf32> to vector<8x128xf32>
    %491 = math.tanh %490 : vector<8x128xf32>
    %492 = vector.extract_strided_slice %473 {offsets = [0, 384], sizes = [8, 128], strides = [1, 1]} : vector<8x512xf32> to vector<8x128xf32>
    %cst_152 = arith.constant 5.000000e-01 : f32
    %493 = vector.broadcast %cst_152 : f32 to vector<8x128xf32>
    %494 = arith.mulf %493, %492 : vector<8x128xf32>
    %495 = math.tanh %494 : vector<8x128xf32>
    %cst_153 = arith.constant 5.000000e-01 : f32
    %496 = vector.broadcast %cst_153 : f32 to vector<8x128xf32>
    %497 = arith.mulf %496, %495 : vector<8x128xf32>
    %cst_154 = arith.constant 5.000000e-01 : f32
    %498 = vector.broadcast %cst_154 : f32 to vector<8x128xf32>
    %499 = arith.addf %497, %498 : vector<8x128xf32>
    %500 = arith.mulf %489, %426 : vector<8x128xf32>
    %501 = arith.mulf %481, %491 : vector<8x128xf32>
    %502 = arith.addf %500, %501 : vector<8x128xf32>
    %503 = math.tanh %502 : vector<8x128xf32>
    %504 = arith.mulf %499, %503 : vector<8x128xf32>
    %505 = tpu.concatenate %504, %465 in 1 : vector<8x128xf32>, vector<8x128xf32> -> vector<8x256xf32>
    %506 = arith.truncf %505 : vector<8x256xf32> to vector<8x256xbf16>
    %c0_155 = arith.constant 0 : index
    %c0_156 = arith.constant 0 : index
    %507 = vector.load %arg3[%c0_155, %c0_156] : memref<256x1024xbf16, #tpu.memory_space<vmem>>, vector<256x1024xbf16>
    %cst_157 = arith.constant dense<0.000000e+00> : vector<8x1024xf32>
    %508 = tpu.matmul %506, %507, %cst_157 {dimension_numbers = #tpu.dot_dimension_numbers<[1], [0], [0], [1], [0, 0, 1, 1], [], []>} : vector<8x256xbf16>, vector<256x1024xbf16>, vector<8x1024xf32> -> vector<8x1024xf32>
    %509 = vector.extract_strided_slice %508 {offsets = [0, 512], sizes = [8, 512], strides = [1, 1]} : vector<8x1024xf32> to vector<8x512xf32>
    %510 = arith.addf %509, %8 : vector<8x512xf32>
    %511 = vector.extract_strided_slice %510 {offsets = [0, 0], sizes = [8, 128], strides = [1, 1]} : vector<8x512xf32> to vector<8x128xf32>
    %cst_158 = arith.constant 5.000000e-01 : f32
    %512 = vector.broadcast %cst_158 : f32 to vector<8x128xf32>
    %513 = arith.mulf %512, %511 : vector<8x128xf32>
    %514 = math.tanh %513 : vector<8x128xf32>
    %cst_159 = arith.constant 5.000000e-01 : f32
    %515 = vector.broadcast %cst_159 : f32 to vector<8x128xf32>
    %516 = arith.mulf %515, %514 : vector<8x128xf32>
    %cst_160 = arith.constant 5.000000e-01 : f32
    %517 = vector.broadcast %cst_160 : f32 to vector<8x128xf32>
    %518 = arith.addf %516, %517 : vector<8x128xf32>
    %519 = vector.extract_strided_slice %510 {offsets = [0, 128], sizes = [8, 128], strides = [1, 1]} : vector<8x512xf32> to vector<8x128xf32>
    %cst_161 = arith.constant 5.000000e-01 : f32
    %520 = vector.broadcast %cst_161 : f32 to vector<8x128xf32>
    %521 = arith.mulf %520, %519 : vector<8x128xf32>
    %522 = math.tanh %521 : vector<8x128xf32>
    %cst_162 = arith.constant 5.000000e-01 : f32
    %523 = vector.broadcast %cst_162 : f32 to vector<8x128xf32>
    %524 = arith.mulf %523, %522 : vector<8x128xf32>
    %cst_163 = arith.constant 5.000000e-01 : f32
    %525 = vector.broadcast %cst_163 : f32 to vector<8x128xf32>
    %526 = arith.addf %524, %525 : vector<8x128xf32>
    %527 = vector.extract_strided_slice %510 {offsets = [0, 256], sizes = [8, 128], strides = [1, 1]} : vector<8x512xf32> to vector<8x128xf32>
    %528 = math.tanh %527 : vector<8x128xf32>
    %529 = vector.extract_strided_slice %510 {offsets = [0, 384], sizes = [8, 128], strides = [1, 1]} : vector<8x512xf32> to vector<8x128xf32>
    %cst_164 = arith.constant 5.000000e-01 : f32
    %530 = vector.broadcast %cst_164 : f32 to vector<8x128xf32>
    %531 = arith.mulf %530, %529 : vector<8x128xf32>
    %532 = math.tanh %531 : vector<8x128xf32>
    %cst_165 = arith.constant 5.000000e-01 : f32
    %533 = vector.broadcast %cst_165 : f32 to vector<8x128xf32>
    %534 = arith.mulf %533, %532 : vector<8x128xf32>
    %cst_166 = arith.constant 5.000000e-01 : f32
    %535 = vector.broadcast %cst_166 : f32 to vector<8x128xf32>
    %536 = arith.addf %534, %535 : vector<8x128xf32>
    %537 = arith.mulf %526, %463 : vector<8x128xf32>
    %538 = arith.mulf %518, %528 : vector<8x128xf32>
    %539 = arith.addf %537, %538 : vector<8x128xf32>
    %540 = math.tanh %539 : vector<8x128xf32>
    %541 = arith.mulf %536, %540 : vector<8x128xf32>
    %542 = vector.extract_strided_slice %508 {offsets = [0, 0], sizes = [8, 512], strides = [1, 1]} : vector<8x1024xf32> to vector<8x512xf32>
    %c7_i32 = arith.constant 7 : i32
    %543 = arith.index_cast %c7_i32 : i32 to index
    %c0_167 = arith.constant 0 : index
    %c0_168 = arith.constant 0 : index
    %544 = vector.load %arg0[%543, %c0_167, %c0_168] : memref<8x8x1xf32, #tpu.memory_space<vmem>>, vector<1x8x1xf32>
    %545 = vector.shape_cast %544 : vector<1x8x1xf32> to vector<8x1xf32>
    %546 = vector.broadcast %545 : vector<8x1xf32> to vector<8x512xf32>
    %547 = arith.mulf %546, %2 : vector<8x512xf32>
    %548 = arith.addf %547, %5 : vector<8x512xf32>
    %549 = arith.addf %548, %542 : vector<8x512xf32>
    %550 = vector.extract_strided_slice %549 {offsets = [0, 0], sizes = [8, 128], strides = [1, 1]} : vector<8x512xf32> to vector<8x128xf32>
    %cst_169 = arith.constant 5.000000e-01 : f32
    %551 = vector.broadcast %cst_169 : f32 to vector<8x128xf32>
    %552 = arith.mulf %551, %550 : vector<8x128xf32>
    %553 = math.tanh %552 : vector<8x128xf32>
    %cst_170 = arith.constant 5.000000e-01 : f32
    %554 = vector.broadcast %cst_170 : f32 to vector<8x128xf32>
    %555 = arith.mulf %554, %553 : vector<8x128xf32>
    %cst_171 = arith.constant 5.000000e-01 : f32
    %556 = vector.broadcast %cst_171 : f32 to vector<8x128xf32>
    %557 = arith.addf %555, %556 : vector<8x128xf32>
    %558 = vector.extract_strided_slice %549 {offsets = [0, 128], sizes = [8, 128], strides = [1, 1]} : vector<8x512xf32> to vector<8x128xf32>
    %cst_172 = arith.constant 5.000000e-01 : f32
    %559 = vector.broadcast %cst_172 : f32 to vector<8x128xf32>
    %560 = arith.mulf %559, %558 : vector<8x128xf32>
    %561 = math.tanh %560 : vector<8x128xf32>
    %cst_173 = arith.constant 5.000000e-01 : f32
    %562 = vector.broadcast %cst_173 : f32 to vector<8x128xf32>
    %563 = arith.mulf %562, %561 : vector<8x128xf32>
    %cst_174 = arith.constant 5.000000e-01 : f32
    %564 = vector.broadcast %cst_174 : f32 to vector<8x128xf32>
    %565 = arith.addf %563, %564 : vector<8x128xf32>
    %566 = vector.extract_strided_slice %549 {offsets = [0, 256], sizes = [8, 128], strides = [1, 1]} : vector<8x512xf32> to vector<8x128xf32>
    %567 = math.tanh %566 : vector<8x128xf32>
    %568 = vector.extract_strided_slice %549 {offsets = [0, 384], sizes = [8, 128], strides = [1, 1]} : vector<8x512xf32> to vector<8x128xf32>
    %cst_175 = arith.constant 5.000000e-01 : f32
    %569 = vector.broadcast %cst_175 : f32 to vector<8x128xf32>
    %570 = arith.mulf %569, %568 : vector<8x128xf32>
    %571 = math.tanh %570 : vector<8x128xf32>
    %cst_176 = arith.constant 5.000000e-01 : f32
    %572 = vector.broadcast %cst_176 : f32 to vector<8x128xf32>
    %573 = arith.mulf %572, %571 : vector<8x128xf32>
    %cst_177 = arith.constant 5.000000e-01 : f32
    %574 = vector.broadcast %cst_177 : f32 to vector<8x128xf32>
    %575 = arith.addf %573, %574 : vector<8x128xf32>
    %576 = arith.mulf %565, %502 : vector<8x128xf32>
    %577 = arith.mulf %557, %567 : vector<8x128xf32>
    %578 = arith.addf %576, %577 : vector<8x128xf32>
    %579 = math.tanh %578 : vector<8x128xf32>
    %580 = arith.mulf %575, %579 : vector<8x128xf32>
    %581 = tpu.concatenate %580, %541 in 1 : vector<8x128xf32>, vector<8x128xf32> -> vector<8x256xf32>
    %582 = arith.truncf %581 : vector<8x256xf32> to vector<8x256xbf16>
    %c0_178 = arith.constant 0 : index
    %c0_179 = arith.constant 0 : index
    %583 = vector.load %arg3[%c0_178, %c0_179] : memref<256x1024xbf16, #tpu.memory_space<vmem>>, vector<256x1024xbf16>
    %cst_180 = arith.constant dense<0.000000e+00> : vector<8x1024xf32>
    %584 = tpu.matmul %582, %583, %cst_180 {dimension_numbers = #tpu.dot_dimension_numbers<[1], [0], [0], [1], [0, 0, 1, 1], [], []>} : vector<8x256xbf16>, vector<256x1024xbf16>, vector<8x1024xf32> -> vector<8x1024xf32>
    %585 = vector.extract_strided_slice %584 {offsets = [0, 512], sizes = [8, 512], strides = [1, 1]} : vector<8x1024xf32> to vector<8x512xf32>
    %586 = arith.addf %585, %8 : vector<8x512xf32>
    %587 = vector.extract_strided_slice %586 {offsets = [0, 0], sizes = [8, 128], strides = [1, 1]} : vector<8x512xf32> to vector<8x128xf32>
    %cst_181 = arith.constant 5.000000e-01 : f32
    %588 = vector.broadcast %cst_181 : f32 to vector<8x128xf32>
    %589 = arith.mulf %588, %587 : vector<8x128xf32>
    %590 = math.tanh %589 : vector<8x128xf32>
    %cst_182 = arith.constant 5.000000e-01 : f32
    %591 = vector.broadcast %cst_182 : f32 to vector<8x128xf32>
    %592 = arith.mulf %591, %590 : vector<8x128xf32>
    %cst_183 = arith.constant 5.000000e-01 : f32
    %593 = vector.broadcast %cst_183 : f32 to vector<8x128xf32>
    %594 = arith.addf %592, %593 : vector<8x128xf32>
    %595 = vector.extract_strided_slice %586 {offsets = [0, 128], sizes = [8, 128], strides = [1, 1]} : vector<8x512xf32> to vector<8x128xf32>
    %cst_184 = arith.constant 5.000000e-01 : f32
    %596 = vector.broadcast %cst_184 : f32 to vector<8x128xf32>
    %597 = arith.mulf %596, %595 : vector<8x128xf32>
    %598 = math.tanh %597 : vector<8x128xf32>
    %cst_185 = arith.constant 5.000000e-01 : f32
    %599 = vector.broadcast %cst_185 : f32 to vector<8x128xf32>
    %600 = arith.mulf %599, %598 : vector<8x128xf32>
    %cst_186 = arith.constant 5.000000e-01 : f32
    %601 = vector.broadcast %cst_186 : f32 to vector<8x128xf32>
    %602 = arith.addf %600, %601 : vector<8x128xf32>
    %603 = vector.extract_strided_slice %586 {offsets = [0, 256], sizes = [8, 128], strides = [1, 1]} : vector<8x512xf32> to vector<8x128xf32>
    %604 = math.tanh %603 : vector<8x128xf32>
    %605 = vector.extract_strided_slice %586 {offsets = [0, 384], sizes = [8, 128], strides = [1, 1]} : vector<8x512xf32> to vector<8x128xf32>
    %cst_187 = arith.constant 5.000000e-01 : f32
    %606 = vector.broadcast %cst_187 : f32 to vector<8x128xf32>
    %607 = arith.mulf %606, %605 : vector<8x128xf32>
    %608 = math.tanh %607 : vector<8x128xf32>
    %cst_188 = arith.constant 5.000000e-01 : f32
    %609 = vector.broadcast %cst_188 : f32 to vector<8x128xf32>
    %610 = arith.mulf %609, %608 : vector<8x128xf32>
    %cst_189 = arith.constant 5.000000e-01 : f32
    %611 = vector.broadcast %cst_189 : f32 to vector<8x128xf32>
    %612 = arith.addf %610, %611 : vector<8x128xf32>
    %613 = arith.mulf %602, %539 : vector<8x128xf32>
    %614 = arith.mulf %594, %604 : vector<8x128xf32>
    %615 = arith.addf %613, %614 : vector<8x128xf32>
    %616 = math.tanh %615 : vector<8x128xf32>
    %617 = arith.mulf %612, %616 : vector<8x128xf32>
    %618 = vector.extract_strided_slice %584 {offsets = [0, 0], sizes = [8, 512], strides = [1, 1]} : vector<8x1024xf32> to vector<8x512xf32>
    %c8_i32 = arith.constant 8 : i32
    %619 = arith.truncf %617 : vector<8x128xf32> to vector<8x128xbf16>
    %c0_190 = arith.constant 0 : index
    %c0_191 = arith.constant 0 : index
    %620 = vector.load %arg5[%c0_190, %c0_191] : memref<128x128xbf16, #tpu.memory_space<vmem>>, vector<128x128xbf16>
    %cst_192 = arith.constant dense<0.000000e+00> : vector<8x128xf32>
    %621 = tpu.matmul %619, %620, %cst_192 {dimension_numbers = #tpu.dot_dimension_numbers<[1], [0], [0], [1], [0, 0, 1, 1], [], []>} : vector<8x128xbf16>, vector<128x128xbf16>, vector<8x128xf32> -> vector<8x128xf32>
    %c0_193 = arith.constant 0 : index
    %c0_194 = arith.constant 0 : index
    %622 = vector.load %arg6[%c0_193, %c0_194] : memref<1x128xf32, #tpu.memory_space<vmem>>, vector<1x128xf32>
    %623 = vector.broadcast %622 : vector<1x128xf32> to vector<8x128xf32>
    %624 = arith.addf %621, %623 : vector<8x128xf32>
    %c0_195 = arith.constant 0 : index
    %c0_196 = arith.constant 0 : index
    %625 = vector.load %arg7[%c0_195, %c0_196] : memref<8x128xf32, #tpu.memory_space<vmem>>, vector<8x128xf32>
    tpu.vector_store %arg7[%c0_195, %c0_196], %624 {strides = array<i32>} : memref<8x128xf32, #tpu.memory_space<vmem>>, vector<8x128xf32>,
    return
  }
}

</mosaic_0001>

<bundles_post_ra>
// kernel: lstm_forward.1
= control target key start
LH: loop header
LB: loop body
LE: loop exit
PB: predicated region body
PF: predicated region fallthrough
CT: control target
= control target key end

     0   :  { %12 = vsyncpa [#allocation3], 0  ;;  %s3084_s24 = smov [#allocation2]   ;;  %s4680_s0 = inlined_call_operand.vmem [shape: f32[8,8,1], index: 0, kind: input, shape index: {}]   ;;  %s4681_s1 = inlined_call_operand.vmem [shape: f32[1,512], index: 1, kind: input, shape index: {}]   ;;  %s4682_s2 = inlined_call_operand.vmem [shape: f32[1,512], index: 2, kind: input, shape index: {}]   ;;  %s4683_s3 = inlined_call_operand.hbm [shape: bf16[256,1024], index: 3, kind: input, shape index: {}]   ;;  %s4684_s4 = inlined_call_operand.vmem [shape: f32[1,512], index: 4, kind: input, shape index: {}]   ;;  %s4685_s5 = inlined_call_operand.vmem [shape: bf16[128,128], index: 5, kind: input, shape index: {}]   ;;  %s4686_s6 = inlined_call_operand.vmem [shape: f32[1,128], index: 6, kind: input, shape index: {}]   ;;  %s4687_s7 = inlined_call_operand.vmem [shape: f32[8,128], index: 7, kind: output, shape index: {}]  }
   0x1   :  { %s24_s25 = sshll.u32 %s3084_s24, 4  ;;  %s3060_s28 = scalar_lea.hbm %s4683_s3, 16384  ;;  %s25_s25 = int_to_ptr.vmem [resolvable:$true] %s24_s25 }
   0x2   :  { %p3061_p0 = scmp.ne.s32.totalorder %s4683_s3, %s3060_s28  ;;  %p3064_p1 = scmp.lt.u32.totalorder %s3060_s28, %s4683_s3 }
   0x4   :  { %p3066_p2 = pnand %p3064_p1, %p3061_p0 }
   0x6   :  { %3069 = shalt.err (!%p3066_p2)
}
   0x7   :  { %s3070_s10 = scalar_lea.vmem %s25_s25, 16384  ;;  %p3075_p4 = scmp.lt.s32.totalorder %s25_s25, %s25_s25 }
   0x8   :  { %p3071_p3 = scmp.ne.s32.totalorder %s25_s25, %s3070_s10  ;;  %p3076_p5 = scmp.lt.s32.totalorder %s3070_s10, %s3070_s10 }
   0xa   :  { %p3077_p6 = por %p3076_p5, %p3075_p4 }
   0xc   :  { %p3078_p7 = pnand %p3077_p6, %p3071_p3 }
   0xe   :  { %3081 = shalt.err (!%p3078_p7)
}
   0xf   :  { %s3085_s11 = smov 512   ;;  %s3086_s12 = smov 32  }
  0x10   :  { %30 = dma.hbm_to_vmem [thread:$0]  %s4683_s3, 16384, %s25_s25, [#allocation3], %s3085_s11, %s3085_s11, %s3086_s12  }
  0x11   :  { %3082 = dma.done.wait [#allocation3], 16384  }
  0x12   :  { %3083 = vsyncadd [#allocation3], 4294950912  ;;  %v3087_v0 = vmov 0   ;;  %v107_v1 = vld [vmem:[%s4680_s0] sm:$0xff]  ;;  %v2838_v2 = vld [vmem:[%s4680_s0 + $0x8] sm:$0xff]  ;;  %vm3090_vm0 = vmmov 0  }
  0x13   :  { %2890 = vset.pattern.permute.xlu0 %v3087_v0  ;;  %2891 = vset.pattern.permute.xlu1 %v3087_v0  ;;  %v145_v3 = vld [vmem:[#allocation2] sm:$0xff]  ;;  %v146_v6 = vld [vmem:[#allocation2 + $0x8] sm:$0xff]  ;;  %v2843_v30 = vld [vmem:[%s4680_s0 + $0x30] sm:$0xff] }
  0x14   :  { %110 = vperm.xlu0 %2890, %v107_v1   ;;  %v149_v4 = vld [vmem:[#allocation2 + $0x20] sm:$0xff]  ;;  %v150_v7 = vld [vmem:[#allocation2 + $0x28] sm:$0xff] }
  0x15   :  { %v3149_v5 = vcombine.high %v145_v3, %v149_v4  ;;  %v3151_v8 = vcombine.low %v145_v3, %v149_v4  ;;  %v153_v9 = vld [vmem:[#allocation2 + $0x40] sm:$0xff]  ;;  %v3153_v10 = vcombine.high %v146_v6, %v150_v7  ;;  %v3155_v11 = vcombine.low %v146_v6, %v150_v7  ;;  %v154_v13 = vld [vmem:[#allocation2 + $0x48] sm:$0xff] }
  0x16   :  { %v157_v12 = vld [vmem:[#allocation2 + $0x60] sm:$0xff]  ;;  %v158_v14 = vld [vmem:[#allocation2 + $0x68] sm:$0xff] }
  0x17   :  { %4997 = vst [vmem:[#allocation5_spill] sm:$0xff] %v3149_v5  ;;  %4998 = vst [vmem:[#allocation6_spill] sm:$0xff] %v3151_v8  ;;  %913 = vmatprep.subr.bf16.mxu0 %v3149_v5  ;;  %v3158_v15 = vcombine.high %v153_v9, %v157_v12  ;;  %v3160_v16 = vcombine.high %v154_v13, %v158_v14  ;;  %v161_v17 = vld [vmem:[#allocation2 + $0x80] sm:$0xff]  ;;  %v162_v19 = vld [vmem:[#allocation2 + $0x88] sm:$0xff]  ;;  %954 = vmatprep.subr.bf16.mxu1 %v3153_v10 }
  0x18   :  { %4999 = vst [vmem:[#allocation7_spill] sm:$0xff] %v3153_v10  ;;  %5000 = vst [vmem:[#allocation8_spill] sm:$0xff] %v3155_v11  ;;  %v165_v18 = vld [vmem:[#allocation2 + $0xa0] sm:$0xff]  ;;  %1103 = vperm.xlu0 %2890, %v2838_v2   ;;  %v166_v20 = vld [vmem:[#allocation2 + $0xa8] sm:$0xff]  ;;  %914 = vmatpush1.bf16.msra.mxu0 %v3151_v8  ;;  %v3168_v22 = vcombine.low %v153_v9, %v157_v12  ;;  %v3170_v23 = vcombine.low %v154_v13, %v158_v14  ;;  %v4688_v9 = vmov 0.0|0.0  }
  0x19   :  { %5001 = vst [vmem:[#allocation9_spill] sm:$0xff] %v3158_v15  ;;  %5002 = vst [vmem:[#allocation10_spill] sm:$0xff] %v3160_v16  ;;  %v2841_v21 = vld [vmem:[%s4680_s0 + $0x20] sm:$0xff]  ;;  %955 = vmatpush1.bf16.msra.mxu1 %v3155_v11  ;;  %915 = vmatprep.subr.bf16.mxu0 %v3158_v15  ;;  %v3174_v24 = vcombine.high %v161_v17, %v165_v18  ;;  %v3176_v25 = vcombine.high %v162_v19, %v166_v20  ;;  %v170_v28 = vld [vmem:[#allocation2 + $0xc8] sm:$0xff] }
  0x1a   :  { %5003 = vst [vmem:[#allocation11_spill] sm:$0xff] %v3168_v22  ;;  %5004 = vst [vmem:[#allocation12_spill] sm:$0xff] %v3170_v23  ;;  %956 = vmatprep.subr.bf16.mxu1 %v3160_v16  ;;  %v169_v26 = vld [vmem:[#allocation2 + $0xc0] sm:$0xff]  ;;  %v174_v29 = vld [vmem:[#allocation2 + $0xe8] sm:$0xff]  ;;  %v3183_v31 = vcombine.low %v161_v17, %v165_v18  ;;  %v3185_v32 = vcombine.low %v162_v19, %v166_v20  ;;  %945 = vmatprep.mubr.bf16.mxu0 %v4688_v9 }
  0x1b   :  { %5005 = vst [vmem:[#allocation13_spill] sm:$0xff] %v3174_v24  ;;  %5006 = vst [vmem:[#allocation14_spill] sm:$0xff] %v3176_v25  ;;  %v173_v27 = vld [vmem:[#allocation2 + $0xe0] sm:$0xff]  ;;  %v3191_v34 = vcombine.high %v170_v28, %v174_v29  ;;  %v178_v37 = vld [vmem:[#allocation2 + $0x108] sm:$0xff]  ;;  %v3197_v40 = vcombine.low %v170_v28, %v174_v29  ;;  %986 = vmatprep.mubr.bf16.mxu1 %v4688_v9 }
  0x1c   :  { %1778 = vperm.xlu0 %2890, %v2841_v21   ;;  %916 = vmatpush1.bf16.msra.mxu0 %v3168_v22  ;;  %5007 = vst [vmem:[#allocation15_spill] sm:$0xff] %v3183_v31  ;;  %5008 = vst [vmem:[#allocation16_spill] sm:$0xff] %v3185_v32  ;;  %v3189_v33 = vcombine.high %v169_v26, %v173_v27  ;;  %v177_v35 = vld [vmem:[#allocation2 + $0x100] sm:$0xff]  ;;  %v182_v38 = vld [vmem:[#allocation2 + $0x128] sm:$0xff]  ;;  %v3195_v39 = vcombine.low %v169_v26, %v173_v27 }
  0x1d   :  { %957 = vmatpush1.bf16.msra.mxu1 %v3170_v23  ;;  %917 = vmatprep.subr.bf16.mxu0 %v3174_v24  ;;  %5010 = vst [vmem:[#allocation18_spill] sm:$0xff] %v3191_v34  ;;  %v181_v36 = vld [vmem:[#allocation2 + $0x120] sm:$0xff]  ;;  %5012 = vst [vmem:[#allocation20_spill] sm:$0xff] %v3197_v40  ;;  %v3203_v42 = vcombine.high %v178_v37, %v182_v38  ;;  %v186_v45 = vld [vmem:[#allocation2 + $0x148] sm:$0xff]  ;;  %v3209_v48 = vcombine.low %v178_v37, %v182_v38 }
  0x1e   :  { %958 = vmatprep.subr.bf16.mxu1 %v3176_v25  ;;  %5009 = vst [vmem:[#allocation17_spill] sm:$0xff] %v3189_v33  ;;  %5011 = vst [vmem:[#allocation19_spill] sm:$0xff] %v3195_v39  ;;  %v3201_v41 = vcombine.high %v177_v35, %v181_v36  ;;  %v185_v43 = vld [vmem:[#allocation2 + $0x140] sm:$0xff]  ;;  %v190_v46 = vld [vmem:[#allocation2 + $0x168] sm:$0xff]  ;;  %v3207_v47 = vcombine.low %v177_v35, %v181_v36 }
  0x1f   :  { %5014 = vst [vmem:[#allocation22_spill] sm:$0xff] %v3203_v42  ;;  %v189_v44 = vld [vmem:[#allocation2 + $0x160] sm:$0xff]  ;;  %5016 = vst [vmem:[#allocation24_spill] sm:$0xff] %v3209_v48  ;;  %v3215_v50 = vcombine.high %v186_v45, %v190_v46  ;;  %v194_v53 = vld [vmem:[#allocation2 + $0x188] sm:$0xff]  ;;  %v3221_v56 = vcombine.low %v186_v45, %v190_v46 }
  0x20   :  { %2228 = vperm.xlu0 %2890, %v2843_v30   ;;  %918 = vmatpush1.bf16.msra.mxu0 %v3183_v31  ;;  %5013 = vst [vmem:[#allocation21_spill] sm:$0xff] %v3201_v41  ;;  %5015 = vst [vmem:[#allocation23_spill] sm:$0xff] %v3207_v47  ;;  %v3213_v49 = vcombine.high %v185_v43, %v189_v44  ;;  %v193_v51 = vld [vmem:[#allocation2 + $0x180] sm:$0xff]  ;;  %v198_v54 = vld [vmem:[#allocation2 + $0x1a8] sm:$0xff]  ;;  %v3219_v55 = vcombine.low %v185_v43, %v189_v44 }
  0x21   :  { %959 = vmatpush1.bf16.msra.mxu1 %v3185_v32  ;;  %919 = vmatprep.subr.bf16.mxu0 %v3189_v33  ;;  %5018 = vst [vmem:[#allocation26_spill] sm:$0xff] %v3215_v50  ;;  %v197_v52 = vld [vmem:[#allocation2 + $0x1a0] sm:$0xff]  ;;  %5020 = vst [vmem:[#allocation28_spill] sm:$0xff] %v3221_v56  ;;  %v3227_v58 = vcombine.high %v194_v53, %v198_v54  ;;  %v202_v61 = vld [vmem:[#allocation2 + $0x1c8] sm:$0xff]  ;;  %v3233_v0 = vcombine.low %v194_v53, %v198_v54 }
  0x22   :  { %960 = vmatprep.subr.bf16.mxu1 %v3191_v34  ;;  %5017 = vst [vmem:[#allocation25_spill] sm:$0xff] %v3213_v49  ;;  %5019 = vst [vmem:[#allocation27_spill] sm:$0xff] %v3219_v55  ;;  %v3225_v57 = vcombine.high %v193_v51, %v197_v52  ;;  %v201_v59 = vld [vmem:[#allocation2 + $0x1c0] sm:$0xff]  ;;  %v206_v62 = vld [vmem:[#allocation2 + $0x1e8] sm:$0xff]  ;;  %v3231_v63 = vcombine.low %v193_v51, %v197_v52 }
  0x23   :  { %5022 = vst [vmem:[#allocation30_spill] sm:$0xff] %v3227_v58  ;;  %v205_v60 = vld [vmem:[#allocation2 + $0x1e0] sm:$0xff]  ;;  %5024 = vst [vmem:[#allocation32_spill] sm:$0xff] %v3233_v0  ;;  %v3239_v2 = vcombine.high %v202_v61, %v206_v62  ;;  %v210_v6 = vld [vmem:[#allocation2 + $0x208] sm:$0xff]  ;;  %v3247_v13 = vcombine.low %v202_v61, %v206_v62 }
  0x24   :  { %920 = vmatpush1.bf16.msra.mxu0 %v3195_v39  ;;  %5021 = vst [vmem:[#allocation29_spill] sm:$0xff] %v3225_v57  ;;  %5023 = vst [vmem:[#allocation31_spill] sm:$0xff] %v3231_v63  ;;  %v3237_v1 = vcombine.high %v201_v59, %v205_v60  ;;  %v209_v3 = vld [vmem:[#allocation2 + $0x200] sm:$0xff]  ;;  %v214_v7 = vld [vmem:[#allocation2 + $0x228] sm:$0xff]  ;;  %v3245_v12 = vcombine.low %v201_v59, %v205_v60 }
  0x25   :  { %961 = vmatpush1.bf16.msra.mxu1 %v3197_v40  ;;  %921 = vmatprep.subr.bf16.mxu0 %v3201_v41  ;;  %5026 = vst [vmem:[#allocation34_spill] sm:$0xff] %v3239_v2  ;;  %v213_v4 = vld [vmem:[#allocation2 + $0x220] sm:$0xff]  ;;  %5028 = vst [vmem:[#allocation36_spill] sm:$0xff] %v3247_v13  ;;  %v3253_v17 = vcombine.high %v210_v6, %v214_v7  ;;  %v218_v20 = vld [vmem:[#allocation2 + $0x248] sm:$0xff]  ;;  %v3259_v27 = vcombine.low %v210_v6, %v214_v7 }
  0x26   :  { %962 = vmatprep.subr.bf16.mxu1 %v3203_v42  ;;  %5025 = vst [vmem:[#allocation33_spill] sm:$0xff] %v3237_v1  ;;  %5027 = vst [vmem:[#allocation35_spill] sm:$0xff] %v3245_v12  ;;  %v3251_v14 = vcombine.high %v209_v3, %v213_v4  ;;  %v217_v18 = vld [vmem:[#allocation2 + $0x240] sm:$0xff]  ;;  %v222_v21 = vld [vmem:[#allocation2 + $0x268] sm:$0xff]  ;;  %v3257_v26 = vcombine.low %v209_v3, %v213_v4 }
  0x27   :  { %5030 = vst [vmem:[#allocation38_spill] sm:$0xff] %v3253_v17  ;;  %v221_v19 = vld [vmem:[#allocation2 + $0x260] sm:$0xff]  ;;  %5032 = vst [vmem:[#allocation40_spill] sm:$0xff] %v3259_v27  ;;  %v3265_v29 = vcombine.high %v218_v20, %v222_v21  ;;  %v226_v36 = vld [vmem:[#allocation2 + $0x288] sm:$0xff]  ;;  %v3273_v44 = vcombine.low %v218_v20, %v222_v21 }
  0x28   :  { %922 = vmatpush1.bf16.msra.mxu0 %v3207_v47  ;;  %5029 = vst [vmem:[#allocation37_spill] sm:$0xff] %v3251_v14  ;;  %5031 = vst [vmem:[#allocation39_spill] sm:$0xff] %v3257_v26  ;;  %v3263_v28 = vcombine.high %v217_v18, %v221_v19  ;;  %v225_v30 = vld [vmem:[#allocation2 + $0x280] sm:$0xff]  ;;  %v230_v37 = vld [vmem:[#allocation2 + $0x2a8] sm:$0xff]  ;;  %v3271_v43 = vcombine.low %v217_v18, %v221_v19 }
  0x29   :  { %963 = vmatpush1.bf16.msra.mxu1 %v3209_v48  ;;  %923 = vmatprep.subr.bf16.mxu0 %v3213_v49  ;;  %5034 = vst [vmem:[#allocation42_spill] sm:$0xff] %v3265_v29  ;;  %v229_v35 = vld [vmem:[#allocation2 + $0x2a0] sm:$0xff]  ;;  %v3267_v38 = vld [vmem:[#allocation2 + $0x10] sm:$0xff]  ;;  %5036 = vst [vmem:[#allocation44_spill] sm:$0xff] %v3273_v44  ;;  %v3285_v53 = vcombine.high %v226_v36, %v230_v37  ;;  %v3299_v6 = vcombine.low %v226_v36, %v230_v37 }
  0x2a   :  { %964 = vmatprep.subr.bf16.mxu1 %v3215_v50  ;;  %5033 = vst [vmem:[#allocation41_spill] sm:$0xff] %v3263_v28  ;;  %5035 = vst [vmem:[#allocation43_spill] sm:$0xff] %v3271_v43  ;;  %v3275_v45 = vld [vmem:[#allocation2 + $0x30] sm:$0xff]  ;;  %v3277_v46 = vld [vmem:[#allocation2 + $0x18] sm:$0xff]  ;;  %v3283_v52 = vcombine.high %v225_v30, %v229_v35  ;;  %v3297_v4 = vcombine.low %v225_v30, %v229_v35 }
  0x2b   :  { %v3279_v51 = vld [vmem:[#allocation2 + $0x38] sm:$0xff]  ;;  %5038 = vst [vmem:[#allocation46_spill] sm:$0xff] %v3285_v53  ;;  %v233_v54 = vld [vmem:[#allocation2 + $0x2c0] sm:$0xff]  ;;  %v234_v60 = vld [vmem:[#allocation2 + $0x2c8] sm:$0xff]  ;;  %v3289_v62 = vcombine.low %v3267_v38, %v3275_v45 }
  0x2c   :  { %924 = vmatpush1.bf16.msra.mxu0 %v3219_v55  ;;  %5037 = vst [vmem:[#allocation45_spill] sm:$0xff] %v3283_v52  ;;  %v237_v59 = vld [vmem:[#allocation2 + $0x2e0] sm:$0xff]  ;;  %v238_v61 = vld [vmem:[#allocation2 + $0x2e8] sm:$0xff]  ;;  %v3293_v3 = vcombine.low %v3277_v46, %v3279_v51  ;;  %5040 = vst [vmem:[#allocation48_spill] sm:$0xff] %v3297_v4 }
  0x2d   :  { %965 = vmatpush1.bf16.msra.mxu1 %v3221_v56  ;;  %925 = vmatprep.subr.bf16.mxu0 %v3225_v57  ;;  %5041 = vst [vmem:[#allocation49_spill] sm:$0xff] %v3299_v6  ;;  %v3303_v7 = vcombine.high %v233_v54, %v237_v59  ;;  %v3305_v18 = vcombine.high %v234_v60, %v238_v61  ;;  %v241_v19 = vld [vmem:[#allocation2 + $0x300] sm:$0xff]  ;;  %v242_v21 = vld [vmem:[#allocation2 + $0x308] sm:$0xff] }
  0x2e   :  { %966 = vmatprep.subr.bf16.mxu1 %v3227_v58  ;;  %5039 = vst [vmem:[#allocation47_spill] sm:$0xff] %v3293_v3  ;;  %v245_v20 = vld [vmem:[#allocation2 + $0x320] sm:$0xff]  ;;  %v246_v9 = vld [vmem:[#allocation2 + $0x328] sm:$0xff]  ;;  %v3309_v30 = vcombine.low %v233_v54, %v237_v59  ;;  %v3311_v35 = vcombine.low %v234_v60, %v238_v61 }
  0x2f   :  { %5042 = vst [vmem:[#allocation50_spill] sm:$0xff] %v3303_v7  ;;  %5043 = vst [vmem:[#allocation51_spill] sm:$0xff] %v3305_v18  ;;  %v3315_v36 = vcombine.high %v241_v19, %v245_v20  ;;  %v3317_v37 = vcombine.high %v242_v21, %v246_v9  ;;  %v3321_v54 = vcombine.low %v241_v19, %v245_v20 }
  0x30   :  { %926 = vmatpush1.bf16.msra.mxu0 %v3231_v63  ;;  %5044 = vst [vmem:[#allocation52_spill] sm:$0xff] %v3309_v30  ;;  %5045 = vst [vmem:[#allocation53_spill] sm:$0xff] %v3311_v35  ;;  %v3323_v59 = vcombine.low %v242_v21, %v246_v9 }
  0x31   :  { %967 = vmatpush1.bf16.msra.mxu1 %v3233_v0  ;;  %927 = vmatprep.subr.bf16.mxu0 %v3237_v1  ;;  %5046 = vst [vmem:[#allocation54_spill] sm:$0xff] %v3315_v36  ;;  %5047 = vst [vmem:[#allocation55_spill] sm:$0xff] %v3317_v37 }
  0x32   :  { %968 = vmatprep.subr.bf16.mxu1 %v3239_v2  ;;  %5048 = vst [vmem:[#allocation56_spill] sm:$0xff] %v3321_v54  ;;  %5049 = vst [vmem:[#allocation57_spill] sm:$0xff] %v3323_v59 }
  0x34   :  { %928 = vmatpush1.bf16.msra.mxu0 %v3245_v12 }
  0x35   :  { %969 = vmatpush1.bf16.msra.mxu1 %v3247_v13  ;;  %929 = vmatprep.subr.bf16.mxu0 %v3251_v14 }
  0x36   :  { %970 = vmatprep.subr.bf16.mxu1 %v3253_v17 }
  0x38   :  { %930 = vmatpush1.bf16.msra.mxu0 %v3257_v26 }
  0x39   :  { %971 = vmatpush1.bf16.msra.mxu1 %v3259_v27  ;;  %931 = vmatprep.subr.bf16.mxu0 %v3263_v28 }
  0x3a   :  { %972 = vmatprep.subr.bf16.mxu1 %v3265_v29 }
  0x3c   :  { %932 = vmatpush1.bf16.msra.mxu0 %v3271_v43  ;;  %v254_v43 = vld [vmem:[#allocation2 + $0x368] sm:$0xff] }
  0x3d   :  { %973 = vmatpush1.bf16.msra.mxu1 %v3273_v44  ;;  %933 = vmatprep.subr.bf16.mxu0 %v3283_v52  ;;  %v253_v52 = vld [vmem:[#allocation2 + $0x360] sm:$0xff]  ;;  %v250_v44 = vld [vmem:[#allocation2 + $0x348] sm:$0xff] }
  0x3e   :  { %974 = vmatprep.subr.bf16.mxu1 %v3285_v53  ;;  %v249_v53 = vld [vmem:[#allocation2 + $0x340] sm:$0xff]  ;;  %v3329_v61 = vcombine.high %v250_v44, %v254_v43  ;;  %v3335_v9 = vcombine.low %v250_v44, %v254_v43 }
  0x3f   :  { %v3327_v60 = vcombine.high %v249_v53, %v253_v52  ;;  %v3333_v19 = vcombine.low %v249_v53, %v253_v52 }
  0x40   :  { %934 = vmatpush1.bf16.msra.mxu0 %v3297_v4  ;;  %5051 = vst [vmem:[#allocation59_spill] sm:$0xff] %v3329_v61  ;;  %v262_v4 = vld [vmem:[#allocation2 + $0x3a8] sm:$0xff]  ;;  %5053 = vst [vmem:[#allocation61_spill] sm:$0xff] %v3335_v9 }
  0x41   :  { %975 = vmatpush1.bf16.msra.mxu1 %v3299_v6  ;;  %935 = vmatprep.subr.bf16.mxu0 %v3303_v7  ;;  %5050 = vst [vmem:[#allocation58_spill] sm:$0xff] %v3327_v60  ;;  %v261_v7 = vld [vmem:[#allocation2 + $0x3a0] sm:$0xff]  ;;  %v258_v6 = vld [vmem:[#allocation2 + $0x388] sm:$0xff]  ;;  %5052 = vst [vmem:[#allocation60_spill] sm:$0xff] %v3333_v19 }
  0x42   :  { %976 = vmatprep.subr.bf16.mxu1 %v3305_v18  ;;  %v257_v18 = vld [vmem:[#allocation2 + $0x380] sm:$0xff]  ;;  %v3341_v21 = vcombine.high %v258_v6, %v262_v4  ;;  %v3347_v43 = vcombine.low %v258_v6, %v262_v4  ;;  %v3365_v4 = vcombine.high %v3267_v38, %v3275_v45  ;;  %v3369_v6 = vcombine.high %v3277_v46, %v3279_v51 }
  0x43   :  { %v3339_v20 = vcombine.high %v257_v18, %v261_v7  ;;  %v3345_v52 = vcombine.low %v257_v18, %v261_v7  ;;  %v43_v7 = vlaneseq  ;;  %v41_v38 = vld [vmem:[%s4681_s1] sm:$0xf] }
  0x44   :  { %936 = vmatpush1.bf16.msra.mxu0 %v3309_v30  ;;  %5055 = vst [vmem:[#allocation63_spill] sm:$0xff] %v3341_v21  ;;  %v270_v30 = vld [vmem:[#allocation2 + $0x3e8] sm:$0xff]  ;;  %5057 = vst [vmem:[#allocation65_spill] sm:$0xff] %v3347_v43  ;;  %v63_v46 = vld [vmem:[%s4682_s2] sm:$0xf] }
  0x45   :  { %977 = vmatpush1.bf16.msra.mxu1 %v3311_v35  ;;  %937 = vmatprep.subr.bf16.mxu0 %v3315_v36  ;;  %5054 = vst [vmem:[#allocation62_spill] sm:$0xff] %v3339_v20  ;;  %v269_v36 = vld [vmem:[#allocation2 + $0x3e0] sm:$0xff]  ;;  %v266_v35 = vld [vmem:[#allocation2 + $0x3c8] sm:$0xff]  ;;  %5056 = vst [vmem:[#allocation64_spill] sm:$0xff] %v3345_v52  ;;  %v44_v18 = vshrl.u32 %v43_v7, 7 }
  0x46   :  { %978 = vmatprep.subr.bf16.mxu1 %v3317_v37  ;;  %v265_v37 = vld [vmem:[#allocation2 + $0x3c0] sm:$0xff]  ;;  %v3353_v53 = vcombine.high %v266_v35, %v270_v30  ;;  %5062 = vst [vmem:[#allocation70_spill] sm:$0xff] %v3365_v4  ;;  %5063 = vst [vmem:[#allocation71_spill] sm:$0xff] %v3369_v6 }
  0x47   :  { %v3351_v44 = vcombine.high %v265_v37, %v269_v36  ;;  %v3382_v45 = vsub.s32 2, %v44_v18 }
  0x48   :  { %938 = vmatpush1.bf16.msra.mxu0 %v3321_v54  ;;  %5059 = vst [vmem:[#allocation67_spill] sm:$0xff] %v3353_v53 }
  0x49   :  { %979 = vmatpush1.bf16.msra.mxu1 %v3323_v59  ;;  %939 = vmatprep.subr.bf16.mxu0 %v3327_v60  ;;  %5058 = vst [vmem:[#allocation66_spill] sm:$0xff] %v3351_v44  ;;  %5066 = vst [vmem:[#allocation74_spill] sm:$0xff] %v3382_v45  ;;  %v3396_v7 = vrot.slane %v41_v38, %v3382_v45 }
  0x4a   :  { %980 = vmatprep.subr.bf16.mxu1 %v3329_v61  ;;  %v3357_v61 = vcombine.low %v265_v37, %v269_v36  ;;  %v3393_v37 = vsub.s32 3, %v44_v18 }
  0x4b   :  { %5070 = vst [vmem:[#allocation78_spill] sm:$0xff] %v3396_v7 }
  0x4c   :  { %940 = vmatpush1.bf16.msra.mxu0 %v3333_v19  ;;  %5060 = vst [vmem:[#allocation68_spill] sm:$0xff] %v3357_v61  ;;  %v3359_v19 = vcombine.low %v266_v35, %v270_v30  ;;  %v3375_v30 = vsub.s32 0, %v44_v18  ;;  %v3377_v35 = vsub.s32 1, %v44_v18  ;;  %5069 = vst [vmem:[#allocation77_spill] sm:$0xff] %v3393_v37  ;;  %v3410_v18 = vrot.slane %v63_v46, %v3382_v45 }
  0x4d   :  { %981 = vmatpush1.bf16.msra.mxu1 %v3335_v9  ;;  %941 = vmatprep.subr.bf16.mxu0 %v3339_v20  ;;  %v3416_v20 = vrot.slane %v63_v46, %v3393_v37 }
  0x4e   :  { %982 = vmatprep.subr.bf16.mxu1 %v3341_v21  ;;  %5061 = vst [vmem:[#allocation69_spill] sm:$0xff] %v3359_v19  ;;  %5064 = vst [vmem:[#allocation72_spill] sm:$0xff] %v3375_v30  ;;  %v3388_v51 = vrot.slane %v41_v38, %v3375_v30  ;;  %v3391_v36 = vrot.slane %v41_v38, %v3377_v35 }
  0x4f   :  { %5065 = vst [vmem:[#allocation73_spill] sm:$0xff] %v3377_v35  ;;  %5074 = vst [vmem:[#allocation82_spill] sm:$0xff] %v3410_v18 }
  0x50   :  { %942 = vmatpush1.bf16.msra.mxu0 %v3345_v52  ;;  %5067 = vst [vmem:[#allocation75_spill] sm:$0xff] %v3388_v51  ;;  %5068 = vst [vmem:[#allocation76_spill] sm:$0xff] %v3391_v36 }
  0x51   :  { %983 = vmatpush1.bf16.msra.mxu1 %v3347_v43  ;;  %943 = vmatprep.subr.bf16.mxu0 %v3351_v44  ;;  %v3407_v44 = vrot.slane %v41_v38, %v3393_v37  ;;  %5075 = vst [vmem:[#allocation83_spill] sm:$0xff] %v3416_v20 }
  0x52   :  { %984 = vmatprep.subr.bf16.mxu1 %v3353_v53 }
  0x53   :  { %5073 = vst [vmem:[#allocation81_spill] sm:$0xff] %v3407_v44 }
  0x54   :  { %944 = vmatpush1.bf16.msra.mxu0 %v3357_v61 }
  0x55   :  { %985 = vmatpush1.bf16.msra.mxu1 %v3359_v19  ;;  %995 = vmatprep.subr.bf16.mxu0 %v3365_v4  ;;  %v3402_v4 = vrot.slane %v63_v46, %v3377_v35 }
  0x56   :  { %1036 = vmatprep.subr.bf16.mxu1 %v3369_v6  ;;  %v3399_v6 = vrot.slane %v63_v46, %v3375_v30 }
  0x57   :  { %5072 = vst [vmem:[#allocation80_spill] sm:$0xff] %v3402_v4 }
  0x58   :  { %5071 = vst [vmem:[#allocation79_spill] sm:$0xff] %v3399_v6 }
  0x93   :  { %v111_v19 = vpop.permute.xlu0 %110 }
  0x94   :  { %v113_v61 = vmul.f32 %v111_v19, %v3388_v51  ;;  %v114_v53 = vmul.f32 %v111_v19, %v3391_v36  ;;  %v115_v43 = vmul.f32 %v111_v19, %v3396_v7  ;;  %v116_v51 = vmul.f32 %v111_v19, %v3407_v44  ;;  %v176_v44 = vld [vmem:[#allocation2 + $0xf8] sm:$0xff] }
  0x96   :  { %v117_v52 = vadd.f32 %v113_v61, %v3399_v6  ;;  %v118_v30 = vadd.f32 %v114_v53, %v3402_v4  ;;  %v119_v36 = vadd.f32 %v115_v43, %v3410_v18  ;;  %v120_v38 = vadd.f32 %v116_v51, %v3416_v20  ;;  %v160_v20 = vld [vmem:[#allocation2 + $0x78] sm:$0xff] }
  0x98   :  { %v125_v21 = vmul.f32 0.5, %v117_v52  ;;  %v129_v35 = vmul.f32 0.5, %v118_v30  ;;  %v134_v45 = vmul.f32 0.5, %v120_v38  ;;  %v156_v38 = vld [vmem:[#allocation2 + $0x58] sm:$0xff] }
  0x9a   :  { %2900 = vtanh.f32 %v125_v21 }
  0x9b   :  { %2902 = vtanh.f32 %v129_v35  ;;  %v155_v35 = vld [vmem:[#allocation2 + $0x50] sm:$0xff] }
  0x9c   :  { %2904 = vtanh.f32 %v119_v36  ;;  %v159_v36 = vld [vmem:[#allocation2 + $0x70] sm:$0xff] }
  0x9d   :  { %2906 = vtanh.f32 %v134_v45  ;;  %v3426_v45 = vcombine.high %v155_v35, %v159_v36 }
  0x9f   :  { %5077 = vst [vmem:[#allocation85_spill] sm:$0xff] %v3426_v45 }
  0xa4   :  { %v2901_v7 = vpop.eup %2900 }
  0xa5   :  { %v2903_v9 = vpop.eup %2902  ;;  %v127_v61 = vmul.f32 0.5, %v2901_v7 }
  0xa6   :  { %v131_v6 = vmul.f32 0.5, %v2903_v9  ;;  %v2905_v53 = vpop.eup %2904 }
  0xa7   :  { %v128_v52 = vadd.f32 0.5, %v127_v61  ;;  %v2907_v19 = vpop.eup %2906  ;;  %v163_v61 = vld [vmem:[#allocation2 + $0x90] sm:$0xff] }
  0xa8   :  { %v132_v30 = vadd.f32 0.5, %v131_v6  ;;  %v136_v21 = vmul.f32 0.5, %v2907_v19  ;;  %v3428_v6 = vcombine.high %v156_v38, %v160_v20 }
  0xa9   :  { %v139_v46 = vmul.f32 %v2905_v53, %v128_v52  ;;  %v164_v52 = vld [vmem:[#allocation2 + $0x98] sm:$0xff] }
  0xaa   :  { %v138_v37 = vmul.f32 0.0, %v132_v30  ;;  %v137_v43 = vadd.f32 0.5, %v136_v21  ;;  %5078 = vst [vmem:[#allocation86_spill] sm:$0xff] %v3428_v6  ;;  %v168_v53 = vld [vmem:[#allocation2 + $0xb8] sm:$0xff]  ;;  %v3434_v30 = vcombine.low %v155_v35, %v159_v36 }
  0xab   :  { %v3442_v21 = vcombine.high %v164_v52, %v168_v53  ;;  %v3450_v35 = vcombine.low %v164_v52, %v168_v53 }
  0xac   :  { %v3421_v4 = vadd.f32 %v139_v46, %v138_v37  ;;  %v167_v37 = vld [vmem:[#allocation2 + $0xb0] sm:$0xff]  ;;  %5079 = vst [vmem:[#allocation87_spill] sm:$0xff] %v3434_v30  ;;  %v3436_v46 = vcombine.low %v156_v38, %v160_v20 }
  0xad   :  { %v3440_v19 = vcombine.high %v163_v61, %v167_v37  ;;  %5082 = vst [vmem:[#allocation90_spill] sm:$0xff] %v3442_v21  ;;  %v3448_v20 = vcombine.low %v163_v61, %v167_v37  ;;  %5085 = vst [vmem:[#allocation92_spill] sm:$0xff] %v3450_v35 }
  0xae   :  { %5076 = vst [vmem:[#allocation84_spill] sm:$0xff] %v3421_v4  ;;  %2908 = vtanh.f32 %v3421_v4  ;;  %5080 = vst [vmem:[#allocation88_spill] sm:$0xff] %v3436_v46  ;;  %v5083_v4 = vmov 0.0|0.0  }
  0xaf   :  { %5081 = vst [vmem:[#allocation89_spill] sm:$0xff] %v3440_v19  ;;  %5084 = vst [vmem:[#allocation91_spill] sm:$0xff] %v3448_v20 }
  0xb8   :  { %v2909_v51 = vpop.eup %2908 }
  0xb9   :  { %v142_v7 = vmul.f32 %v2909_v51, %v137_v43  ;;  %v171_v43 = vld [vmem:[#allocation2 + $0xd0] sm:$0xff] }
  0xba   :  { %v175_v51 = vld [vmem:[#allocation2 + $0xf0] sm:$0xff] }
  0xbb   :  { %v3424_v9 = vpack.c.bf16 %v142_v7, %v142_v7  ;;  %v172_v7 = vld [vmem:[#allocation2 + $0xd8] sm:$0xff]  ;;  %v3454_v36 = vcombine.high %v171_v43, %v175_v51  ;;  %v3460_v61 = vcombine.low %v171_v43, %v175_v51 }
  0xbc   :  { %v3456_v38 = vcombine.high %v172_v7, %v176_v44  ;;  %v3462_v37 = vcombine.low %v172_v7, %v176_v44 }
  0xbd   :  { %946 = vmatmul.mubr.bf16.vlgmr.msra.gmra.mrb[0].mxu0 %v3424_v9  ;;  %987 = vmatmul.mubr.bf16.vlgmr.msra.gmra.mrb[0].mxu1 %v3424_v9  ;;  %5086 = vst [vmem:[#allocation93_spill] sm:$0xff] %v3454_v36  ;;  %5088 = vst [vmem:[#allocation95_spill] sm:$0xff] %v3460_v61 }
  0xbe   :  { %996 = vmatpush1.bf16.msra.mxu0 %v3289_v62  ;;  %1037 = vmatpush1.bf16.msra.mxu1 %v3293_v3  ;;  %5087 = vst [vmem:[#allocation94_spill] sm:$0xff] %v3456_v38  ;;  %v180_v3 = vld [vmem:[#allocation2 + $0x118] sm:$0xff]  ;;  %5089 = vst [vmem:[#allocation96_spill] sm:$0xff] %v3462_v37 }
  0xbf   :  { %997 = vmatprep.subr.bf16.mxu0 %v3426_v45  ;;  %1038 = vmatprep.subr.bf16.mxu1 %v3428_v6  ;;  %v179_v6 = vld [vmem:[#allocation2 + $0x110] sm:$0xff] }
  0xc0   :  { %1027 = vmatprep.mubr.bf16.mxu0 %v5083_v4  ;;  %1068 = vmatprep.mubr.bf16.mxu1 %v5083_v4  ;;  %v183_v45 = vld [vmem:[#allocation2 + $0x130] sm:$0xff]  ;;  %v184_v4 = vld [vmem:[#allocation2 + $0x138] sm:$0xff] }
  0xc1   :  { %v3466_v52 = vcombine.high %v179_v6, %v183_v45  ;;  %v3468_v53 = vcombine.high %v180_v3, %v184_v4  ;;  %v3472_v43 = vcombine.low %v179_v6, %v183_v45  ;;  %v3474_v44 = vcombine.low %v180_v3, %v184_v4 }
  0xc2   :  { %998 = vmatpush1.bf16.msra.mxu0 %v3434_v30  ;;  %1039 = vmatpush1.bf16.msra.mxu1 %v3436_v46  ;;  %v188_v46 = vld [vmem:[#allocation2 + $0x158] sm:$0xff] }
  0xc3   :  { %999 = vmatprep.subr.bf16.mxu0 %v3440_v19  ;;  %1040 = vmatprep.subr.bf16.mxu1 %v3442_v21  ;;  %5090 = vst [vmem:[#allocation97_spill] sm:$0xff] %v3466_v52  ;;  %5091 = vst [vmem:[#allocation98_spill] sm:$0xff] %v3468_v53  ;;  %v187_v21 = vld [vmem:[#allocation2 + $0x150] sm:$0xff]  ;;  %v192_v30 = vld [vmem:[#allocation2 + $0x178] sm:$0xff] }
  0xc4   :  { %v191_v19 = vld [vmem:[#allocation2 + $0x170] sm:$0xff]  ;;  %5092 = vst [vmem:[#allocation99_spill] sm:$0xff] %v3472_v43  ;;  %5093 = vst [vmem:[#allocation100_spill] sm:$0xff] %v3474_v44  ;;  %v3480_v7 = vcombine.high %v188_v46, %v192_v30  ;;  %v3486_v3 = vcombine.low %v188_v46, %v192_v30 }
  0xc5   :  { %v3478_v51 = vcombine.high %v187_v21, %v191_v19  ;;  %v3484_v45 = vcombine.low %v187_v21, %v191_v19 }
  0xc6   :  { %1000 = vmatpush1.bf16.msra.mxu0 %v3448_v20  ;;  %1041 = vmatpush1.bf16.msra.mxu1 %v3450_v35  ;;  %5095 = vst [vmem:[#allocation102_spill] sm:$0xff] %v3480_v7  ;;  %v196_v35 = vld [vmem:[#allocation2 + $0x198] sm:$0xff]  ;;  %5097 = vst [vmem:[#allocation104_spill] sm:$0xff] %v3486_v3 }
  0xc7   :  { %1001 = vmatprep.subr.bf16.mxu0 %v3454_v36  ;;  %1042 = vmatprep.subr.bf16.mxu1 %v3456_v38  ;;  %5094 = vst [vmem:[#allocation101_spill] sm:$0xff] %v3478_v51  ;;  %v195_v38 = vld [vmem:[#allocation2 + $0x190] sm:$0xff]  ;;  %v200_v20 = vld [vmem:[#allocation2 + $0x1b8] sm:$0xff]  ;;  %5096 = vst [vmem:[#allocation103_spill] sm:$0xff] %v3484_v45 }
  0xc8   :  { %v199_v36 = vld [vmem:[#allocation2 + $0x1b0] sm:$0xff]  ;;  %v3492_v4 = vcombine.high %v196_v35, %v200_v20  ;;  %v3498_v30 = vcombine.low %v196_v35, %v200_v20 }
  0xc9   :  { %v3490_v6 = vcombine.high %v195_v38, %v199_v36  ;;  %v3496_v19 = vcombine.low %v195_v38, %v199_v36 }
  0xca   :  { %1002 = vmatpush1.bf16.msra.mxu0 %v3460_v61  ;;  %1043 = vmatpush1.bf16.msra.mxu1 %v3462_v37  ;;  %5099 = vst [vmem:[#allocation106_spill] sm:$0xff] %v3492_v4  ;;  %v204_v37 = vld [vmem:[#allocation2 + $0x1d8] sm:$0xff]  ;;  %5101 = vst [vmem:[#allocation108_spill] sm:$0xff] %v3498_v30 }
  0xcb   :  { %1003 = vmatprep.subr.bf16.mxu0 %v3466_v52  ;;  %1044 = vmatprep.subr.bf16.mxu1 %v3468_v53  ;;  %5098 = vst [vmem:[#allocation105_spill] sm:$0xff] %v3490_v6  ;;  %v203_v53 = vld [vmem:[#allocation2 + $0x1d0] sm:$0xff]  ;;  %v208_v61 = vld [vmem:[#allocation2 + $0x1f8] sm:$0xff]  ;;  %5100 = vst [vmem:[#allocation107_spill] sm:$0xff] %v3496_v19 }
  0xcc   :  { %v207_v52 = vld [vmem:[#allocation2 + $0x1f0] sm:$0xff]  ;;  %v3504_v21 = vcombine.high %v204_v37, %v208_v61  ;;  %v3510_v20 = vcombine.low %v204_v37, %v208_v61 }
  0xcd   :  { %v3502_v46 = vcombine.high %v203_v53, %v207_v52  ;;  %v3508_v36 = vcombine.low %v203_v53, %v207_v52 }
  0xce   :  { %1004 = vmatpush1.bf16.msra.mxu0 %v3472_v43  ;;  %1045 = vmatpush1.bf16.msra.mxu1 %v3474_v44  ;;  %5103 = vst [vmem:[#allocation110_spill] sm:$0xff] %v3504_v21  ;;  %v212_v44 = vld [vmem:[#allocation2 + $0x218] sm:$0xff]  ;;  %5105 = vst [vmem:[#allocation112_spill] sm:$0xff] %v3510_v20 }
  0xcf   :  { %1005 = vmatprep.subr.bf16.mxu0 %v3478_v51  ;;  %1046 = vmatprep.subr.bf16.mxu1 %v3480_v7  ;;  %5102 = vst [vmem:[#allocation109_spill] sm:$0xff] %v3502_v46  ;;  %v211_v7 = vld [vmem:[#allocation2 + $0x210] sm:$0xff]  ;;  %v216_v43 = vld [vmem:[#allocation2 + $0x238] sm:$0xff]  ;;  %5104 = vst [vmem:[#allocation111_spill] sm:$0xff] %v3508_v36 }
  0xd0   :  { %v215_v51 = vld [vmem:[#allocation2 + $0x230] sm:$0xff]  ;;  %v3516_v38 = vcombine.high %v212_v44, %v216_v43  ;;  %v3522_v61 = vcombine.low %v212_v44, %v216_v43 }
  0xd1   :  { %v3514_v35 = vcombine.high %v211_v7, %v215_v51  ;;  %v3520_v52 = vcombine.low %v211_v7, %v215_v51 }
  0xd2   :  { %1006 = vmatpush1.bf16.msra.mxu0 %v3484_v45  ;;  %1047 = vmatpush1.bf16.msra.mxu1 %v3486_v3  ;;  %5107 = vst [vmem:[#allocation114_spill] sm:$0xff] %v3516_v38  ;;  %v220_v3 = vld [vmem:[#allocation2 + $0x258] sm:$0xff]  ;;  %5109 = vst [vmem:[#allocation116_spill] sm:$0xff] %v3522_v61 }
  0xd3   :  { %1007 = vmatprep.subr.bf16.mxu0 %v3490_v6  ;;  %1048 = vmatprep.subr.bf16.mxu1 %v3492_v4  ;;  %5106 = vst [vmem:[#allocation113_spill] sm:$0xff] %v3514_v35  ;;  %v219_v4 = vld [vmem:[#allocation2 + $0x250] sm:$0xff]  ;;  %v224_v45 = vld [vmem:[#allocation2 + $0x278] sm:$0xff]  ;;  %5108 = vst [vmem:[#allocation115_spill] sm:$0xff] %v3520_v52 }
  0xd4   :  { %v223_v6 = vld [vmem:[#allocation2 + $0x270] sm:$0xff]  ;;  %v3528_v53 = vcombine.high %v220_v3, %v224_v45  ;;  %v3534_v43 = vcombine.low %v220_v3, %v224_v45 }
  0xd5   :  { %v3526_v37 = vcombine.high %v219_v4, %v223_v6  ;;  %v3532_v51 = vcombine.low %v219_v4, %v223_v6 }
  0xd6   :  { %1008 = vmatpush1.bf16.msra.mxu0 %v3496_v19  ;;  %1049 = vmatpush1.bf16.msra.mxu1 %v3498_v30  ;;  %5111 = vst [vmem:[#allocation118_spill] sm:$0xff] %v3528_v53  ;;  %v228_v30 = vld [vmem:[#allocation2 + $0x298] sm:$0xff]  ;;  %5113 = vst [vmem:[#allocation120_spill] sm:$0xff] %v3534_v43 }
  0xd7   :  { %1009 = vmatprep.subr.bf16.mxu0 %v3502_v46  ;;  %1050 = vmatprep.subr.bf16.mxu1 %v3504_v21  ;;  %5110 = vst [vmem:[#allocation117_spill] sm:$0xff] %v3526_v37  ;;  %v227_v21 = vld [vmem:[#allocation2 + $0x290] sm:$0xff]  ;;  %v232_v19 = vld [vmem:[#allocation2 + $0x2b8] sm:$0xff]  ;;  %5112 = vst [vmem:[#allocation119_spill] sm:$0xff] %v3532_v51 }
  0xd8   :  { %v231_v46 = vld [vmem:[#allocation2 + $0x2b0] sm:$0xff]  ;;  %v3540_v7 = vcombine.high %v228_v30, %v232_v19  ;;  %v3546_v45 = vcombine.low %v228_v30, %v232_v19 }
  0xd9   :  { %v3538_v44 = vcombine.high %v227_v21, %v231_v46  ;;  %v3544_v6 = vcombine.low %v227_v21, %v231_v46 }
  0xda   :  { %1010 = vmatpush1.bf16.msra.mxu0 %v3508_v36  ;;  %1051 = vmatpush1.bf16.msra.mxu1 %v3510_v20  ;;  %5115 = vst [vmem:[#allocation122_spill] sm:$0xff] %v3540_v7  ;;  %v236_v20 = vld [vmem:[#allocation2 + $0x2d8] sm:$0xff]  ;;  %5117 = vst [vmem:[#allocation124_spill] sm:$0xff] %v3546_v45 }
  0xdb   :  { %1011 = vmatprep.subr.bf16.mxu0 %v3514_v35  ;;  %1052 = vmatprep.subr.bf16.mxu1 %v3516_v38  ;;  %5114 = vst [vmem:[#allocation121_spill] sm:$0xff] %v3538_v44  ;;  %v235_v38 = vld [vmem:[#allocation2 + $0x2d0] sm:$0xff]  ;;  %v240_v36 = vld [vmem:[#allocation2 + $0x2f8] sm:$0xff]  ;;  %5116 = vst [vmem:[#allocation123_spill] sm:$0xff] %v3544_v6 }
  0xdc   :  { %v239_v35 = vld [vmem:[#allocation2 + $0x2f0] sm:$0xff]  ;;  %v3552_v4 = vcombine.high %v236_v20, %v240_v36  ;;  %v3558_v19 = vcombine.low %v236_v20, %v240_v36 }
  0xdd   :  { %v3550_v3 = vcombine.high %v235_v38, %v239_v35  ;;  %v3556_v46 = vcombine.low %v235_v38, %v239_v35 }
  0xde   :  { %1012 = vmatpush1.bf16.msra.mxu0 %v3520_v52  ;;  %1053 = vmatpush1.bf16.msra.mxu1 %v3522_v61  ;;  %5119 = vst [vmem:[#allocation126_spill] sm:$0xff] %v3552_v4  ;;  %v244_v61 = vld [vmem:[#allocation2 + $0x318] sm:$0xff]  ;;  %5121 = vst [vmem:[#allocation128_spill] sm:$0xff] %v3558_v19 }
  0xdf   :  { %1013 = vmatprep.subr.bf16.mxu0 %v3526_v37  ;;  %1054 = vmatprep.subr.bf16.mxu1 %v3528_v53  ;;  %5118 = vst [vmem:[#allocation125_spill] sm:$0xff] %v3550_v3  ;;  %v243_v53 = vld [vmem:[#allocation2 + $0x310] sm:$0xff]  ;;  %v248_v52 = vld [vmem:[#allocation2 + $0x338] sm:$0xff]  ;;  %5120 = vst [vmem:[#allocation127_spill] sm:$0xff] %v3556_v46 }
  0xe0   :  { %v247_v37 = vld [vmem:[#allocation2 + $0x330] sm:$0xff]  ;;  %v3564_v21 = vcombine.high %v244_v61, %v248_v52  ;;  %v3570_v36 = vcombine.low %v244_v61, %v248_v52 }
  0xe1   :  { %v3562_v30 = vcombine.high %v243_v53, %v247_v37  ;;  %v3568_v35 = vcombine.low %v243_v53, %v247_v37 }
  0xe2   :  { %1014 = vmatpush1.bf16.msra.mxu0 %v3532_v51  ;;  %1055 = vmatpush1.bf16.msra.mxu1 %v3534_v43  ;;  %5123 = vst [vmem:[#allocation130_spill] sm:$0xff] %v3564_v21  ;;  %v252_v43 = vld [vmem:[#allocation2 + $0x358] sm:$0xff]  ;;  %5125 = vst [vmem:[#allocation132_spill] sm:$0xff] %v3570_v36 }
  0xe3   :  { %1015 = vmatprep.subr.bf16.mxu0 %v3538_v44  ;;  %1056 = vmatprep.subr.bf16.mxu1 %v3540_v7  ;;  %5122 = vst [vmem:[#allocation129_spill] sm:$0xff] %v3562_v30  ;;  %v251_v7 = vld [vmem:[#allocation2 + $0x350] sm:$0xff]  ;;  %v256_v51 = vld [vmem:[#allocation2 + $0x378] sm:$0xff]  ;;  %5124 = vst [vmem:[#allocation131_spill] sm:$0xff] %v3568_v35 }
  0xe4   :  { %v255_v44 = vld [vmem:[#allocation2 + $0x370] sm:$0xff]  ;;  %v3576_v38 = vcombine.high %v252_v43, %v256_v51  ;;  %v3582_v52 = vcombine.low %v252_v43, %v256_v51 }
  0xe5   :  { %v3574_v20 = vcombine.high %v251_v7, %v255_v44  ;;  %v3580_v37 = vcombine.low %v251_v7, %v255_v44 }
  0xe6   :  { %1016 = vmatpush1.bf16.msra.mxu0 %v3544_v6  ;;  %1057 = vmatpush1.bf16.msra.mxu1 %v3546_v45  ;;  %5127 = vst [vmem:[#allocation134_spill] sm:$0xff] %v3576_v38  ;;  %v260_v45 = vld [vmem:[#allocation2 + $0x398] sm:$0xff]  ;;  %5129 = vst [vmem:[#allocation136_spill] sm:$0xff] %v3582_v52 }
  0xe7   :  { %1017 = vmatprep.subr.bf16.mxu0 %v3550_v3  ;;  %1058 = vmatprep.subr.bf16.mxu1 %v3552_v4  ;;  %5126 = vst [vmem:[#allocation133_spill] sm:$0xff] %v3574_v20  ;;  %v259_v4 = vld [vmem:[#allocation2 + $0x390] sm:$0xff]  ;;  %v264_v6 = vld [vmem:[#allocation2 + $0x3b8] sm:$0xff]  ;;  %5128 = vst [vmem:[#allocation135_spill] sm:$0xff] %v3580_v37 }
  0xe8   :  { %v263_v3 = vld [vmem:[#allocation2 + $0x3b0] sm:$0xff]  ;;  %v3588_v53 = vcombine.high %v260_v45, %v264_v6  ;;  %v3594_v51 = vcombine.low %v260_v45, %v264_v6  ;;  %v5139_v6 = vld [vmem:[#allocation44_spill] sm:$0xff]  ;;  %v5140_v45 = vld [vmem:[#allocation45_spill] sm:$0xff] }
  0xe9   :  { %v3586_v61 = vcombine.high %v259_v4, %v263_v3  ;;  %v3592_v44 = vcombine.low %v259_v4, %v263_v3  ;;  %v5141_v3 = vld [vmem:[#allocation46_spill] sm:$0xff]  ;;  %v5142_v4 = vld [vmem:[#allocation48_spill] sm:$0xff] }
  0xea   :  { %1018 = vmatpush1.bf16.msra.mxu0 %v3556_v46  ;;  %1059 = vmatpush1.bf16.msra.mxu1 %v3558_v19  ;;  %5131 = vst [vmem:[#allocation138_spill] sm:$0xff] %v3588_v53  ;;  %v268_v19 = vld [vmem:[#allocation2 + $0x3d8] sm:$0xff]  ;;  %5133 = vst [vmem:[#allocation140_spill] sm:$0xff] %v3594_v51 }
  0xeb   :  { %1019 = vmatprep.subr.bf16.mxu0 %v3562_v30  ;;  %1060 = vmatprep.subr.bf16.mxu1 %v3564_v21  ;;  %5130 = vst [vmem:[#allocation137_spill] sm:$0xff] %v3586_v61  ;;  %v267_v21 = vld [vmem:[#allocation2 + $0x3d0] sm:$0xff]  ;;  %v272_v46 = vld [vmem:[#allocation2 + $0x3f8] sm:$0xff]  ;;  %5132 = vst [vmem:[#allocation139_spill] sm:$0xff] %v3592_v44 }
  0xec   :  { %v271_v30 = vld [vmem:[#allocation2 + $0x3f0] sm:$0xff]  ;;  %v3600_v7 = vcombine.high %v268_v19, %v272_v46 }
  0xed   :  { %v3598_v43 = vcombine.high %v267_v21, %v271_v30 }
  0xee   :  { %1020 = vmatpush1.bf16.msra.mxu0 %v3568_v35  ;;  %1061 = vmatpush1.bf16.msra.mxu1 %v3570_v36  ;;  %5135 = vst [vmem:[#allocation142_spill] sm:$0xff] %v3600_v7 }
  0xef   :  { %1021 = vmatprep.subr.bf16.mxu0 %v3574_v20  ;;  %1062 = vmatprep.subr.bf16.mxu1 %v3576_v38  ;;  %5134 = vst [vmem:[#allocation141_spill] sm:$0xff] %v3598_v43  ;;  %v3604_v38 = vcombine.low %v267_v21, %v271_v30  ;;  %v5145_v30 = vld [vmem:[#allocation51_spill] sm:$0xff]  ;;  %v5146_v21 = vld [vmem:[#allocation52_spill] sm:$0xff] }
  0xf1   :  { %5136 = vst [vmem:[#allocation143_spill] sm:$0xff] %v3604_v38 }
  0xf2   :  { %1022 = vmatpush1.bf16.msra.mxu0 %v3580_v37  ;;  %1063 = vmatpush1.bf16.msra.mxu1 %v3582_v52  ;;  %v3606_v37 = vcombine.low %v268_v19, %v272_v46  ;;  %v5143_v46 = vld [vmem:[#allocation49_spill] sm:$0xff]  ;;  %v5144_v19 = vld [vmem:[#allocation50_spill] sm:$0xff] }
  0xf3   :  { %1023 = vmatprep.subr.bf16.mxu0 %v3586_v61  ;;  %1064 = vmatprep.subr.bf16.mxu1 %v3588_v53 }
  0xf4   :  { %5137 = vst [vmem:[#allocation144_spill] sm:$0xff] %v3606_v37 }
  0xf6   :  { %1024 = vmatpush1.bf16.msra.mxu0 %v3592_v44  ;;  %1065 = vmatpush1.bf16.msra.mxu1 %v3594_v51 }
  0xf7   :  { %1025 = vmatprep.subr.bf16.mxu0 %v3598_v43  ;;  %1066 = vmatprep.subr.bf16.mxu1 %v3600_v7 }
  0xfa   :  { %1026 = vmatpush1.bf16.msra.mxu0 %v3604_v38  ;;  %1067 = vmatpush1.bf16.msra.mxu1 %v3606_v37 }
  0xfb   :  { %1138 = vmatprep.subr.bf16.mxu0 %v3149_v5  ;;  %1179 = vmatprep.subr.bf16.mxu1 %v3153_v10 }
  0xfd   :  { %1028 = vmatmul.mubr.bf16.vlgmr.msra.gmra.mrb[4].mxu0 %v3424_v9  ;;  %1069 = vmatmul.mubr.bf16.vlgmr.msra.gmra.mrb[4].mxu1 %v3424_v9  ;;  %v5138_v9 = vld [vmem:[#allocation43_spill] sm:$0xff] }
  0xfe   :  { %1139 = vmatpush1.bf16.msra.mxu0 %v3151_v8  ;;  %1180 = vmatpush1.bf16.msra.mxu1 %v3155_v11 }
  0xff   :  { %1140 = vmatprep.subr.bf16.mxu0 %v3158_v15  ;;  %1181 = vmatprep.subr.bf16.mxu1 %v3160_v16 }
 0x102   :  { %1141 = vmatpush1.bf16.msra.mxu0 %v3168_v22  ;;  %1182 = vmatpush1.bf16.msra.mxu1 %v3170_v23 }
 0x103   :  { %1142 = vmatprep.subr.bf16.mxu0 %v3174_v24  ;;  %1183 = vmatprep.subr.bf16.mxu1 %v3176_v25 }
 0x106   :  { %1143 = vmatpush1.bf16.msra.mxu0 %v3183_v31  ;;  %1184 = vmatpush1.bf16.msra.mxu1 %v3185_v32 }
 0x107   :  { %1144 = vmatprep.subr.bf16.mxu0 %v3189_v33  ;;  %1185 = vmatprep.subr.bf16.mxu1 %v3191_v34 }
 0x10a   :  { %1145 = vmatpush1.bf16.msra.mxu0 %v3195_v39  ;;  %1186 = vmatpush1.bf16.msra.mxu1 %v3197_v40 }
 0x10b   :  { %1146 = vmatprep.subr.bf16.mxu0 %v3201_v41  ;;  %1187 = vmatprep.subr.bf16.mxu1 %v3203_v42 }
 0x10e   :  { %1147 = vmatpush1.bf16.msra.mxu0 %v3207_v47  ;;  %1188 = vmatpush1.bf16.msra.mxu1 %v3209_v48 }
 0x10f   :  { %1148 = vmatprep.subr.bf16.mxu0 %v3213_v49  ;;  %1189 = vmatprep.subr.bf16.mxu1 %v3215_v50 }
 0x112   :  { %1149 = vmatpush1.bf16.msra.mxu0 %v3219_v55  ;;  %1190 = vmatpush1.bf16.msra.mxu1 %v3221_v56 }
 0x113   :  { %1150 = vmatprep.subr.bf16.mxu0 %v3225_v57  ;;  %1191 = vmatprep.subr.bf16.mxu1 %v3227_v58 }
 0x116   :  { %1151 = vmatpush1.bf16.msra.mxu0 %v3231_v63  ;;  %1192 = vmatpush1.bf16.msra.mxu1 %v3233_v0 }
 0x117   :  { %1152 = vmatprep.subr.bf16.mxu0 %v3237_v1  ;;  %1193 = vmatprep.subr.bf16.mxu1 %v3239_v2 }
 0x11a   :  { %1153 = vmatpush1.bf16.msra.mxu0 %v3245_v12  ;;  %1194 = vmatpush1.bf16.msra.mxu1 %v3247_v13 }
 0x11b   :  { %1154 = vmatprep.subr.bf16.mxu0 %v3251_v14  ;;  %1195 = vmatprep.subr.bf16.mxu1 %v3253_v17 }
 0x11e   :  { %1155 = vmatpush1.bf16.msra.mxu0 %v3257_v26  ;;  %1196 = vmatpush1.bf16.msra.mxu1 %v3259_v27 }
 0x11f   :  { %1156 = vmatprep.subr.bf16.mxu0 %v3263_v28  ;;  %1197 = vmatprep.subr.bf16.mxu1 %v3265_v29  ;;  %v5147_v28 = vld [vmem:[#allocation53_spill] sm:$0xff]  ;;  %v5148_v29 = vld [vmem:[#allocation54_spill] sm:$0xff] }
 0x122   :  { %1157 = vmatpush1.bf16.msra.mxu0 %v5138_v9  ;;  %1198 = vmatpush1.bf16.msra.mxu1 %v5139_v6  ;;  %v5149_v9 = vld [vmem:[#allocation55_spill] sm:$0xff] }
 0x123   :  { %1158 = vmatprep.subr.bf16.mxu0 %v5140_v45  ;;  %1199 = vmatprep.subr.bf16.mxu1 %v5141_v3 }
 0x126   :  { %1159 = vmatpush1.bf16.msra.mxu0 %v5142_v4  ;;  %1200 = vmatpush1.bf16.msra.mxu1 %v5143_v46  ;;  %v5150_v4 = vld [vmem:[#allocation59_spill] sm:$0xff]  ;;  %v5151_v46 = vld [vmem:[#allocation60_spill] sm:$0xff] }
 0x127   :  { %1160 = vmatprep.subr.bf16.mxu0 %v5144_v19  ;;  %1201 = vmatprep.subr.bf16.mxu1 %v5145_v30  ;;  %v5152_v19 = vld [vmem:[#allocation61_spill] sm:$0xff]  ;;  %v5153_v30 = vld [vmem:[#allocation62_spill] sm:$0xff] }
 0x12a   :  { %1161 = vmatpush1.bf16.msra.mxu0 %v5146_v21  ;;  %1202 = vmatpush1.bf16.msra.mxu1 %v5147_v28  ;;  %v5154_v21 = vld [vmem:[#allocation63_spill] sm:$0xff]  ;;  %v5155_v28 = vld [vmem:[#allocation64_spill] sm:$0xff] }
 0x12b   :  { %1162 = vmatprep.subr.bf16.mxu0 %v5148_v29  ;;  %1203 = vmatprep.subr.bf16.mxu1 %v5149_v9  ;;  %v5156_v29 = vld [vmem:[#allocation65_spill] sm:$0xff]  ;;  %v5157_v9 = vld [vmem:[#allocation66_spill] sm:$0xff] }
 0x12e   :  { %1163 = vmatpush1.bf16.msra.mxu0 %v3321_v54  ;;  %1204 = vmatpush1.bf16.msra.mxu1 %v3323_v59  ;;  %v5158_v54 = vld [vmem:[#allocation67_spill] sm:$0xff]  ;;  %v5159_v59 = vld [vmem:[#allocation68_spill] sm:$0xff] }
 0x12f   :  { %1164 = vmatprep.subr.bf16.mxu0 %v3327_v60  ;;  %1205 = vmatprep.subr.bf16.mxu1 %v5150_v4  ;;  %v5160_v60 = vld [vmem:[#allocation69_spill] sm:$0xff]  ;;  %v5161_v4 = vld [vmem:[#allocation70_spill] sm:$0xff] }
 0x132   :  { %1165 = vmatpush1.bf16.msra.mxu0 %v5151_v46  ;;  %1206 = vmatpush1.bf16.msra.mxu1 %v5152_v19  ;;  %v5162_v46 = vld [vmem:[#allocation71_spill] sm:$0xff]  ;;  %v1104_v19 = vpop.permute.xlu0 %1103 }
 0x133   :  { %1166 = vmatprep.subr.bf16.mxu0 %v5153_v30  ;;  %1207 = vmatprep.subr.bf16.mxu1 %v5154_v21  ;;  %v5163_v30 = vld [vmem:[#allocation75_spill] sm:$0xff]  ;;  %v5164_v21 = vld [vmem:[#allocation76_spill] sm:$0xff] }
 0x134   :  { %v1106_v3 = vmul.f32 %v1104_v19, %v5163_v30  ;;  %v1107_v45 = vmul.f32 %v1104_v19, %v5164_v21 }
 0x136   :  { %1167 = vmatpush1.bf16.msra.mxu0 %v5155_v28  ;;  %1208 = vmatpush1.bf16.msra.mxu1 %v5156_v29  ;;  %v5165_v28 = vld [vmem:[#allocation79_spill] sm:$0xff]  ;;  %v5166_v29 = vld [vmem:[#allocation78_spill] sm:$0xff] }
 0x137   :  { %1168 = vmatprep.subr.bf16.mxu0 %v5157_v9  ;;  %1209 = vmatprep.subr.bf16.mxu1 %v5158_v54  ;;  %v1110_v6 = vadd.f32 %v1106_v3, %v5165_v28  ;;  %v1108_v27 = vmul.f32 %v1104_v19, %v5166_v29  ;;  %v5167_v54 = vld [vmem:[#allocation80_spill] sm:$0xff] }
 0x138   :  { %v1111_v17 = vadd.f32 %v1107_v45, %v5167_v54 }
 0x139   :  { %v1112_v2 = vadd.f32 %v1108_v27, %v3410_v18  ;;  %v5169_v27 = vld [vmem:[#allocation72_spill] sm:$0xff]  ;;  %v5176_v18 = vld [vmem:[#allocation77_spill] sm:$0xff] }
 0x13a   :  { %1169 = vmatpush1.bf16.msra.mxu0 %v5159_v59  ;;  %1210 = vmatpush1.bf16.msra.mxu1 %v5160_v60 }
 0x13b   :  { %1220 = vmatprep.subr.bf16.mxu0 %v5161_v4  ;;  %1261 = vmatprep.subr.bf16.mxu1 %v5162_v46 }
 0x190   :  { %v947_v9 = vpop.f32.mrb[0].mxu0  ;;  %v988_v26 = vpop.f32.mrb[0].mxu1 }
 0x191   :  { %v1114_v59 = vadd.f32 %v1110_v6, %v947_v9  ;;  %v949_v14 = vpop.f32.mrb[1].mxu0  ;;  %v990_v60 = vpop.f32.mrb[1].mxu1  ;;  %v1116_v3 = vadd.f32 %v1112_v2, %v988_v26  ;;  %v2840_v2 = vld [vmem:[%s4680_s0 + $0x18] sm:$0xff]  ;;  %v85_v26 = vld [vmem:[%s4684_s4] sm:$0xf] }
 0x192   :  { %v1115_v13 = vadd.f32 %v1111_v17, %v949_v14  ;;  %v951_v4 = vpop.f32.mrb[2].mxu0  ;;  %v992_v12 = vpop.f32.mrb[2].mxu1  ;;  %v5168_v17 = vld [vmem:[#allocation84_spill] sm:$0xff] }
 0x193   :  { %v1118_v46 = vmul.f32 0.5, %v1114_v59  ;;  %v952_v30 = vpop.f32.mrb[3].mxu0  ;;  %v993_v1 = vpop.f32.mrb[3].mxu1 }
 0x194   :  { %v1122_v21 = vmul.f32 0.5, %v1115_v13  ;;  %v2839_v1 = vld [vmem:[%s4680_s0 + $0x10] sm:$0xff]  ;;  %v2844_v13 = vld [vmem:[%s4680_s0 + $0x38] sm:$0xff] }
 0x195   :  { %2910 = vtanh.f32 %v1118_v46  ;;  %1328 = vperm.xlu1 %2891, %v2839_v1  }
 0x196   :  { %2912 = vtanh.f32 %v1122_v21  ;;  %v5173_v21 = vld [vmem:[#allocation74_spill] sm:$0xff] }
 0x197   :  { %2914 = vtanh.f32 %v1116_v3  ;;  %v3712_v3 = vrot.slane %v85_v26, %v5173_v21  ;;  %v5178_v21 = vld [vmem:[#allocation83_spill] sm:$0xff] }
 0x199   :  { %1553 = vperm.xlu1 %2891, %v2840_v2  }
 0x19f   :  { %v2911_v29 = vpop.eup %2910 }
 0x1a0   :  { %v2913_v28 = vpop.eup %2912  ;;  %v1120_v0 = vmul.f32 0.5, %v2911_v29  ;;  %v5171_v29 = vld [vmem:[#allocation73_spill] sm:$0xff] }
 0x1a1   :  { %v1124_v45 = vmul.f32 0.5, %v2913_v28  ;;  %v2915_v6 = vpop.eup %2914  ;;  %v3705_v28 = vrot.slane %v85_v26, %v5169_v27  ;;  %5174 = vst [vmem:[#allocation73_spill] sm:$0xff] %v3712_v3 }
 0x1a2   :  { %v1121_v9 = vadd.f32 0.5, %v1120_v0  ;;  %v2842_v0 = vld [vmem:[%s4680_s0 + $0x28] sm:$0xff] }
 0x1a3   :  { %v1125_v54 = vadd.f32 0.5, %v1124_v45  ;;  %2003 = vperm.xlu1 %2891, %v2842_v0   ;;  %5170 = vst [vmem:[#allocation84_spill] sm:$0xff] %v3705_v28 }
 0x1a4   :  { %v1132_v14 = vmul.f32 %v2915_v6, %v1121_v9  ;;  %v5175_v6 = vld [vmem:[#allocation81_spill] sm:$0xff] }
 0x1a5   :  { %v1131_v12 = vmul.f32 %v1125_v54, %v5168_v17  ;;  %v3708_v54 = vrot.slane %v85_v26, %v5171_v29 }
 0x1a7   :  { %v3687_v59 = vadd.f32 %v1132_v14, %v1131_v12  ;;  %2453 = vperm.xlu1 %2891, %v2844_v13   ;;  %5172 = vst [vmem:[#allocation72_spill] sm:$0xff] %v3708_v54  ;;  %v1109_v14 = vmul.f32 %v1104_v19, %v5175_v6 }
 0x1d0   :  { %v1029_v4 = vpop.f32.mrb[4].mxu0  ;;  %v1070_v46 = vpop.f32.mrb[4].mxu1 }
 0x1d1   :  { %v1077_v30 = vadd.f32 %v1029_v4, %v3705_v28  ;;  %v1031_v45 = vpop.f32.mrb[5].mxu0  ;;  %v1072_v9 = vpop.f32.mrb[5].mxu1  ;;  %v1079_v29 = vadd.f32 %v1070_v46, %v3712_v3  ;;  %v3718_v4 = vrot.slane %v85_v26, %v5176_v18  ;;  %v1113_v28 = vadd.f32 %v1109_v14, %v5178_v21 }
 0x1d2   :  { %v1078_v17 = vadd.f32 %v1031_v45, %v3708_v54  ;;  %v1033_v12 = vpop.f32.mrb[6].mxu0  ;;  %v1074_v1 = vpop.f32.mrb[6].mxu1 }
 0x1d3   :  { %v1081_v2 = vmul.f32 0.5, %v1077_v30  ;;  %v1034_v0 = vpop.f32.mrb[7].mxu0  ;;  %v1075_v13 = vpop.f32.mrb[7].mxu1  ;;  %5177 = vst [vmem:[#allocation74_spill] sm:$0xff] %v3718_v4  ;;  %v1117_v63 = vadd.f32 %v1113_v28, %v990_v60  ;;  %v1080_v19 = vadd.f32 %v1072_v9, %v3718_v4 }
 0x1d4   :  { %v1085_v27 = vmul.f32 0.5, %v1078_v17 }
 0x1d5   :  { %2916 = vtanh.f32 %v1081_v2  ;;  %v1127_v45 = vmul.f32 0.5, %v1117_v63  ;;  %v1090_v12 = vmul.f32 0.5, %v1080_v19 }
 0x1d6   :  { %2918 = vtanh.f32 %v1085_v27 }
 0x1d7   :  { %2920 = vtanh.f32 %v1079_v29 }
 0x1d8   :  { %2922 = vtanh.f32 %v1127_v45 }
 0x1d9   :  { %2924 = vtanh.f32 %v1090_v12 }
 0x1da   :  { %2926 = vtanh.f32 %v3687_v59 }
 0x1df   :  { %v2917_v1 = vpop.eup %2916 }
 0x1e0   :  { %v2919_v30 = vpop.eup %2918  ;;  %v1083_v0 = vmul.f32 0.5, %v2917_v1 }
 0x1e1   :  { %v1087_v17 = vmul.f32 0.5, %v2919_v30  ;;  %v2921_v46 = vpop.eup %2920 }
 0x1e2   :  { %v1084_v2 = vadd.f32 0.5, %v1083_v0  ;;  %v2923_v60 = vpop.eup %2922 }
 0x1e3   :  { %v1088_v13 = vadd.f32 0.5, %v1087_v17  ;;  %v2925_v63 = vpop.eup %2924  ;;  %v1129_v28 = vmul.f32 0.5, %v2923_v60  ;;  %v5179_v17 = vld [vmem:[#allocation47_spill] sm:$0xff]  ;;  %v5185_v60 = vld [vmem:[#allocation90_spill] sm:$0xff] }
 0x1e4   :  { %v1095_v18 = vmul.f32 %v2921_v46, %v1084_v2  ;;  %v1092_v9 = vmul.f32 0.5, %v2925_v63  ;;  %v2927_v27 = vpop.eup %2926  ;;  %v5180_v2 = vld [vmem:[#allocation85_spill] sm:$0xff]  ;;  %v5181_v46 = vld [vmem:[#allocation86_spill] sm:$0xff]  ;;  %v5186_v63 = vld [vmem:[#allocation91_spill] sm:$0xff] }
 0x1e5   :  { %v1094_v26 = vmul.f32 0.0, %v1088_v13  ;;  %v1130_v29 = vadd.f32 0.5, %v1129_v28  ;;  %v5182_v13 = vld [vmem:[#allocation87_spill] sm:$0xff]  ;;  %v5187_v28 = vld [vmem:[#allocation92_spill] sm:$0xff] }
 0x1e6   :  { %v1093_v19 = vadd.f32 0.5, %v1092_v9  ;;  %v5188_v9 = vld [vmem:[#allocation93_spill] sm:$0xff] }
 0x1e7   :  { %v3723_v14 = vadd.f32 %v1095_v18, %v1094_v26  ;;  %v1135_v12 = vmul.f32 %v2927_v27, %v1130_v29  ;;  %v5183_v18 = vld [vmem:[#allocation88_spill] sm:$0xff]  ;;  %v5184_v26 = vld [vmem:[#allocation89_spill] sm:$0xff]  ;;  %v5189_v27 = vld [vmem:[#allocation94_spill] sm:$0xff] }
 0x1e8   :  { %v5190_v29 = vld [vmem:[#allocation95_spill] sm:$0xff] }
 0x1e9   :  { %2928 = vtanh.f32 %v3723_v14  ;;  %v3726_v0 = vpack.c.bf16 %v1135_v12, %v1135_v12  ;;  %v5193_v12 = vld [vmem:[#allocation98_spill] sm:$0xff] }
 0x1f3   :  { %v2929_v45 = vpop.eup %2928 }
 0x1f4   :  { %v1098_v1 = vmul.f32 %v2929_v45, %v1093_v19  ;;  %v5191_v19 = vld [vmem:[#allocation96_spill] sm:$0xff]  ;;  %v5192_v45 = vld [vmem:[#allocation97_spill] sm:$0xff] }
 0x1f6   :  { %v1137_v30 = vpack.c.bf16 %v1098_v1, %v1098_v1  ;;  %v5194_v1 = vld [vmem:[#allocation99_spill] sm:$0xff] }
 0x1f8   :  { %1170 = vmatprep.mubr.bf16.mxu0 %v1137_v30  ;;  %1211 = vmatprep.mubr.bf16.mxu1 %v1137_v30 }
 0x1f9   :  { %1171 = vmatmul.mubr.bf16.vlgmr.msra.gmra.mrb[8].mxu0 %v3726_v0  ;;  %1212 = vmatmul.mubr.bf16.vlgmr.msra.gmra.mrb[8].mxu1 %v3726_v0 }
 0x1fa   :  { %1221 = vmatpush1.bf16.msra.mxu0 %v3289_v62  ;;  %1262 = vmatpush1.bf16.msra.mxu1 %v5179_v17 }
 0x1fb   :  { %1252 = vmatprep.mubr.bf16.mxu0 %v1137_v30  ;;  %1293 = vmatprep.mubr.bf16.mxu1 %v1137_v30  ;;  %v5195_v30 = vld [vmem:[#allocation100_spill] sm:$0xff] }
 0x1fc   :  { %1222 = vmatprep.subr.bf16.mxu0 %v5180_v2  ;;  %1263 = vmatprep.subr.bf16.mxu1 %v5181_v46 }
 0x1fe   :  { %1223 = vmatpush1.bf16.msra.mxu0 %v5182_v13  ;;  %1264 = vmatpush1.bf16.msra.mxu1 %v5183_v18 }
 0x1ff   :  { %1224 = vmatprep.subr.bf16.mxu0 %v5184_v26  ;;  %1265 = vmatprep.subr.bf16.mxu1 %v5185_v60  ;;  %v5196_v60 = vld [vmem:[#allocation101_spill] sm:$0xff] }
 0x202   :  { %1225 = vmatpush1.bf16.msra.mxu0 %v5186_v63  ;;  %1266 = vmatpush1.bf16.msra.mxu1 %v5187_v28  ;;  %v5197_v63 = vld [vmem:[#allocation102_spill] sm:$0xff]  ;;  %v5198_v28 = vld [vmem:[#allocation103_spill] sm:$0xff] }
 0x203   :  { %1226 = vmatprep.subr.bf16.mxu0 %v5188_v9  ;;  %1267 = vmatprep.subr.bf16.mxu1 %v5189_v27  ;;  %v5199_v9 = vld [vmem:[#allocation104_spill] sm:$0xff]  ;;  %v5200_v27 = vld [vmem:[#allocation105_spill] sm:$0xff] }
 0x206   :  { %1227 = vmatpush1.bf16.msra.mxu0 %v5190_v29  ;;  %1268 = vmatpush1.bf16.msra.mxu1 %v5191_v19  ;;  %v5201_v29 = vld [vmem:[#allocation106_spill] sm:$0xff]  ;;  %v5202_v19 = vld [vmem:[#allocation107_spill] sm:$0xff] }
 0x207   :  { %1228 = vmatprep.subr.bf16.mxu0 %v5192_v45  ;;  %1269 = vmatprep.subr.bf16.mxu1 %v5193_v12  ;;  %v5203_v45 = vld [vmem:[#allocation108_spill] sm:$0xff]  ;;  %v5204_v12 = vld [vmem:[#allocation109_spill] sm:$0xff] }
 0x20a   :  { %1229 = vmatpush1.bf16.msra.mxu0 %v5194_v1  ;;  %1270 = vmatpush1.bf16.msra.mxu1 %v5195_v30  ;;  %v5205_v1 = vld [vmem:[#allocation110_spill] sm:$0xff]  ;;  %v5206_v30 = vld [vmem:[#allocation111_spill] sm:$0xff] }
 0x20b   :  { %1230 = vmatprep.subr.bf16.mxu0 %v5196_v60  ;;  %1271 = vmatprep.subr.bf16.mxu1 %v5197_v63  ;;  %v5207_v60 = vld [vmem:[#allocation112_spill] sm:$0xff]  ;;  %v5208_v63 = vld [vmem:[#allocation113_spill] sm:$0xff] }
 0x20e   :  { %1231 = vmatpush1.bf16.msra.mxu0 %v5198_v28  ;;  %1272 = vmatpush1.bf16.msra.mxu1 %v5199_v9  ;;  %v5209_v28 = vld [vmem:[#allocation114_spill] sm:$0xff]  ;;  %v5210_v9 = vld [vmem:[#allocation115_spill] sm:$0xff] }
 0x20f   :  { %1232 = vmatprep.subr.bf16.mxu0 %v5200_v27  ;;  %1273 = vmatprep.subr.bf16.mxu1 %v5201_v29  ;;  %v5211_v27 = vld [vmem:[#allocation116_spill] sm:$0xff]  ;;  %v5212_v29 = vld [vmem:[#allocation117_spill] sm:$0xff] }
 0x212   :  { %1233 = vmatpush1.bf16.msra.mxu0 %v5202_v19  ;;  %1274 = vmatpush1.bf16.msra.mxu1 %v5203_v45  ;;  %v5213_v19 = vld [vmem:[#allocation118_spill] sm:$0xff]  ;;  %v5214_v45 = vld [vmem:[#allocation119_spill] sm:$0xff] }
 0x213   :  { %1234 = vmatprep.subr.bf16.mxu0 %v5204_v12  ;;  %1275 = vmatprep.subr.bf16.mxu1 %v5205_v1  ;;  %v5215_v12 = vld [vmem:[#allocation120_spill] sm:$0xff]  ;;  %v5216_v1 = vld [vmem:[#allocation121_spill] sm:$0xff] }
 0x216   :  { %1235 = vmatpush1.bf16.msra.mxu0 %v5206_v30  ;;  %1276 = vmatpush1.bf16.msra.mxu1 %v5207_v60  ;;  %v5217_v30 = vld [vmem:[#allocation122_spill] sm:$0xff]  ;;  %v5218_v60 = vld [vmem:[#allocation123_spill] sm:$0xff] }
 0x217   :  { %1236 = vmatprep.subr.bf16.mxu0 %v5208_v63  ;;  %1277 = vmatprep.subr.bf16.mxu1 %v5209_v28  ;;  %v5219_v63 = vld [vmem:[#allocation124_spill] sm:$0xff]  ;;  %v5220_v28 = vld [vmem:[#allocation125_spill] sm:$0xff] }
 0x21a   :  { %1237 = vmatpush1.bf16.msra.mxu0 %v5210_v9  ;;  %1278 = vmatpush1.bf16.msra.mxu1 %v5211_v27  ;;  %v5221_v9 = vld [vmem:[#allocation126_spill] sm:$0xff]  ;;  %v5222_v27 = vld [vmem:[#allocation127_spill] sm:$0xff] }
 0x21b   :  { %1238 = vmatprep.subr.bf16.mxu0 %v5212_v29  ;;  %1279 = vmatprep.subr.bf16.mxu1 %v5213_v19  ;;  %v5223_v29 = vld [vmem:[#allocation128_spill] sm:$0xff]  ;;  %v5224_v19 = vld [vmem:[#allocation129_spill] sm:$0xff] }
 0x21e   :  { %1239 = vmatpush1.bf16.msra.mxu0 %v5214_v45  ;;  %1280 = vmatpush1.bf16.msra.mxu1 %v5215_v12  ;;  %v5225_v45 = vld [vmem:[#allocation130_spill] sm:$0xff] }
 0x21f   :  { %1240 = vmatprep.subr.bf16.mxu0 %v5216_v1  ;;  %1281 = vmatprep.subr.bf16.mxu1 %v5217_v30 }
 0x222   :  { %1241 = vmatpush1.bf16.msra.mxu0 %v5218_v60  ;;  %1282 = vmatpush1.bf16.msra.mxu1 %v5219_v63  ;;  %v5226_v60 = vld [vmem:[#allocation134_spill] sm:$0xff]  ;;  %v5227_v63 = vld [vmem:[#allocation135_spill] sm:$0xff] }
 0x223   :  { %1242 = vmatprep.subr.bf16.mxu0 %v5220_v28  ;;  %1283 = vmatprep.subr.bf16.mxu1 %v5221_v9 }
 0x226   :  { %1243 = vmatpush1.bf16.msra.mxu0 %v5222_v27  ;;  %1284 = vmatpush1.bf16.msra.mxu1 %v5223_v29 }
 0x227   :  { %1244 = vmatprep.subr.bf16.mxu0 %v5224_v19  ;;  %1285 = vmatprep.subr.bf16.mxu1 %v5225_v45 }
 0x22a   :  { %1245 = vmatpush1.bf16.msra.mxu0 %v3568_v35  ;;  %1286 = vmatpush1.bf16.msra.mxu1 %v3570_v36 }
 0x22b   :  { %1246 = vmatprep.subr.bf16.mxu0 %v3574_v20  ;;  %1287 = vmatprep.subr.bf16.mxu1 %v5226_v60 }
 0x22e   :  { %1247 = vmatpush1.bf16.msra.mxu0 %v5227_v63  ;;  %1288 = vmatpush1.bf16.msra.mxu1 %v3582_v52 }
 0x22f   :  { %1248 = vmatprep.subr.bf16.mxu0 %v3586_v61  ;;  %1289 = vmatprep.subr.bf16.mxu1 %v3588_v53 }
 0x232   :  { %1249 = vmatpush1.bf16.msra.mxu0 %v3592_v44  ;;  %1290 = vmatpush1.bf16.msra.mxu1 %v3594_v51 }
 0x233   :  { %1250 = vmatprep.subr.bf16.mxu0 %v3598_v43  ;;  %1291 = vmatprep.subr.bf16.mxu1 %v3600_v7 }
 0x236   :  { %1251 = vmatpush1.bf16.msra.mxu0 %v3604_v38  ;;  %1292 = vmatpush1.bf16.msra.mxu1 %v3606_v37 }
 0x237   :  { %1363 = vmatprep.subr.bf16.mxu0 %v3149_v5  ;;  %1404 = vmatprep.subr.bf16.mxu1 %v3153_v10 }
 0x239   :  { %1253 = vmatmul.mubr.bf16.vlgmr.msra.gmra.mrb[12].mxu0 %v3726_v0  ;;  %1294 = vmatmul.mubr.bf16.vlgmr.msra.gmra.mrb[12].mxu1 %v3726_v0  ;;  %v5228_v0 = vld [vmem:[#allocation31_spill] sm:$0xff] }
 0x23a   :  { %1364 = vmatpush1.bf16.msra.mxu0 %v3151_v8  ;;  %1405 = vmatpush1.bf16.msra.mxu1 %v3155_v11 }
 0x23b   :  { %1365 = vmatprep.subr.bf16.mxu0 %v3158_v15  ;;  %1406 = vmatprep.subr.bf16.mxu1 %v3160_v16 }
 0x23e   :  { %1366 = vmatpush1.bf16.msra.mxu0 %v3168_v22  ;;  %1407 = vmatpush1.bf16.msra.mxu1 %v3170_v23 }
 0x23f   :  { %1367 = vmatprep.subr.bf16.mxu0 %v3174_v24  ;;  %1408 = vmatprep.subr.bf16.mxu1 %v3176_v25  ;;  %v5273_v25 = vld [vmem:[#allocation82_spill] sm:$0xff] }
 0x242   :  { %1368 = vmatpush1.bf16.msra.mxu0 %v3183_v31  ;;  %1409 = vmatpush1.bf16.msra.mxu1 %v3185_v32 }
 0x243   :  { %1369 = vmatprep.subr.bf16.mxu0 %v3189_v33  ;;  %1410 = vmatprep.subr.bf16.mxu1 %v3191_v34 }
 0x246   :  { %1370 = vmatpush1.bf16.msra.mxu0 %v3195_v39  ;;  %1411 = vmatpush1.bf16.msra.mxu1 %v3197_v40 }
 0x247   :  { %1371 = vmatprep.subr.bf16.mxu0 %v3201_v41  ;;  %1412 = vmatprep.subr.bf16.mxu1 %v3203_v42  ;;  %v5229_v41 = vld [vmem:[#allocation32_spill] sm:$0xff]  ;;  %v5230_v42 = vld [vmem:[#allocation33_spill] sm:$0xff] }
 0x24a   :  { %1372 = vmatpush1.bf16.msra.mxu0 %v3207_v47  ;;  %1413 = vmatpush1.bf16.msra.mxu1 %v3209_v48  ;;  %v5231_v47 = vld [vmem:[#allocation34_spill] sm:$0xff]  ;;  %v5232_v48 = vld [vmem:[#allocation35_spill] sm:$0xff] }
 0x24b   :  { %1373 = vmatprep.subr.bf16.mxu0 %v3213_v49  ;;  %1414 = vmatprep.subr.bf16.mxu1 %v3215_v50  ;;  %v5233_v49 = vld [vmem:[#allocation36_spill] sm:$0xff]  ;;  %v5234_v50 = vld [vmem:[#allocation37_spill] sm:$0xff] }
 0x24e   :  { %1374 = vmatpush1.bf16.msra.mxu0 %v3219_v55  ;;  %1415 = vmatpush1.bf16.msra.mxu1 %v3221_v56  ;;  %v5235_v55 = vld [vmem:[#allocation38_spill] sm:$0xff]  ;;  %v5236_v56 = vld [vmem:[#allocation39_spill] sm:$0xff] }
 0x24f   :  { %1375 = vmatprep.subr.bf16.mxu0 %v3225_v57  ;;  %1416 = vmatprep.subr.bf16.mxu1 %v3227_v58  ;;  %v5237_v57 = vld [vmem:[#allocation40_spill] sm:$0xff]  ;;  %v5238_v58 = vld [vmem:[#allocation41_spill] sm:$0xff] }
 0x252   :  { %1376 = vmatpush1.bf16.msra.mxu0 %v5228_v0  ;;  %1417 = vmatpush1.bf16.msra.mxu1 %v5229_v41  ;;  %v5239_v0 = vld [vmem:[#allocation42_spill] sm:$0xff]  ;;  %v5240_v41 = vld [vmem:[#allocation43_spill] sm:$0xff] }
 0x253   :  { %1377 = vmatprep.subr.bf16.mxu0 %v5230_v42  ;;  %1418 = vmatprep.subr.bf16.mxu1 %v5231_v47  ;;  %v5241_v42 = vld [vmem:[#allocation44_spill] sm:$0xff]  ;;  %v5242_v47 = vld [vmem:[#allocation45_spill] sm:$0xff] }
 0x256   :  { %1378 = vmatpush1.bf16.msra.mxu0 %v5232_v48  ;;  %1419 = vmatpush1.bf16.msra.mxu1 %v5233_v49  ;;  %v5243_v48 = vld [vmem:[#allocation46_spill] sm:$0xff]  ;;  %v5244_v49 = vld [vmem:[#allocation48_spill] sm:$0xff] }
 0x257   :  { %1379 = vmatprep.subr.bf16.mxu0 %v5234_v50  ;;  %1420 = vmatprep.subr.bf16.mxu1 %v5235_v55  ;;  %v5245_v50 = vld [vmem:[#allocation49_spill] sm:$0xff]  ;;  %v5246_v55 = vld [vmem:[#allocation50_spill] sm:$0xff] }
 0x25a   :  { %1380 = vmatpush1.bf16.msra.mxu0 %v5236_v56  ;;  %1421 = vmatpush1.bf16.msra.mxu1 %v5237_v57  ;;  %v5247_v56 = vld [vmem:[#allocation51_spill] sm:$0xff]  ;;  %v5248_v57 = vld [vmem:[#allocation52_spill] sm:$0xff] }
 0x25b   :  { %1381 = vmatprep.subr.bf16.mxu0 %v5238_v58  ;;  %1422 = vmatprep.subr.bf16.mxu1 %v5239_v0  ;;  %v5249_v58 = vld [vmem:[#allocation53_spill] sm:$0xff]  ;;  %v5250_v0 = vld [vmem:[#allocation54_spill] sm:$0xff] }
 0x25e   :  { %1382 = vmatpush1.bf16.msra.mxu0 %v5240_v41  ;;  %1423 = vmatpush1.bf16.msra.mxu1 %v5241_v42  ;;  %v5251_v41 = vld [vmem:[#allocation55_spill] sm:$0xff]  ;;  %v5252_v42 = vld [vmem:[#allocation56_spill] sm:$0xff] }
 0x25f   :  { %1383 = vmatprep.subr.bf16.mxu0 %v5242_v47  ;;  %1424 = vmatprep.subr.bf16.mxu1 %v5243_v48  ;;  %v5253_v47 = vld [vmem:[#allocation57_spill] sm:$0xff]  ;;  %v5254_v48 = vld [vmem:[#allocation58_spill] sm:$0xff] }
 0x262   :  { %1384 = vmatpush1.bf16.msra.mxu0 %v5244_v49  ;;  %1425 = vmatpush1.bf16.msra.mxu1 %v5245_v50  ;;  %v5255_v49 = vld [vmem:[#allocation59_spill] sm:$0xff]  ;;  %v5256_v50 = vld [vmem:[#allocation60_spill] sm:$0xff] }
 0x263   :  { %1385 = vmatprep.subr.bf16.mxu0 %v5246_v55  ;;  %1426 = vmatprep.subr.bf16.mxu1 %v5247_v56  ;;  %v5257_v55 = vld [vmem:[#allocation61_spill] sm:$0xff]  ;;  %v5258_v56 = vld [vmem:[#allocation62_spill] sm:$0xff] }
 0x266   :  { %1386 = vmatpush1.bf16.msra.mxu0 %v5248_v57  ;;  %1427 = vmatpush1.bf16.msra.mxu1 %v5249_v58  ;;  %v5259_v57 = vld [vmem:[#allocation63_spill] sm:$0xff]  ;;  %v5260_v58 = vld [vmem:[#allocation64_spill] sm:$0xff] }
 0x267   :  { %1387 = vmatprep.subr.bf16.mxu0 %v5250_v0  ;;  %1428 = vmatprep.subr.bf16.mxu1 %v5251_v41  ;;  %v5261_v0 = vld [vmem:[#allocation65_spill] sm:$0xff]  ;;  %v5262_v41 = vld [vmem:[#allocation66_spill] sm:$0xff] }
 0x26a   :  { %1388 = vmatpush1.bf16.msra.mxu0 %v5252_v42  ;;  %1429 = vmatpush1.bf16.msra.mxu1 %v5253_v47  ;;  %v5263_v42 = vld [vmem:[#allocation67_spill] sm:$0xff]  ;;  %v5264_v47 = vld [vmem:[#allocation68_spill] sm:$0xff] }
 0x26b   :  { %1389 = vmatprep.subr.bf16.mxu0 %v5254_v48  ;;  %1430 = vmatprep.subr.bf16.mxu1 %v5255_v49  ;;  %v5265_v48 = vld [vmem:[#allocation69_spill] sm:$0xff]  ;;  %v5266_v49 = vld [vmem:[#allocation70_spill] sm:$0xff] }
 0x26e   :  { %1390 = vmatpush1.bf16.msra.mxu0 %v5256_v50  ;;  %1431 = vmatpush1.bf16.msra.mxu1 %v5257_v55  ;;  %v5267_v50 = vld [vmem:[#allocation71_spill] sm:$0xff]  ;;  %v1329_v55 = vpop.permute.xlu1 %1328 }
 0x26f   :  { %1391 = vmatprep.subr.bf16.mxu0 %v5258_v56  ;;  %1432 = vmatprep.subr.bf16.mxu1 %v5259_v57  ;;  %v5268_v56 = vld [vmem:[#allocation75_spill] sm:$0xff]  ;;  %v5269_v57 = vld [vmem:[#allocation76_spill] sm:$0xff] }
 0x270   :  { %v1331_v40 = vmul.f32 %v1329_v55, %v5268_v56  ;;  %v1332_v39 = vmul.f32 %v1329_v55, %v5269_v57 }
 0x272   :  { %1392 = vmatpush1.bf16.msra.mxu0 %v5260_v58  ;;  %1433 = vmatpush1.bf16.msra.mxu1 %v5261_v0  ;;  %v5270_v58 = vld [vmem:[#allocation79_spill] sm:$0xff]  ;;  %v5271_v0 = vld [vmem:[#allocation78_spill] sm:$0xff] }
 0x273   :  { %1393 = vmatprep.subr.bf16.mxu0 %v5262_v41  ;;  %1434 = vmatprep.subr.bf16.mxu1 %v5263_v42  ;;  %v1335_v34 = vadd.f32 %v1331_v40, %v5270_v58  ;;  %v1333_v33 = vmul.f32 %v1329_v55, %v5271_v0  ;;  %v5272_v41 = vld [vmem:[#allocation80_spill] sm:$0xff] }
 0x274   :  { %v1336_v32 = vadd.f32 %v1332_v39, %v5272_v41 }
 0x276   :  { %1394 = vmatpush1.bf16.msra.mxu0 %v5264_v47  ;;  %1435 = vmatpush1.bf16.msra.mxu1 %v5265_v48  ;;  %v1337_v48 = vadd.f32 %v1333_v33, %v5273_v25 }
 0x277   :  { %1445 = vmatprep.subr.bf16.mxu0 %v5266_v49  ;;  %1486 = vmatprep.subr.bf16.mxu1 %v5267_v50 }
 0x2cc   :  { %v1172_v42 = vpop.f32.mrb[8].mxu0  ;;  %v1213_v31 = vpop.f32.mrb[8].mxu1 }
 0x2cd   :  { %v1339_v47 = vadd.f32 %v1335_v34, %v1172_v42  ;;  %v1174_v24 = vpop.f32.mrb[9].mxu0  ;;  %v1215_v49 = vpop.f32.mrb[9].mxu1  ;;  %v1341_v40 = vadd.f32 %v1337_v48, %v1213_v31 }
 0x2ce   :  { %v1340_v23 = vadd.f32 %v1336_v32, %v1174_v24  ;;  %v1176_v50 = vpop.f32.mrb[10].mxu0  ;;  %v1217_v22 = vpop.f32.mrb[10].mxu1 }
 0x2cf   :  { %v1343_v16 = vmul.f32 0.5, %v1339_v47  ;;  %v1177_v56 = vpop.f32.mrb[11].mxu0  ;;  %v1218_v15 = vpop.f32.mrb[11].mxu1  ;;  %v1334_v22 = vmul.f32 %v1329_v55, %v5175_v6 }
 0x2d0   :  { %v1347_v57 = vmul.f32 0.5, %v1340_v23 }
 0x2d1   :  { %2930 = vtanh.f32 %v1343_v16  ;;  %v5274_v16 = vld [vmem:[#allocation84_spill] sm:$0xff] }
 0x2d2   :  { %2932 = vtanh.f32 %v1347_v57 }
 0x2d3   :  { %2934 = vtanh.f32 %v1341_v40  ;;  %v1338_v40 = vadd.f32 %v1334_v22, %v5178_v21 }
 0x2d5   :  { %v1342_v55 = vadd.f32 %v1338_v40, %v1215_v49 }
 0x2db   :  { %v2931_v0 = vpop.eup %2930 }
 0x2dc   :  { %v2933_v39 = vpop.eup %2932  ;;  %v1345_v41 = vmul.f32 0.5, %v2931_v0 }
 0x2dd   :  { %v1349_v58 = vmul.f32 0.5, %v2933_v39  ;;  %v2935_v42 = vpop.eup %2934 }
 0x2de   :  { %v1346_v34 = vadd.f32 0.5, %v1345_v41 }
 0x2df   :  { %v1350_v33 = vadd.f32 0.5, %v1349_v58 }
 0x2e0   :  { %v1357_v25 = vmul.f32 %v2935_v42, %v1346_v34  ;;  %v1352_v34 = vmul.f32 0.5, %v1342_v55 }
 0x2e1   :  { %v1356_v24 = vmul.f32 %v1350_v33, %v3687_v59 }
 0x2e3   :  { %v3867_v32 = vadd.f32 %v1357_v25, %v1356_v24 }
 0x30c   :  { %v1254_v15 = vpop.f32.mrb[12].mxu0  ;;  %v1295_v23 = vpop.f32.mrb[12].mxu1 }
 0x30d   :  { %v1302_v31 = vadd.f32 %v1254_v15, %v5274_v16  ;;  %v1256_v47 = vpop.f32.mrb[13].mxu0  ;;  %v1297_v48 = vpop.f32.mrb[13].mxu1  ;;  %v1304_v25 = vadd.f32 %v1295_v23, %v3712_v3 }
 0x30e   :  { %v1303_v50 = vadd.f32 %v1256_v47, %v3708_v54  ;;  %v1258_v56 = vpop.f32.mrb[14].mxu0  ;;  %v1299_v57 = vpop.f32.mrb[14].mxu1  ;;  %v1305_v39 = vadd.f32 %v1297_v48, %v3718_v4 }
 0x30f   :  { %v1306_v41 = vmul.f32 0.5, %v1302_v31  ;;  %v1259_v0 = vpop.f32.mrb[15].mxu0  ;;  %v1300_v58 = vpop.f32.mrb[15].mxu1 }
 0x310   :  { %v1310_v59 = vmul.f32 0.5, %v1303_v50  ;;  %v1315_v42 = vmul.f32 0.5, %v1305_v39 }
 0x311   :  { %2936 = vtanh.f32 %v1306_v41 }
 0x312   :  { %2938 = vtanh.f32 %v1310_v59 }
 0x313   :  { %2940 = vtanh.f32 %v1304_v25 }
 0x314   :  { %2942 = vtanh.f32 %v1352_v34 }
 0x315   :  { %2944 = vtanh.f32 %v1315_v42 }
 0x316   :  { %2946 = vtanh.f32 %v3867_v32 }
 0x31b   :  { %v2937_v33 = vpop.eup %2936 }
 0x31c   :  { %v2939_v24 = vpop.eup %2938  ;;  %v1308_v15 = vmul.f32 0.5, %v2937_v33  ;;  %v5276_v33 = vld [vmem:[#allocation91_spill] sm:$0xff] }
 0x31d   :  { %v1312_v31 = vmul.f32 0.5, %v2939_v24  ;;  %v2941_v56 = vpop.eup %2940  ;;  %v5277_v24 = vld [vmem:[#allocation92_spill] sm:$0xff] }
 0x31e   :  { %v1309_v47 = vadd.f32 0.5, %v1308_v15  ;;  %v2943_v23 = vpop.eup %2942  ;;  %v5278_v15 = vld [vmem:[#allocation93_spill] sm:$0xff] }
 0x31f   :  { %v1313_v22 = vadd.f32 0.5, %v1312_v31  ;;  %v2945_v48 = vpop.eup %2944  ;;  %v1354_v41 = vmul.f32 0.5, %v2943_v23  ;;  %v5279_v31 = vld [vmem:[#allocation94_spill] sm:$0xff]  ;;  %v5285_v23 = vld [vmem:[#allocation100_spill] sm:$0xff] }
 0x320   :  { %v1320_v50 = vmul.f32 %v2941_v56, %v1309_v47  ;;  %v1317_v0 = vmul.f32 0.5, %v2945_v48  ;;  %v2947_v58 = vpop.eup %2946  ;;  %v5280_v47 = vld [vmem:[#allocation95_spill] sm:$0xff]  ;;  %v5281_v56 = vld [vmem:[#allocation96_spill] sm:$0xff]  ;;  %v5286_v48 = vld [vmem:[#allocation101_spill] sm:$0xff] }
 0x321   :  { %v1319_v57 = vmul.f32 %v1313_v22, %v3723_v14  ;;  %v1355_v40 = vadd.f32 0.5, %v1354_v41  ;;  %v5275_v14 = vld [vmem:[#allocation90_spill] sm:$0xff]  ;;  %v5282_v22 = vld [vmem:[#allocation97_spill] sm:$0xff] }
 0x322   :  { %v1318_v59 = vadd.f32 0.5, %v1317_v0  ;;  %v5287_v41 = vld [vmem:[#allocation102_spill] sm:$0xff]  ;;  %v5288_v0 = vld [vmem:[#allocation103_spill] sm:$0xff] }
 0x323   :  { %v3877_v49 = vadd.f32 %v1320_v50, %v1319_v57  ;;  %v1360_v55 = vmul.f32 %v2947_v58, %v1355_v40  ;;  %v5283_v50 = vld [vmem:[#allocation98_spill] sm:$0xff]  ;;  %v5284_v57 = vld [vmem:[#allocation99_spill] sm:$0xff]  ;;  %v5289_v58 = vld [vmem:[#allocation104_spill] sm:$0xff] }
 0x324   :  { %v5290_v40 = vld [vmem:[#allocation105_spill] sm:$0xff] }
 0x325   :  { %2948 = vtanh.f32 %v3877_v49  ;;  %v3880_v42 = vpack.c.bf16 %v1360_v55, %v1360_v55  ;;  %v5293_v55 = vld [vmem:[#allocation108_spill] sm:$0xff] }
 0x32f   :  { %v2949_v25 = vpop.eup %2948 }
 0x330   :  { %v1323_v39 = vmul.f32 %v2949_v25, %v1318_v59  ;;  %v5291_v59 = vld [vmem:[#allocation106_spill] sm:$0xff]  ;;  %v5292_v25 = vld [vmem:[#allocation107_spill] sm:$0xff] }
 0x332   :  { %v1362_v34 = vpack.c.bf16 %v1323_v39, %v1323_v39  ;;  %v5294_v39 = vld [vmem:[#allocation109_spill] sm:$0xff] }
 0x334   :  { %1395 = vmatprep.mubr.bf16.mxu0 %v1362_v34  ;;  %1436 = vmatprep.mubr.bf16.mxu1 %v1362_v34 }
 0x335   :  { %1396 = vmatmul.mubr.bf16.vlgmr.msra.gmra.mrb[16].mxu0 %v3880_v42  ;;  %1437 = vmatmul.mubr.bf16.vlgmr.msra.gmra.mrb[16].mxu1 %v3880_v42 }
 0x336   :  { %1446 = vmatpush1.bf16.msra.mxu0 %v3289_v62  ;;  %1487 = vmatpush1.bf16.msra.mxu1 %v5179_v17 }
 0x337   :  { %1477 = vmatprep.mubr.bf16.mxu0 %v1362_v34  ;;  %1518 = vmatprep.mubr.bf16.mxu1 %v1362_v34  ;;  %v5295_v34 = vld [vmem:[#allocation110_spill] sm:$0xff] }
 0x338   :  { %1447 = vmatprep.subr.bf16.mxu0 %v5180_v2  ;;  %1488 = vmatprep.subr.bf16.mxu1 %v5181_v46 }
 0x33a   :  { %1448 = vmatpush1.bf16.msra.mxu0 %v5182_v13  ;;  %1489 = vmatpush1.bf16.msra.mxu1 %v5183_v18 }
 0x33b   :  { %1449 = vmatprep.subr.bf16.mxu0 %v5184_v26  ;;  %1490 = vmatprep.subr.bf16.mxu1 %v5275_v14 }
 0x33e   :  { %1450 = vmatpush1.bf16.msra.mxu0 %v5276_v33  ;;  %1491 = vmatpush1.bf16.msra.mxu1 %v5277_v24 }
 0x33f   :  { %1451 = vmatprep.subr.bf16.mxu0 %v5278_v15  ;;  %1492 = vmatprep.subr.bf16.mxu1 %v5279_v31 }
 0x342   :  { %1452 = vmatpush1.bf16.msra.mxu0 %v5280_v47  ;;  %1493 = vmatpush1.bf16.msra.mxu1 %v5281_v56 }
 0x343   :  { %1453 = vmatprep.subr.bf16.mxu0 %v5282_v22  ;;  %1494 = vmatprep.subr.bf16.mxu1 %v5283_v50 }
 0x346   :  { %1454 = vmatpush1.bf16.msra.mxu0 %v5284_v57  ;;  %1495 = vmatpush1.bf16.msra.mxu1 %v5285_v23  ;;  %v5296_v23 = vld [vmem:[#allocation111_spill] sm:$0xff] }
 0x347   :  { %1455 = vmatprep.subr.bf16.mxu0 %v5286_v48  ;;  %1496 = vmatprep.subr.bf16.mxu1 %v5287_v41  ;;  %v5297_v48 = vld [vmem:[#allocation112_spill] sm:$0xff]  ;;  %v5298_v41 = vld [vmem:[#allocation113_spill] sm:$0xff] }
 0x34a   :  { %1456 = vmatpush1.bf16.msra.mxu0 %v5288_v0  ;;  %1497 = vmatpush1.bf16.msra.mxu1 %v5289_v58  ;;  %v5299_v0 = vld [vmem:[#allocation114_spill] sm:$0xff]  ;;  %v5300_v58 = vld [vmem:[#allocation115_spill] sm:$0xff] }
 0x34b   :  { %1457 = vmatprep.subr.bf16.mxu0 %v5290_v40  ;;  %1498 = vmatprep.subr.bf16.mxu1 %v5291_v59  ;;  %v5301_v40 = vld [vmem:[#allocation116_spill] sm:$0xff]  ;;  %v5302_v59 = vld [vmem:[#allocation117_spill] sm:$0xff] }
 0x34e   :  { %1458 = vmatpush1.bf16.msra.mxu0 %v5292_v25  ;;  %1499 = vmatpush1.bf16.msra.mxu1 %v5293_v55  ;;  %v5303_v25 = vld [vmem:[#allocation118_spill] sm:$0xff]  ;;  %v5304_v55 = vld [vmem:[#allocation119_spill] sm:$0xff] }
 0x34f   :  { %1459 = vmatprep.subr.bf16.mxu0 %v5294_v39  ;;  %1500 = vmatprep.subr.bf16.mxu1 %v5295_v34 }
 0x352   :  { %1460 = vmatpush1.bf16.msra.mxu0 %v5296_v23  ;;  %1501 = vmatpush1.bf16.msra.mxu1 %v5297_v48  ;;  %v5305_v48 = vld [vmem:[#allocation123_spill] sm:$0xff] }
 0x353   :  { %1461 = vmatprep.subr.bf16.mxu0 %v5298_v41  ;;  %1502 = vmatprep.subr.bf16.mxu1 %v5299_v0  ;;  %v5306_v41 = vld [vmem:[#allocation124_spill] sm:$0xff] }
 0x356   :  { %1462 = vmatpush1.bf16.msra.mxu0 %v5300_v58  ;;  %1503 = vmatpush1.bf16.msra.mxu1 %v5301_v40 }
 0x357   :  { %1463 = vmatprep.subr.bf16.mxu0 %v5302_v59  ;;  %1504 = vmatprep.subr.bf16.mxu1 %v5303_v25 }
 0x35a   :  { %1464 = vmatpush1.bf16.msra.mxu0 %v5304_v55  ;;  %1505 = vmatpush1.bf16.msra.mxu1 %v5215_v12 }
 0x35b   :  { %1465 = vmatprep.subr.bf16.mxu0 %v5216_v1  ;;  %1506 = vmatprep.subr.bf16.mxu1 %v5217_v30 }
 0x35e   :  { %1466 = vmatpush1.bf16.msra.mxu0 %v5305_v48  ;;  %1507 = vmatpush1.bf16.msra.mxu1 %v5306_v41 }
 0x35f   :  { %1467 = vmatprep.subr.bf16.mxu0 %v5220_v28  ;;  %1508 = vmatprep.subr.bf16.mxu1 %v5221_v9 }
 0x362   :  { %1468 = vmatpush1.bf16.msra.mxu0 %v5222_v27  ;;  %1509 = vmatpush1.bf16.msra.mxu1 %v5223_v29 }
 0x363   :  { %1469 = vmatprep.subr.bf16.mxu0 %v5224_v19  ;;  %1510 = vmatprep.subr.bf16.mxu1 %v5225_v45  ;;  %v5374_v19 = vld [vmem:[#allocation82_spill] sm:$0xff] }
 0x366   :  { %1470 = vmatpush1.bf16.msra.mxu0 %v3568_v35  ;;  %1511 = vmatpush1.bf16.msra.mxu1 %v3570_v36 }
 0x367   :  { %1471 = vmatprep.subr.bf16.mxu0 %v3574_v20  ;;  %1512 = vmatprep.subr.bf16.mxu1 %v5226_v60 }
 0x36a   :  { %1472 = vmatpush1.bf16.msra.mxu0 %v5227_v63  ;;  %1513 = vmatpush1.bf16.msra.mxu1 %v3582_v52 }
 0x36b   :  { %1473 = vmatprep.subr.bf16.mxu0 %v3586_v61  ;;  %1514 = vmatprep.subr.bf16.mxu1 %v3588_v53 }
 0x36e   :  { %1474 = vmatpush1.bf16.msra.mxu0 %v3592_v44  ;;  %1515 = vmatpush1.bf16.msra.mxu1 %v3594_v51  ;;  %v5307_v51 = vld [vmem:[#allocation9_spill] sm:$0xff]  ;;  %v5314_v44 = vld [vmem:[#allocation16_spill] sm:$0xff] }
 0x36f   :  { %1475 = vmatprep.subr.bf16.mxu0 %v3598_v43  ;;  %1516 = vmatprep.subr.bf16.mxu1 %v3600_v7  ;;  %v5308_v43 = vld [vmem:[#allocation10_spill] sm:$0xff]  ;;  %v5309_v7 = vld [vmem:[#allocation11_spill] sm:$0xff] }
 0x372   :  { %1476 = vmatpush1.bf16.msra.mxu0 %v3604_v38  ;;  %1517 = vmatpush1.bf16.msra.mxu1 %v3606_v37  ;;  %v5310_v38 = vld [vmem:[#allocation12_spill] sm:$0xff]  ;;  %v5311_v37 = vld [vmem:[#allocation13_spill] sm:$0xff] }
 0x373   :  { %1588 = vmatprep.subr.bf16.mxu0 %v3149_v5  ;;  %1629 = vmatprep.subr.bf16.mxu1 %v3153_v10  ;;  %v5312_v5 = vld [vmem:[#allocation14_spill] sm:$0xff]  ;;  %v5313_v10 = vld [vmem:[#allocation15_spill] sm:$0xff] }
 0x375   :  { %1478 = vmatmul.mubr.bf16.vlgmr.msra.gmra.mrb[20].mxu0 %v3880_v42  ;;  %1519 = vmatmul.mubr.bf16.vlgmr.msra.gmra.mrb[20].mxu1 %v3880_v42  ;;  %v5315_v42 = vld [vmem:[#allocation17_spill] sm:$0xff] }
 0x376   :  { %1589 = vmatpush1.bf16.msra.mxu0 %v3151_v8  ;;  %1630 = vmatpush1.bf16.msra.mxu1 %v3155_v11  ;;  %v5316_v8 = vld [vmem:[#allocation18_spill] sm:$0xff]  ;;  %v5317_v11 = vld [vmem:[#allocation19_spill] sm:$0xff] }
 0x377   :  { %1590 = vmatprep.subr.bf16.mxu0 %v5307_v51  ;;  %1631 = vmatprep.subr.bf16.mxu1 %v5308_v43  ;;  %v5318_v51 = vld [vmem:[#allocation20_spill] sm:$0xff]  ;;  %v5319_v43 = vld [vmem:[#allocation21_spill] sm:$0xff] }
 0x37a   :  { %1591 = vmatpush1.bf16.msra.mxu0 %v5309_v7  ;;  %1632 = vmatpush1.bf16.msra.mxu1 %v5310_v38  ;;  %v5320_v7 = vld [vmem:[#allocation22_spill] sm:$0xff]  ;;  %v5321_v38 = vld [vmem:[#allocation23_spill] sm:$0xff] }
 0x37b   :  { %1592 = vmatprep.subr.bf16.mxu0 %v5311_v37  ;;  %1633 = vmatprep.subr.bf16.mxu1 %v5312_v5  ;;  %v5322_v37 = vld [vmem:[#allocation24_spill] sm:$0xff]  ;;  %v5323_v5 = vld [vmem:[#allocation25_spill] sm:$0xff] }
 0x37e   :  { %1593 = vmatpush1.bf16.msra.mxu0 %v5313_v10  ;;  %1634 = vmatpush1.bf16.msra.mxu1 %v5314_v44  ;;  %v5324_v10 = vld [vmem:[#allocation26_spill] sm:$0xff]  ;;  %v5325_v44 = vld [vmem:[#allocation27_spill] sm:$0xff] }
 0x37f   :  { %1594 = vmatprep.subr.bf16.mxu0 %v5315_v42  ;;  %1635 = vmatprep.subr.bf16.mxu1 %v5316_v8  ;;  %v5326_v42 = vld [vmem:[#allocation28_spill] sm:$0xff]  ;;  %v5327_v8 = vld [vmem:[#allocation29_spill] sm:$0xff] }
 0x382   :  { %1595 = vmatpush1.bf16.msra.mxu0 %v5317_v11  ;;  %1636 = vmatpush1.bf16.msra.mxu1 %v5318_v51  ;;  %v5328_v11 = vld [vmem:[#allocation30_spill] sm:$0xff]  ;;  %v5329_v51 = vld [vmem:[#allocation31_spill] sm:$0xff] }
 0x383   :  { %1596 = vmatprep.subr.bf16.mxu0 %v5319_v43  ;;  %1637 = vmatprep.subr.bf16.mxu1 %v5320_v7  ;;  %v5330_v43 = vld [vmem:[#allocation32_spill] sm:$0xff]  ;;  %v5331_v7 = vld [vmem:[#allocation33_spill] sm:$0xff] }
 0x386   :  { %1597 = vmatpush1.bf16.msra.mxu0 %v5321_v38  ;;  %1638 = vmatpush1.bf16.msra.mxu1 %v5322_v37  ;;  %v5332_v38 = vld [vmem:[#allocation34_spill] sm:$0xff]  ;;  %v5333_v37 = vld [vmem:[#allocation35_spill] sm:$0xff] }
 0x387   :  { %1598 = vmatprep.subr.bf16.mxu0 %v5323_v5  ;;  %1639 = vmatprep.subr.bf16.mxu1 %v5324_v10  ;;  %v5334_v5 = vld [vmem:[#allocation36_spill] sm:$0xff]  ;;  %v5335_v10 = vld [vmem:[#allocation37_spill] sm:$0xff] }
 0x38a   :  { %1599 = vmatpush1.bf16.msra.mxu0 %v5325_v44  ;;  %1640 = vmatpush1.bf16.msra.mxu1 %v5326_v42  ;;  %v5336_v44 = vld [vmem:[#allocation38_spill] sm:$0xff]  ;;  %v5337_v42 = vld [vmem:[#allocation39_spill] sm:$0xff] }
 0x38b   :  { %1600 = vmatprep.subr.bf16.mxu0 %v5327_v8  ;;  %1641 = vmatprep.subr.bf16.mxu1 %v5328_v11  ;;  %v5338_v8 = vld [vmem:[#allocation40_spill] sm:$0xff]  ;;  %v5339_v11 = vld [vmem:[#allocation41_spill] sm:$0xff] }
 0x38e   :  { %1601 = vmatpush1.bf16.msra.mxu0 %v5329_v51  ;;  %1642 = vmatpush1.bf16.msra.mxu1 %v5330_v43  ;;  %v5340_v51 = vld [vmem:[#allocation42_spill] sm:$0xff]  ;;  %v5341_v43 = vld [vmem:[#allocation43_spill] sm:$0xff] }
 0x38f   :  { %1602 = vmatprep.subr.bf16.mxu0 %v5331_v7  ;;  %1643 = vmatprep.subr.bf16.mxu1 %v5332_v38  ;;  %v5342_v7 = vld [vmem:[#allocation44_spill] sm:$0xff]  ;;  %v5343_v38 = vld [vmem:[#allocation45_spill] sm:$0xff] }
 0x392   :  { %1603 = vmatpush1.bf16.msra.mxu0 %v5333_v37  ;;  %1644 = vmatpush1.bf16.msra.mxu1 %v5334_v5  ;;  %v5344_v37 = vld [vmem:[#allocation46_spill] sm:$0xff]  ;;  %v5345_v5 = vld [vmem:[#allocation48_spill] sm:$0xff] }
 0x393   :  { %1604 = vmatprep.subr.bf16.mxu0 %v5335_v10  ;;  %1645 = vmatprep.subr.bf16.mxu1 %v5336_v44  ;;  %v5346_v10 = vld [vmem:[#allocation49_spill] sm:$0xff]  ;;  %v5347_v44 = vld [vmem:[#allocation50_spill] sm:$0xff] }
 0x396   :  { %1605 = vmatpush1.bf16.msra.mxu0 %v5337_v42  ;;  %1646 = vmatpush1.bf16.msra.mxu1 %v5338_v8  ;;  %v5348_v42 = vld [vmem:[#allocation51_spill] sm:$0xff]  ;;  %v5349_v8 = vld [vmem:[#allocation52_spill] sm:$0xff] }
 0x397   :  { %1606 = vmatprep.subr.bf16.mxu0 %v5339_v11  ;;  %1647 = vmatprep.subr.bf16.mxu1 %v5340_v51  ;;  %v5350_v11 = vld [vmem:[#allocation53_spill] sm:$0xff]  ;;  %v5351_v51 = vld [vmem:[#allocation54_spill] sm:$0xff] }
 0x39a   :  { %1607 = vmatpush1.bf16.msra.mxu0 %v5341_v43  ;;  %1648 = vmatpush1.bf16.msra.mxu1 %v5342_v7  ;;  %v5352_v43 = vld [vmem:[#allocation55_spill] sm:$0xff]  ;;  %v5353_v7 = vld [vmem:[#allocation56_spill] sm:$0xff] }
 0x39b   :  { %1608 = vmatprep.subr.bf16.mxu0 %v5343_v38  ;;  %1649 = vmatprep.subr.bf16.mxu1 %v5344_v37  ;;  %v5354_v38 = vld [vmem:[#allocation57_spill] sm:$0xff]  ;;  %v5355_v37 = vld [vmem:[#allocation58_spill] sm:$0xff] }
 0x39e   :  { %1609 = vmatpush1.bf16.msra.mxu0 %v5345_v5  ;;  %1650 = vmatpush1.bf16.msra.mxu1 %v5346_v10  ;;  %v5356_v5 = vld [vmem:[#allocation59_spill] sm:$0xff]  ;;  %v5357_v10 = vld [vmem:[#allocation60_spill] sm:$0xff] }
 0x39f   :  { %1610 = vmatprep.subr.bf16.mxu0 %v5347_v44  ;;  %1651 = vmatprep.subr.bf16.mxu1 %v5348_v42  ;;  %v5358_v44 = vld [vmem:[#allocation61_spill] sm:$0xff]  ;;  %v5359_v42 = vld [vmem:[#allocation62_spill] sm:$0xff] }
 0x3a2   :  { %1611 = vmatpush1.bf16.msra.mxu0 %v5349_v8  ;;  %1652 = vmatpush1.bf16.msra.mxu1 %v5350_v11  ;;  %v5360_v8 = vld [vmem:[#allocation63_spill] sm:$0xff]  ;;  %v5361_v11 = vld [vmem:[#allocation64_spill] sm:$0xff] }
 0x3a3   :  { %1612 = vmatprep.subr.bf16.mxu0 %v5351_v51  ;;  %1653 = vmatprep.subr.bf16.mxu1 %v5352_v43  ;;  %v5362_v51 = vld [vmem:[#allocation65_spill] sm:$0xff]  ;;  %v5363_v43 = vld [vmem:[#allocation66_spill] sm:$0xff] }
 0x3a6   :  { %1613 = vmatpush1.bf16.msra.mxu0 %v5353_v7  ;;  %1654 = vmatpush1.bf16.msra.mxu1 %v5354_v38  ;;  %v5364_v7 = vld [vmem:[#allocation67_spill] sm:$0xff]  ;;  %v5365_v38 = vld [vmem:[#allocation68_spill] sm:$0xff] }
 0x3a7   :  { %1614 = vmatprep.subr.bf16.mxu0 %v5355_v37  ;;  %1655 = vmatprep.subr.bf16.mxu1 %v5356_v5  ;;  %v5366_v37 = vld [vmem:[#allocation69_spill] sm:$0xff]  ;;  %v5367_v5 = vld [vmem:[#allocation70_spill] sm:$0xff] }
 0x3aa   :  { %1615 = vmatpush1.bf16.msra.mxu0 %v5357_v10  ;;  %1656 = vmatpush1.bf16.msra.mxu1 %v5358_v44  ;;  %v5368_v10 = vld [vmem:[#allocation71_spill] sm:$0xff]  ;;  %v1554_v44 = vpop.permute.xlu1 %1553 }
 0x3ab   :  { %1616 = vmatprep.subr.bf16.mxu0 %v5359_v42  ;;  %1657 = vmatprep.subr.bf16.mxu1 %v5360_v8  ;;  %v5369_v42 = vld [vmem:[#allocation75_spill] sm:$0xff]  ;;  %v5370_v8 = vld [vmem:[#allocation76_spill] sm:$0xff] }
 0x3ac   :  { %v1556_v53 = vmul.f32 %v1554_v44, %v5369_v42  ;;  %v1557_v61 = vmul.f32 %v1554_v44, %v5370_v8 }
 0x3ae   :  { %1617 = vmatpush1.bf16.msra.mxu0 %v5361_v11  ;;  %1658 = vmatpush1.bf16.msra.mxu1 %v5362_v51  ;;  %v5371_v11 = vld [vmem:[#allocation79_spill] sm:$0xff]  ;;  %v5372_v51 = vld [vmem:[#allocation78_spill] sm:$0xff] }
 0x3af   :  { %1618 = vmatprep.subr.bf16.mxu0 %v5363_v43  ;;  %1659 = vmatprep.subr.bf16.mxu1 %v5364_v7  ;;  %v1560_v52 = vadd.f32 %v1556_v53, %v5371_v11  ;;  %v1558_v63 = vmul.f32 %v1554_v44, %v5372_v51  ;;  %v5373_v7 = vld [vmem:[#allocation80_spill] sm:$0xff] }
 0x3b0   :  { %v1561_v20 = vadd.f32 %v1557_v61, %v5373_v7 }
 0x3b1   :  { %v1562_v29 = vadd.f32 %v1558_v63, %v5374_v19 }
 0x3b2   :  { %1619 = vmatpush1.bf16.msra.mxu0 %v5365_v38  ;;  %1660 = vmatpush1.bf16.msra.mxu1 %v5366_v37 }
 0x3b3   :  { %1670 = vmatprep.subr.bf16.mxu0 %v5367_v5  ;;  %1711 = vmatprep.subr.bf16.mxu1 %v5368_v10 }
 0x408   :  { %v1397_v43 = vpop.f32.mrb[16].mxu0  ;;  %v1438_v60 = vpop.f32.mrb[16].mxu1 }
 0x409   :  { %v1564_v38 = vadd.f32 %v1560_v52, %v1397_v43  ;;  %v1399_v36 = vpop.f32.mrb[17].mxu0  ;;  %v1440_v37 = vpop.f32.mrb[17].mxu1  ;;  %v1566_v53 = vadd.f32 %v1562_v29, %v1438_v60 }
 0x40a   :  { %v1565_v35 = vadd.f32 %v1561_v20, %v1399_v36  ;;  %v1401_v5 = vpop.f32.mrb[18].mxu0  ;;  %v1442_v45 = vpop.f32.mrb[18].mxu1 }
 0x40b   :  { %v1568_v10 = vmul.f32 0.5, %v1564_v38  ;;  %v1402_v42 = vpop.f32.mrb[19].mxu0  ;;  %v1443_v27 = vpop.f32.mrb[19].mxu1 }
 0x40c   :  { %v1572_v8 = vmul.f32 0.5, %v1565_v35 }
 0x40d   :  { %2950 = vtanh.f32 %v1568_v10 }
 0x40e   :  { %2952 = vtanh.f32 %v1572_v8  ;;  %v1559_v8 = vmul.f32 %v1554_v44, %v5175_v6 }
 0x40f   :  { %2954 = vtanh.f32 %v1566_v53 }
 0x417   :  { %v2951_v51 = vpop.eup %2950 }
 0x418   :  { %v2953_v11 = vpop.eup %2952  ;;  %v1570_v9 = vmul.f32 0.5, %v2951_v51 }
 0x419   :  { %v1574_v61 = vmul.f32 0.5, %v2953_v11  ;;  %v2955_v43 = vpop.eup %2954 }
 0x41a   :  { %v1571_v52 = vadd.f32 0.5, %v1570_v9 }
 0x41b   :  { %v1575_v7 = vadd.f32 0.5, %v1574_v61 }
 0x41c   :  { %v1582_v36 = vmul.f32 %v2955_v43, %v1571_v52 }
 0x41d   :  { %v1581_v5 = vmul.f32 %v1575_v7, %v3867_v32  ;;  %v1563_v32 = vadd.f32 %v1559_v8, %v5178_v21 }
 0x41f   :  { %v4021_v20 = vadd.f32 %v1582_v36, %v1581_v5  ;;  %v1567_v53 = vadd.f32 %v1563_v32, %v1440_v37 }
 0x421   :  { %v1577_v52 = vmul.f32 0.5, %v1567_v53 }
 0x448   :  { %v1479_v38 = vpop.f32.mrb[20].mxu0  ;;  %v1520_v63 = vpop.f32.mrb[20].mxu1 }
 0x449   :  { %v1527_v35 = vadd.f32 %v1479_v38, %v5274_v16  ;;  %v1481_v10 = vpop.f32.mrb[21].mxu0  ;;  %v1522_v60 = vpop.f32.mrb[21].mxu1  ;;  %v1529_v7 = vadd.f32 %v1520_v63, %v3712_v3 }
 0x44a   :  { %v1528_v27 = vadd.f32 %v1481_v10, %v3708_v54  ;;  %v1483_v51 = vpop.f32.mrb[22].mxu0  ;;  %v1524_v11 = vpop.f32.mrb[22].mxu1  ;;  %v1530_v61 = vadd.f32 %v1522_v60, %v3718_v4 }
 0x44b   :  { %v1531_v9 = vmul.f32 0.5, %v1527_v35  ;;  %v1484_v29 = vpop.f32.mrb[23].mxu0  ;;  %v1525_v45 = vpop.f32.mrb[23].mxu1 }
 0x44c   :  { %v1535_v42 = vmul.f32 0.5, %v1528_v27  ;;  %v1540_v44 = vmul.f32 0.5, %v1530_v61 }
 0x44d   :  { %2956 = vtanh.f32 %v1531_v9 }
 0x44e   :  { %2958 = vtanh.f32 %v1535_v42 }
 0x44f   :  { %2960 = vtanh.f32 %v1529_v7 }
 0x450   :  { %2962 = vtanh.f32 %v1577_v52 }
 0x451   :  { %2964 = vtanh.f32 %v1540_v44  ;;  %v5376_v44 = vld [vmem:[#allocation101_spill] sm:$0xff] }
 0x452   :  { %2966 = vtanh.f32 %v4021_v20 }
 0x457   :  { %v2957_v43 = vpop.eup %2956 }
 0x458   :  { %v2959_v36 = vpop.eup %2958  ;;  %v1533_v5 = vmul.f32 0.5, %v2957_v43  ;;  %v5377_v43 = vld [vmem:[#allocation102_spill] sm:$0xff] }
 0x459   :  { %v1537_v38 = vmul.f32 0.5, %v2959_v36  ;;  %v2961_v10 = vpop.eup %2960  ;;  %v5378_v36 = vld [vmem:[#allocation103_spill] sm:$0xff] }
 0x45a   :  { %v1534_v35 = vadd.f32 0.5, %v1533_v5  ;;  %v2963_v60 = vpop.eup %2962  ;;  %v5379_v5 = vld [vmem:[#allocation104_spill] sm:$0xff] }
 0x45b   :  { %v1538_v27 = vadd.f32 0.5, %v1537_v38  ;;  %v2965_v8 = vpop.eup %2964  ;;  %v1579_v11 = vmul.f32 0.5, %v2963_v60  ;;  %v5380_v38 = vld [vmem:[#allocation105_spill] sm:$0xff]  ;;  %v5386_v60 = vld [vmem:[#allocation126_spill] sm:$0xff] }
 0x45c   :  { %v1545_v51 = vmul.f32 %v2961_v10, %v1534_v35  ;;  %v1542_v9 = vmul.f32 0.5, %v2965_v8  ;;  %v2967_v29 = vpop.eup %2966  ;;  %v5381_v35 = vld [vmem:[#allocation106_spill] sm:$0xff]  ;;  %v5382_v10 = vld [vmem:[#allocation107_spill] sm:$0xff] }
 0x45d   :  { %v1544_v63 = vmul.f32 %v1538_v27, %v3877_v49  ;;  %v1580_v45 = vadd.f32 0.5, %v1579_v11  ;;  %v5375_v49 = vld [vmem:[#allocation100_spill] sm:$0xff]  ;;  %v5387_v8 = vld [vmem:[#allocation127_spill] sm:$0xff] }
 0x45e   :  { %v1543_v42 = vadd.f32 0.5, %v1542_v9  ;;  %v5383_v27 = vld [vmem:[#allocation108_spill] sm:$0xff]  ;;  %v5389_v9 = vld [vmem:[#allocation129_spill] sm:$0xff] }
 0x45f   :  { %v4031_v37 = vadd.f32 %v1545_v51, %v1544_v63  ;;  %v1585_v32 = vmul.f32 %v2967_v29, %v1580_v45  ;;  %v5384_v51 = vld [vmem:[#allocation112_spill] sm:$0xff]  ;;  %v5385_v63 = vld [vmem:[#allocation113_spill] sm:$0xff]  ;;  %v5390_v29 = vld [vmem:[#allocation130_spill] sm:$0xff] }
 0x460   :  { %v5388_v11 = vld [vmem:[#allocation128_spill] sm:$0xff]  ;;  %v5391_v45 = vld [vmem:[#allocation131_spill] sm:$0xff] }
 0x461   :  { %2968 = vtanh.f32 %v4031_v37  ;;  %v4034_v52 = vpack.c.bf16 %v1585_v32, %v1585_v32  ;;  %v5394_v32 = vld [vmem:[#allocation134_spill] sm:$0xff] }
 0x46b   :  { %v2969_v7 = vpop.eup %2968 }
 0x46c   :  { %v1548_v53 = vmul.f32 %v2969_v7, %v1543_v42  ;;  %v5392_v42 = vld [vmem:[#allocation132_spill] sm:$0xff]  ;;  %v5393_v7 = vld [vmem:[#allocation133_spill] sm:$0xff] }
 0x46e   :  { %v1587_v61 = vpack.c.bf16 %v1548_v53, %v1548_v53  ;;  %v5395_v53 = vld [vmem:[#allocation135_spill] sm:$0xff] }
 0x470   :  { %1620 = vmatprep.mubr.bf16.mxu0 %v1587_v61  ;;  %1661 = vmatprep.mubr.bf16.mxu1 %v1587_v61 }
 0x471   :  { %1621 = vmatmul.mubr.bf16.vlgmr.msra.gmra.mrb[24].mxu0 %v4034_v52  ;;  %1662 = vmatmul.mubr.bf16.vlgmr.msra.gmra.mrb[24].mxu1 %v4034_v52 }
 0x472   :  { %1671 = vmatpush1.bf16.msra.mxu0 %v3289_v62  ;;  %1712 = vmatpush1.bf16.msra.mxu1 %v5179_v17 }
 0x473   :  { %1702 = vmatprep.mubr.bf16.mxu0 %v1587_v61  ;;  %1743 = vmatprep.mubr.bf16.mxu1 %v1587_v61  ;;  %v5396_v61 = vld [vmem:[#allocation136_spill] sm:$0xff] }
 0x474   :  { %1672 = vmatprep.subr.bf16.mxu0 %v5180_v2  ;;  %1713 = vmatprep.subr.bf16.mxu1 %v5181_v46 }
 0x476   :  { %1673 = vmatpush1.bf16.msra.mxu0 %v5182_v13  ;;  %1714 = vmatpush1.bf16.msra.mxu1 %v5183_v18 }
 0x477   :  { %1674 = vmatprep.subr.bf16.mxu0 %v5184_v26  ;;  %1715 = vmatprep.subr.bf16.mxu1 %v5275_v14 }
 0x47a   :  { %1675 = vmatpush1.bf16.msra.mxu0 %v5276_v33  ;;  %1716 = vmatpush1.bf16.msra.mxu1 %v5277_v24 }
 0x47b   :  { %1676 = vmatprep.subr.bf16.mxu0 %v5278_v15  ;;  %1717 = vmatprep.subr.bf16.mxu1 %v5279_v31 }
 0x47e   :  { %1677 = vmatpush1.bf16.msra.mxu0 %v5280_v47  ;;  %1718 = vmatpush1.bf16.msra.mxu1 %v5281_v56 }
 0x47f   :  { %1678 = vmatprep.subr.bf16.mxu0 %v5282_v22  ;;  %1719 = vmatprep.subr.bf16.mxu1 %v5283_v50 }
 0x482   :  { %1679 = vmatpush1.bf16.msra.mxu0 %v5284_v57  ;;  %1720 = vmatpush1.bf16.msra.mxu1 %v5375_v49 }
 0x483   :  { %1680 = vmatprep.subr.bf16.mxu0 %v5376_v44  ;;  %1721 = vmatprep.subr.bf16.mxu1 %v5377_v43 }
 0x486   :  { %1681 = vmatpush1.bf16.msra.mxu0 %v5378_v36  ;;  %1722 = vmatpush1.bf16.msra.mxu1 %v5379_v5 }
 0x487   :  { %1682 = vmatprep.subr.bf16.mxu0 %v5380_v38  ;;  %1723 = vmatprep.subr.bf16.mxu1 %v5381_v35 }
 0x48a   :  { %1683 = vmatpush1.bf16.msra.mxu0 %v5382_v10  ;;  %1724 = vmatpush1.bf16.msra.mxu1 %v5383_v27 }
 0x48b   :  { %1684 = vmatprep.subr.bf16.mxu0 %v5294_v39  ;;  %1725 = vmatprep.subr.bf16.mxu1 %v5295_v34 }
 0x48e   :  { %1685 = vmatpush1.bf16.msra.mxu0 %v5296_v23  ;;  %1726 = vmatpush1.bf16.msra.mxu1 %v5384_v51 }
 0x48f   :  { %1686 = vmatprep.subr.bf16.mxu0 %v5385_v63  ;;  %1727 = vmatprep.subr.bf16.mxu1 %v5299_v0 }
 0x492   :  { %1687 = vmatpush1.bf16.msra.mxu0 %v5300_v58  ;;  %1728 = vmatpush1.bf16.msra.mxu1 %v5301_v40 }
 0x493   :  { %1688 = vmatprep.subr.bf16.mxu0 %v5302_v59  ;;  %1729 = vmatprep.subr.bf16.mxu1 %v5303_v25 }
 0x496   :  { %1689 = vmatpush1.bf16.msra.mxu0 %v5304_v55  ;;  %1730 = vmatpush1.bf16.msra.mxu1 %v5215_v12 }
 0x497   :  { %1690 = vmatprep.subr.bf16.mxu0 %v5216_v1  ;;  %1731 = vmatprep.subr.bf16.mxu1 %v5217_v30 }
 0x49a   :  { %1691 = vmatpush1.bf16.msra.mxu0 %v5305_v48  ;;  %1732 = vmatpush1.bf16.msra.mxu1 %v5306_v41 }
 0x49b   :  { %1692 = vmatprep.subr.bf16.mxu0 %v5220_v28  ;;  %1733 = vmatprep.subr.bf16.mxu1 %v5386_v60  ;;  %v5397_v60 = vld [vmem:[#allocation137_spill] sm:$0xff] }
 0x49e   :  { %1693 = vmatpush1.bf16.msra.mxu0 %v5387_v8  ;;  %1734 = vmatpush1.bf16.msra.mxu1 %v5388_v11  ;;  %v5398_v8 = vld [vmem:[#allocation138_spill] sm:$0xff]  ;;  %v5399_v11 = vld [vmem:[#allocation139_spill] sm:$0xff] }
 0x49f   :  { %1694 = vmatprep.subr.bf16.mxu0 %v5389_v9  ;;  %1735 = vmatprep.subr.bf16.mxu1 %v5390_v29  ;;  %v5400_v9 = vld [vmem:[#allocation140_spill] sm:$0xff]  ;;  %v5401_v29 = vld [vmem:[#allocation141_spill] sm:$0xff] }
 0x4a2   :  { %1695 = vmatpush1.bf16.msra.mxu0 %v5391_v45  ;;  %1736 = vmatpush1.bf16.msra.mxu1 %v5392_v42  ;;  %v5402_v45 = vld [vmem:[#allocation142_spill] sm:$0xff]  ;;  %v5403_v42 = vld [vmem:[#allocation143_spill] sm:$0xff] }
 0x4a3   :  { %1696 = vmatprep.subr.bf16.mxu0 %v5393_v7  ;;  %1737 = vmatprep.subr.bf16.mxu1 %v5394_v32  ;;  %v5404_v7 = vld [vmem:[#allocation144_spill] sm:$0xff]  ;;  %v5405_v32 = vld [vmem:[#allocation5_spill] sm:$0xff] }
 0x4a6   :  { %1697 = vmatpush1.bf16.msra.mxu0 %v5395_v53  ;;  %1738 = vmatpush1.bf16.msra.mxu1 %v5396_v61  ;;  %v5406_v53 = vld [vmem:[#allocation7_spill] sm:$0xff] }
 0x4a7   :  { %1698 = vmatprep.subr.bf16.mxu0 %v5397_v60  ;;  %1739 = vmatprep.subr.bf16.mxu1 %v5398_v8  ;;  %v5407_v8 = vld [vmem:[#allocation6_spill] sm:$0xff]  ;;  %v5416_v60 = vld [vmem:[#allocation16_spill] sm:$0xff] }
 0x4aa   :  { %1699 = vmatpush1.bf16.msra.mxu0 %v5399_v11  ;;  %1740 = vmatpush1.bf16.msra.mxu1 %v5400_v9  ;;  %v5408_v11 = vld [vmem:[#allocation8_spill] sm:$0xff]  ;;  %v5409_v9 = vld [vmem:[#allocation9_spill] sm:$0xff] }
 0x4ab   :  { %1700 = vmatprep.subr.bf16.mxu0 %v5401_v29  ;;  %1741 = vmatprep.subr.bf16.mxu1 %v5402_v45  ;;  %v5410_v29 = vld [vmem:[#allocation10_spill] sm:$0xff]  ;;  %v5411_v45 = vld [vmem:[#allocation11_spill] sm:$0xff] }
 0x4ae   :  { %1701 = vmatpush1.bf16.msra.mxu0 %v5403_v42  ;;  %1742 = vmatpush1.bf16.msra.mxu1 %v5404_v7  ;;  %v5412_v42 = vld [vmem:[#allocation12_spill] sm:$0xff]  ;;  %v5413_v7 = vld [vmem:[#allocation13_spill] sm:$0xff] }
 0x4af   :  { %1813 = vmatprep.subr.bf16.mxu0 %v5405_v32  ;;  %1854 = vmatprep.subr.bf16.mxu1 %v5406_v53  ;;  %v5414_v32 = vld [vmem:[#allocation14_spill] sm:$0xff]  ;;  %v5415_v53 = vld [vmem:[#allocation15_spill] sm:$0xff] }
 0x4b1   :  { %1703 = vmatmul.mubr.bf16.vlgmr.msra.gmra.mrb[28].mxu0 %v4034_v52  ;;  %1744 = vmatmul.mubr.bf16.vlgmr.msra.gmra.mrb[28].mxu1 %v4034_v52  ;;  %v5417_v52 = vld [vmem:[#allocation17_spill] sm:$0xff] }
 0x4b2   :  { %1814 = vmatpush1.bf16.msra.mxu0 %v5407_v8  ;;  %1855 = vmatpush1.bf16.msra.mxu1 %v5408_v11  ;;  %v5418_v8 = vld [vmem:[#allocation18_spill] sm:$0xff]  ;;  %v5419_v11 = vld [vmem:[#allocation19_spill] sm:$0xff] }
 0x4b3   :  { %1815 = vmatprep.subr.bf16.mxu0 %v5409_v9  ;;  %1856 = vmatprep.subr.bf16.mxu1 %v5410_v29  ;;  %v5420_v9 = vld [vmem:[#allocation20_spill] sm:$0xff]  ;;  %v5421_v29 = vld [vmem:[#allocation21_spill] sm:$0xff] }
 0x4b6   :  { %1816 = vmatpush1.bf16.msra.mxu0 %v5411_v45  ;;  %1857 = vmatpush1.bf16.msra.mxu1 %v5412_v42  ;;  %v5422_v45 = vld [vmem:[#allocation22_spill] sm:$0xff]  ;;  %v5423_v42 = vld [vmem:[#allocation23_spill] sm:$0xff] }
 0x4b7   :  { %1817 = vmatprep.subr.bf16.mxu0 %v5413_v7  ;;  %1858 = vmatprep.subr.bf16.mxu1 %v5414_v32  ;;  %v5424_v7 = vld [vmem:[#allocation24_spill] sm:$0xff]  ;;  %v5425_v32 = vld [vmem:[#allocation25_spill] sm:$0xff] }
 0x4ba   :  { %1818 = vmatpush1.bf16.msra.mxu0 %v5415_v53  ;;  %1859 = vmatpush1.bf16.msra.mxu1 %v5416_v60  ;;  %v5426_v53 = vld [vmem:[#allocation26_spill] sm:$0xff]  ;;  %v5427_v60 = vld [vmem:[#allocation27_spill] sm:$0xff] }
 0x4bb   :  { %1819 = vmatprep.subr.bf16.mxu0 %v5417_v52  ;;  %1860 = vmatprep.subr.bf16.mxu1 %v5418_v8  ;;  %v5428_v52 = vld [vmem:[#allocation28_spill] sm:$0xff]  ;;  %v5429_v8 = vld [vmem:[#allocation29_spill] sm:$0xff] }
 0x4be   :  { %1820 = vmatpush1.bf16.msra.mxu0 %v5419_v11  ;;  %1861 = vmatpush1.bf16.msra.mxu1 %v5420_v9  ;;  %v5430_v11 = vld [vmem:[#allocation30_spill] sm:$0xff]  ;;  %v5431_v9 = vld [vmem:[#allocation31_spill] sm:$0xff] }
 0x4bf   :  { %1821 = vmatprep.subr.bf16.mxu0 %v5421_v29  ;;  %1862 = vmatprep.subr.bf16.mxu1 %v5422_v45  ;;  %v5432_v29 = vld [vmem:[#allocation32_spill] sm:$0xff]  ;;  %v5433_v45 = vld [vmem:[#allocation33_spill] sm:$0xff] }
 0x4c2   :  { %1822 = vmatpush1.bf16.msra.mxu0 %v5423_v42  ;;  %1863 = vmatpush1.bf16.msra.mxu1 %v5424_v7  ;;  %v5434_v42 = vld [vmem:[#allocation34_spill] sm:$0xff]  ;;  %v5435_v7 = vld [vmem:[#allocation35_spill] sm:$0xff] }
 0x4c3   :  { %1823 = vmatprep.subr.bf16.mxu0 %v5425_v32  ;;  %1864 = vmatprep.subr.bf16.mxu1 %v5426_v53  ;;  %v5436_v32 = vld [vmem:[#allocation36_spill] sm:$0xff]  ;;  %v5437_v53 = vld [vmem:[#allocation37_spill] sm:$0xff] }
 0x4c6   :  { %1824 = vmatpush1.bf16.msra.mxu0 %v5427_v60  ;;  %1865 = vmatpush1.bf16.msra.mxu1 %v5428_v52  ;;  %v5438_v60 = vld [vmem:[#allocation38_spill] sm:$0xff]  ;;  %v5439_v52 = vld [vmem:[#allocation39_spill] sm:$0xff] }
 0x4c7   :  { %1825 = vmatprep.subr.bf16.mxu0 %v5429_v8  ;;  %1866 = vmatprep.subr.bf16.mxu1 %v5430_v11  ;;  %v5440_v8 = vld [vmem:[#allocation40_spill] sm:$0xff]  ;;  %v5441_v11 = vld [vmem:[#allocation41_spill] sm:$0xff] }
 0x4ca   :  { %1826 = vmatpush1.bf16.msra.mxu0 %v5431_v9  ;;  %1867 = vmatpush1.bf16.msra.mxu1 %v5432_v29  ;;  %v5442_v9 = vld [vmem:[#allocation42_spill] sm:$0xff]  ;;  %v5443_v29 = vld [vmem:[#allocation43_spill] sm:$0xff] }
 0x4cb   :  { %1827 = vmatprep.subr.bf16.mxu0 %v5433_v45  ;;  %1868 = vmatprep.subr.bf16.mxu1 %v5434_v42  ;;  %v5444_v45 = vld [vmem:[#allocation44_spill] sm:$0xff]  ;;  %v5445_v42 = vld [vmem:[#allocation45_spill] sm:$0xff] }
 0x4ce   :  { %1828 = vmatpush1.bf16.msra.mxu0 %v5435_v7  ;;  %1869 = vmatpush1.bf16.msra.mxu1 %v5436_v32  ;;  %v5446_v7 = vld [vmem:[#allocation46_spill] sm:$0xff]  ;;  %v5447_v32 = vld [vmem:[#allocation48_spill] sm:$0xff] }
 0x4cf   :  { %1829 = vmatprep.subr.bf16.mxu0 %v5437_v53  ;;  %1870 = vmatprep.subr.bf16.mxu1 %v5438_v60  ;;  %v5448_v53 = vld [vmem:[#allocation49_spill] sm:$0xff]  ;;  %v5449_v60 = vld [vmem:[#allocation50_spill] sm:$0xff] }
 0x4d2   :  { %1830 = vmatpush1.bf16.msra.mxu0 %v5439_v52  ;;  %1871 = vmatpush1.bf16.msra.mxu1 %v5440_v8  ;;  %v5450_v52 = vld [vmem:[#allocation51_spill] sm:$0xff]  ;;  %v5451_v8 = vld [vmem:[#allocation52_spill] sm:$0xff] }
 0x4d3   :  { %1831 = vmatprep.subr.bf16.mxu0 %v5441_v11  ;;  %1872 = vmatprep.subr.bf16.mxu1 %v5442_v9  ;;  %v5452_v11 = vld [vmem:[#allocation53_spill] sm:$0xff]  ;;  %v5453_v9 = vld [vmem:[#allocation54_spill] sm:$0xff] }
 0x4d6   :  { %1832 = vmatpush1.bf16.msra.mxu0 %v5443_v29  ;;  %1873 = vmatpush1.bf16.msra.mxu1 %v5444_v45  ;;  %v5454_v29 = vld [vmem:[#allocation55_spill] sm:$0xff]  ;;  %v5455_v45 = vld [vmem:[#allocation56_spill] sm:$0xff] }
 0x4d7   :  { %1833 = vmatprep.subr.bf16.mxu0 %v5445_v42  ;;  %1874 = vmatprep.subr.bf16.mxu1 %v5446_v7  ;;  %v5456_v42 = vld [vmem:[#allocation57_spill] sm:$0xff]  ;;  %v5457_v7 = vld [vmem:[#allocation58_spill] sm:$0xff] }
 0x4da   :  { %1834 = vmatpush1.bf16.msra.mxu0 %v5447_v32  ;;  %1875 = vmatpush1.bf16.msra.mxu1 %v5448_v53  ;;  %v5458_v32 = vld [vmem:[#allocation59_spill] sm:$0xff]  ;;  %v5459_v53 = vld [vmem:[#allocation60_spill] sm:$0xff] }
 0x4db   :  { %1835 = vmatprep.subr.bf16.mxu0 %v5449_v60  ;;  %1876 = vmatprep.subr.bf16.mxu1 %v5450_v52  ;;  %v5460_v60 = vld [vmem:[#allocation61_spill] sm:$0xff]  ;;  %v5461_v52 = vld [vmem:[#allocation62_spill] sm:$0xff] }
 0x4de   :  { %1836 = vmatpush1.bf16.msra.mxu0 %v5451_v8  ;;  %1877 = vmatpush1.bf16.msra.mxu1 %v5452_v11  ;;  %v5462_v8 = vld [vmem:[#allocation63_spill] sm:$0xff]  ;;  %v5463_v11 = vld [vmem:[#allocation64_spill] sm:$0xff] }
 0x4df   :  { %1837 = vmatprep.subr.bf16.mxu0 %v5453_v9  ;;  %1878 = vmatprep.subr.bf16.mxu1 %v5454_v29  ;;  %v5464_v9 = vld [vmem:[#allocation65_spill] sm:$0xff]  ;;  %v5465_v29 = vld [vmem:[#allocation66_spill] sm:$0xff] }
 0x4e2   :  { %1838 = vmatpush1.bf16.msra.mxu0 %v5455_v45  ;;  %1879 = vmatpush1.bf16.msra.mxu1 %v5456_v42  ;;  %v5466_v45 = vld [vmem:[#allocation67_spill] sm:$0xff]  ;;  %v5467_v42 = vld [vmem:[#allocation68_spill] sm:$0xff] }
 0x4e3   :  { %1839 = vmatprep.subr.bf16.mxu0 %v5457_v7  ;;  %1880 = vmatprep.subr.bf16.mxu1 %v5458_v32  ;;  %v5468_v7 = vld [vmem:[#allocation69_spill] sm:$0xff]  ;;  %v5469_v32 = vld [vmem:[#allocation70_spill] sm:$0xff] }
 0x4e6   :  { %1840 = vmatpush1.bf16.msra.mxu0 %v5459_v53  ;;  %1881 = vmatpush1.bf16.msra.mxu1 %v5460_v60  ;;  %v5470_v53 = vld [vmem:[#allocation71_spill] sm:$0xff]  ;;  %v1779_v60 = vpop.permute.xlu0 %1778 }
 0x4e7   :  { %1841 = vmatprep.subr.bf16.mxu0 %v5461_v52  ;;  %1882 = vmatprep.subr.bf16.mxu1 %v5462_v8  ;;  %v5471_v52 = vld [vmem:[#allocation75_spill] sm:$0xff]  ;;  %v5472_v8 = vld [vmem:[#allocation76_spill] sm:$0xff] }
 0x4e8   :  { %v1781_v61 = vmul.f32 %v1779_v60, %v5471_v52  ;;  %v1782_v28 = vmul.f32 %v1779_v60, %v5472_v8 }
 0x4ea   :  { %1842 = vmatpush1.bf16.msra.mxu0 %v5463_v11  ;;  %1883 = vmatpush1.bf16.msra.mxu1 %v5464_v9  ;;  %v5473_v11 = vld [vmem:[#allocation79_spill] sm:$0xff]  ;;  %v5474_v9 = vld [vmem:[#allocation78_spill] sm:$0xff] }
 0x4eb   :  { %1843 = vmatprep.subr.bf16.mxu0 %v5465_v29  ;;  %1884 = vmatprep.subr.bf16.mxu1 %v5466_v45  ;;  %v1785_v41 = vadd.f32 %v1781_v61, %v5473_v11  ;;  %v1783_v48 = vmul.f32 %v1779_v60, %v5474_v9  ;;  %v5475_v45 = vld [vmem:[#allocation80_spill] sm:$0xff] }
 0x4ec   :  { %v1786_v1 = vadd.f32 %v1782_v28, %v5475_v45 }
 0x4ed   :  { %v1787_v59 = vadd.f32 %v1783_v48, %v5374_v19 }
 0x4ee   :  { %1844 = vmatpush1.bf16.msra.mxu0 %v5467_v42  ;;  %1885 = vmatpush1.bf16.msra.mxu1 %v5468_v7 }
 0x4ef   :  { %1895 = vmatprep.subr.bf16.mxu0 %v5469_v32  ;;  %1936 = vmatprep.subr.bf16.mxu1 %v5470_v53 }
 0x544   :  { %v1622_v29 = vpop.f32.mrb[24].mxu0  ;;  %v1663_v30 = vpop.f32.mrb[24].mxu1 }
 0x545   :  { %v1789_v42 = vadd.f32 %v1785_v41, %v1622_v29  ;;  %v1624_v12 = vpop.f32.mrb[25].mxu0  ;;  %v1665_v7 = vpop.f32.mrb[25].mxu1  ;;  %v1791_v61 = vadd.f32 %v1787_v59, %v1663_v30  ;;  %v1784_v59 = vmul.f32 %v1779_v60, %v5175_v6 }
 0x546   :  { %v1790_v55 = vadd.f32 %v1786_v1, %v1624_v12  ;;  %v1626_v32 = vpop.f32.mrb[26].mxu0  ;;  %v1667_v25 = vpop.f32.mrb[26].mxu1 }
 0x547   :  { %v1793_v53 = vmul.f32 0.5, %v1789_v42  ;;  %v1627_v52 = vpop.f32.mrb[27].mxu0  ;;  %v1668_v40 = vpop.f32.mrb[27].mxu1 }
 0x548   :  { %v1797_v8 = vmul.f32 0.5, %v1790_v55 }
 0x549   :  { %2970 = vtanh.f32 %v1793_v53 }
 0x54a   :  { %2972 = vtanh.f32 %v1797_v8 }
 0x54b   :  { %2974 = vtanh.f32 %v1791_v61 }
 0x553   :  { %v2971_v9 = vpop.eup %2970 }
 0x554   :  { %v2973_v11 = vpop.eup %2972  ;;  %v1795_v58 = vmul.f32 0.5, %v2971_v9 }
 0x555   :  { %v1799_v28 = vmul.f32 0.5, %v2973_v11  ;;  %v2975_v29 = vpop.eup %2974 }
 0x556   :  { %v1796_v41 = vadd.f32 0.5, %v1795_v58 }
 0x557   :  { %v1800_v45 = vadd.f32 0.5, %v1799_v28 }
 0x558   :  { %v1807_v12 = vmul.f32 %v2975_v29, %v1796_v41 }
 0x559   :  { %v1806_v1 = vmul.f32 %v1800_v45, %v4021_v20  ;;  %v1788_v45 = vadd.f32 %v1784_v59, %v5178_v21 }
 0x55b   :  { %v4175_v25 = vadd.f32 %v1807_v12, %v1806_v1  ;;  %v1792_v61 = vadd.f32 %v1788_v45, %v1665_v7 }
 0x55d   :  { %v1802_v41 = vmul.f32 0.5, %v1792_v61 }
 0x584   :  { %v1704_v48 = vpop.f32.mrb[28].mxu0  ;;  %v1745_v42 = vpop.f32.mrb[28].mxu1 }
 0x585   :  { %v1752_v40 = vadd.f32 %v1704_v48, %v5274_v16  ;;  %v1706_v55 = vpop.f32.mrb[29].mxu0  ;;  %v1747_v30 = vpop.f32.mrb[29].mxu1  ;;  %v1754_v20 = vadd.f32 %v1745_v42, %v3712_v3 }
 0x586   :  { %v1753_v8 = vadd.f32 %v1706_v55, %v3708_v54  ;;  %v1708_v9 = vpop.f32.mrb[30].mxu0  ;;  %v1749_v11 = vpop.f32.mrb[30].mxu1  ;;  %v1755_v28 = vadd.f32 %v1747_v30, %v3718_v4 }
 0x587   :  { %v1756_v58 = vmul.f32 0.5, %v1752_v40  ;;  %v1709_v32 = vpop.f32.mrb[31].mxu0  ;;  %v1750_v53 = vpop.f32.mrb[31].mxu1 }
 0x588   :  { %v1760_v52 = vmul.f32 0.5, %v1753_v8  ;;  %v1765_v60 = vmul.f32 0.5, %v1755_v28 }
 0x589   :  { %2976 = vtanh.f32 %v1756_v58 }
 0x58a   :  { %2978 = vtanh.f32 %v1760_v52 }
 0x58b   :  { %2980 = vtanh.f32 %v1754_v20 }
 0x58c   :  { %2982 = vtanh.f32 %v1802_v41 }
 0x58d   :  { %2984 = vtanh.f32 %v1765_v60  ;;  %v5477_v60 = vld [vmem:[#allocation116_spill] sm:$0xff] }
 0x58e   :  { %2986 = vtanh.f32 %v4175_v25 }
 0x593   :  { %v2977_v29 = vpop.eup %2976 }
 0x594   :  { %v2979_v12 = vpop.eup %2978  ;;  %v1758_v1 = vmul.f32 0.5, %v2977_v29  ;;  %v5478_v29 = vld [vmem:[#allocation117_spill] sm:$0xff] }
 0x595   :  { %v1762_v48 = vmul.f32 0.5, %v2979_v12  ;;  %v2981_v55 = vpop.eup %2980  ;;  %v5479_v12 = vld [vmem:[#allocation118_spill] sm:$0xff] }
 0x596   :  { %v1759_v40 = vadd.f32 0.5, %v1758_v1  ;;  %v2983_v30 = vpop.eup %2982  ;;  %v5480_v1 = vld [vmem:[#allocation119_spill] sm:$0xff] }
 0x597   :  { %v1763_v8 = vadd.f32 0.5, %v1762_v48  ;;  %v2985_v59 = vpop.eup %2984  ;;  %v1804_v11 = vmul.f32 0.5, %v2983_v30  ;;  %v5481_v48 = vld [vmem:[#allocation120_spill] sm:$0xff]  ;;  %v5487_v30 = vld [vmem:[#allocation126_spill] sm:$0xff] }
 0x598   :  { %v1770_v9 = vmul.f32 %v2981_v55, %v1759_v40  ;;  %v1767_v58 = vmul.f32 0.5, %v2985_v59  ;;  %v2987_v32 = vpop.eup %2986  ;;  %v5482_v40 = vld [vmem:[#allocation121_spill] sm:$0xff]  ;;  %v5483_v55 = vld [vmem:[#allocation122_spill] sm:$0xff]  ;;  %v5488_v59 = vld [vmem:[#allocation127_spill] sm:$0xff] }
 0x599   :  { %v1769_v42 = vmul.f32 %v1763_v8, %v4031_v37  ;;  %v1805_v53 = vadd.f32 0.5, %v1804_v11  ;;  %v5476_v37 = vld [vmem:[#allocation115_spill] sm:$0xff]  ;;  %v5489_v11 = vld [vmem:[#allocation128_spill] sm:$0xff] }
 0x59a   :  { %v1768_v52 = vadd.f32 0.5, %v1767_v58  ;;  %v5484_v8 = vld [vmem:[#allocation123_spill] sm:$0xff]  ;;  %v5490_v58 = vld [vmem:[#allocation129_spill] sm:$0xff] }
 0x59b   :  { %v4185_v7 = vadd.f32 %v1770_v9, %v1769_v42  ;;  %v1810_v45 = vmul.f32 %v2987_v32, %v1805_v53  ;;  %v5485_v9 = vld [vmem:[#allocation124_spill] sm:$0xff]  ;;  %v5486_v42 = vld [vmem:[#allocation125_spill] sm:$0xff]  ;;  %v5491_v32 = vld [vmem:[#allocation130_spill] sm:$0xff] }
 0x59c   :  { %v5492_v53 = vld [vmem:[#allocation131_spill] sm:$0xff] }
 0x59d   :  { %2988 = vtanh.f32 %v4185_v7  ;;  %v4188_v41 = vpack.c.bf16 %v1810_v45, %v1810_v45  ;;  %v5495_v45 = vld [vmem:[#allocation134_spill] sm:$0xff] }
 0x5a7   :  { %v2989_v20 = vpop.eup %2988 }
 0x5a8   :  { %v1773_v61 = vmul.f32 %v2989_v20, %v1768_v52  ;;  %v5493_v52 = vld [vmem:[#allocation132_spill] sm:$0xff]  ;;  %v5494_v20 = vld [vmem:[#allocation133_spill] sm:$0xff] }
 0x5aa   :  { %v1812_v28 = vpack.c.bf16 %v1773_v61, %v1773_v61  ;;  %v5496_v61 = vld [vmem:[#allocation135_spill] sm:$0xff] }
 0x5ac   :  { %1845 = vmatprep.mubr.bf16.mxu0 %v1812_v28  ;;  %1886 = vmatprep.mubr.bf16.mxu1 %v1812_v28 }
 0x5ad   :  { %1846 = vmatmul.mubr.bf16.vlgmr.msra.gmra.mrb[32].mxu0 %v4188_v41  ;;  %1887 = vmatmul.mubr.bf16.vlgmr.msra.gmra.mrb[32].mxu1 %v4188_v41 }
 0x5ae   :  { %1896 = vmatpush1.bf16.msra.mxu0 %v3289_v62  ;;  %1937 = vmatpush1.bf16.msra.mxu1 %v5179_v17 }
 0x5af   :  { %1927 = vmatprep.mubr.bf16.mxu0 %v1812_v28  ;;  %1968 = vmatprep.mubr.bf16.mxu1 %v1812_v28  ;;  %v5497_v28 = vld [vmem:[#allocation136_spill] sm:$0xff] }
 0x5b0   :  { %1897 = vmatprep.subr.bf16.mxu0 %v5180_v2  ;;  %1938 = vmatprep.subr.bf16.mxu1 %v5181_v46 }
 0x5b2   :  { %1898 = vmatpush1.bf16.msra.mxu0 %v5182_v13  ;;  %1939 = vmatpush1.bf16.msra.mxu1 %v5183_v18 }
 0x5b3   :  { %1899 = vmatprep.subr.bf16.mxu0 %v5184_v26  ;;  %1940 = vmatprep.subr.bf16.mxu1 %v5275_v14 }
 0x5b6   :  { %1900 = vmatpush1.bf16.msra.mxu0 %v5276_v33  ;;  %1941 = vmatpush1.bf16.msra.mxu1 %v5277_v24 }
 0x5b7   :  { %1901 = vmatprep.subr.bf16.mxu0 %v5278_v15  ;;  %1942 = vmatprep.subr.bf16.mxu1 %v5279_v31 }
 0x5ba   :  { %1902 = vmatpush1.bf16.msra.mxu0 %v5280_v47  ;;  %1943 = vmatpush1.bf16.msra.mxu1 %v5281_v56 }
 0x5bb   :  { %1903 = vmatprep.subr.bf16.mxu0 %v5282_v22  ;;  %1944 = vmatprep.subr.bf16.mxu1 %v5283_v50 }
 0x5be   :  { %1904 = vmatpush1.bf16.msra.mxu0 %v5284_v57  ;;  %1945 = vmatpush1.bf16.msra.mxu1 %v5375_v49 }
 0x5bf   :  { %1905 = vmatprep.subr.bf16.mxu0 %v5376_v44  ;;  %1946 = vmatprep.subr.bf16.mxu1 %v5377_v43 }
 0x5c2   :  { %1906 = vmatpush1.bf16.msra.mxu0 %v5378_v36  ;;  %1947 = vmatpush1.bf16.msra.mxu1 %v5379_v5 }
 0x5c3   :  { %1907 = vmatprep.subr.bf16.mxu0 %v5380_v38  ;;  %1948 = vmatprep.subr.bf16.mxu1 %v5381_v35 }
 0x5c6   :  { %1908 = vmatpush1.bf16.msra.mxu0 %v5382_v10  ;;  %1949 = vmatpush1.bf16.msra.mxu1 %v5383_v27 }
 0x5c7   :  { %1909 = vmatprep.subr.bf16.mxu0 %v5294_v39  ;;  %1950 = vmatprep.subr.bf16.mxu1 %v5295_v34 }
 0x5ca   :  { %1910 = vmatpush1.bf16.msra.mxu0 %v5296_v23  ;;  %1951 = vmatpush1.bf16.msra.mxu1 %v5384_v51 }
 0x5cb   :  { %1911 = vmatprep.subr.bf16.mxu0 %v5385_v63  ;;  %1952 = vmatprep.subr.bf16.mxu1 %v5299_v0 }
 0x5ce   :  { %1912 = vmatpush1.bf16.msra.mxu0 %v5476_v37  ;;  %1953 = vmatpush1.bf16.msra.mxu1 %v5477_v60 }
 0x5cf   :  { %1913 = vmatprep.subr.bf16.mxu0 %v5478_v29  ;;  %1954 = vmatprep.subr.bf16.mxu1 %v5479_v12 }
 0x5d2   :  { %1914 = vmatpush1.bf16.msra.mxu0 %v5480_v1  ;;  %1955 = vmatpush1.bf16.msra.mxu1 %v5481_v48 }
 0x5d3   :  { %1915 = vmatprep.subr.bf16.mxu0 %v5482_v40  ;;  %1956 = vmatprep.subr.bf16.mxu1 %v5483_v55 }
 0x5d6   :  { %1916 = vmatpush1.bf16.msra.mxu0 %v5484_v8  ;;  %1957 = vmatpush1.bf16.msra.mxu1 %v5485_v9 }
 0x5d7   :  { %1917 = vmatprep.subr.bf16.mxu0 %v5486_v42  ;;  %1958 = vmatprep.subr.bf16.mxu1 %v5487_v30  ;;  %v5498_v30 = vld [vmem:[#allocation137_spill] sm:$0xff] }
 0x5da   :  { %1918 = vmatpush1.bf16.msra.mxu0 %v5488_v59  ;;  %1959 = vmatpush1.bf16.msra.mxu1 %v5489_v11  ;;  %v5499_v59 = vld [vmem:[#allocation138_spill] sm:$0xff]  ;;  %v5500_v11 = vld [vmem:[#allocation139_spill] sm:$0xff] }
 0x5db   :  { %1919 = vmatprep.subr.bf16.mxu0 %v5490_v58  ;;  %1960 = vmatprep.subr.bf16.mxu1 %v5491_v32  ;;  %v5501_v58 = vld [vmem:[#allocation140_spill] sm:$0xff]  ;;  %v5502_v32 = vld [vmem:[#allocation141_spill] sm:$0xff] }
 0x5de   :  { %1920 = vmatpush1.bf16.msra.mxu0 %v5492_v53  ;;  %1961 = vmatpush1.bf16.msra.mxu1 %v5493_v52  ;;  %v5503_v53 = vld [vmem:[#allocation142_spill] sm:$0xff]  ;;  %v5504_v52 = vld [vmem:[#allocation143_spill] sm:$0xff] }
 0x5df   :  { %1921 = vmatprep.subr.bf16.mxu0 %v5494_v20  ;;  %1962 = vmatprep.subr.bf16.mxu1 %v5495_v45  ;;  %v5505_v20 = vld [vmem:[#allocation144_spill] sm:$0xff]  ;;  %v5506_v45 = vld [vmem:[#allocation5_spill] sm:$0xff] }
 0x5e2   :  { %1922 = vmatpush1.bf16.msra.mxu0 %v5496_v61  ;;  %1963 = vmatpush1.bf16.msra.mxu1 %v5497_v28  ;;  %v5507_v61 = vld [vmem:[#allocation7_spill] sm:$0xff] }
 0x5e3   :  { %1923 = vmatprep.subr.bf16.mxu0 %v5498_v30  ;;  %1964 = vmatprep.subr.bf16.mxu1 %v5499_v59  ;;  %v5508_v59 = vld [vmem:[#allocation6_spill] sm:$0xff]  ;;  %v5517_v30 = vld [vmem:[#allocation16_spill] sm:$0xff] }
 0x5e6   :  { %1924 = vmatpush1.bf16.msra.mxu0 %v5500_v11  ;;  %1965 = vmatpush1.bf16.msra.mxu1 %v5501_v58  ;;  %v5509_v11 = vld [vmem:[#allocation8_spill] sm:$0xff]  ;;  %v5510_v58 = vld [vmem:[#allocation9_spill] sm:$0xff] }
 0x5e7   :  { %1925 = vmatprep.subr.bf16.mxu0 %v5502_v32  ;;  %1966 = vmatprep.subr.bf16.mxu1 %v5503_v53  ;;  %v5511_v32 = vld [vmem:[#allocation10_spill] sm:$0xff]  ;;  %v5512_v53 = vld [vmem:[#allocation11_spill] sm:$0xff] }
 0x5ea   :  { %1926 = vmatpush1.bf16.msra.mxu0 %v5504_v52  ;;  %1967 = vmatpush1.bf16.msra.mxu1 %v5505_v20  ;;  %v5513_v52 = vld [vmem:[#allocation12_spill] sm:$0xff]  ;;  %v5514_v20 = vld [vmem:[#allocation13_spill] sm:$0xff] }
 0x5eb   :  { %2038 = vmatprep.subr.bf16.mxu0 %v5506_v45  ;;  %2079 = vmatprep.subr.bf16.mxu1 %v5507_v61  ;;  %v5515_v45 = vld [vmem:[#allocation14_spill] sm:$0xff]  ;;  %v5516_v61 = vld [vmem:[#allocation15_spill] sm:$0xff] }
 0x5ed   :  { %1928 = vmatmul.mubr.bf16.vlgmr.msra.gmra.mrb[36].mxu0 %v4188_v41  ;;  %1969 = vmatmul.mubr.bf16.vlgmr.msra.gmra.mrb[36].mxu1 %v4188_v41  ;;  %v5518_v41 = vld [vmem:[#allocation17_spill] sm:$0xff] }
 0x5ee   :  { %2039 = vmatpush1.bf16.msra.mxu0 %v5508_v59  ;;  %2080 = vmatpush1.bf16.msra.mxu1 %v5509_v11  ;;  %v5519_v59 = vld [vmem:[#allocation18_spill] sm:$0xff]  ;;  %v5520_v11 = vld [vmem:[#allocation19_spill] sm:$0xff] }
 0x5ef   :  { %2040 = vmatprep.subr.bf16.mxu0 %v5510_v58  ;;  %2081 = vmatprep.subr.bf16.mxu1 %v5511_v32  ;;  %v5521_v58 = vld [vmem:[#allocation20_spill] sm:$0xff]  ;;  %v5522_v32 = vld [vmem:[#allocation21_spill] sm:$0xff] }
 0x5f2   :  { %2041 = vmatpush1.bf16.msra.mxu0 %v5512_v53  ;;  %2082 = vmatpush1.bf16.msra.mxu1 %v5513_v52  ;;  %v5523_v53 = vld [vmem:[#allocation22_spill] sm:$0xff]  ;;  %v5524_v52 = vld [vmem:[#allocation23_spill] sm:$0xff] }
 0x5f3   :  { %2042 = vmatprep.subr.bf16.mxu0 %v5514_v20  ;;  %2083 = vmatprep.subr.bf16.mxu1 %v5515_v45  ;;  %v5525_v20 = vld [vmem:[#allocation24_spill] sm:$0xff]  ;;  %v5526_v45 = vld [vmem:[#allocation25_spill] sm:$0xff] }
 0x5f6   :  { %2043 = vmatpush1.bf16.msra.mxu0 %v5516_v61  ;;  %2084 = vmatpush1.bf16.msra.mxu1 %v5517_v30  ;;  %v5527_v61 = vld [vmem:[#allocation26_spill] sm:$0xff]  ;;  %v5528_v30 = vld [vmem:[#allocation27_spill] sm:$0xff] }
 0x5f7   :  { %2044 = vmatprep.subr.bf16.mxu0 %v5518_v41  ;;  %2085 = vmatprep.subr.bf16.mxu1 %v5519_v59  ;;  %v5529_v41 = vld [vmem:[#allocation28_spill] sm:$0xff]  ;;  %v5530_v59 = vld [vmem:[#allocation29_spill] sm:$0xff] }
 0x5fa   :  { %2045 = vmatpush1.bf16.msra.mxu0 %v5520_v11  ;;  %2086 = vmatpush1.bf16.msra.mxu1 %v5521_v58  ;;  %v5531_v11 = vld [vmem:[#allocation30_spill] sm:$0xff]  ;;  %v5532_v58 = vld [vmem:[#allocation31_spill] sm:$0xff] }
 0x5fb   :  { %2046 = vmatprep.subr.bf16.mxu0 %v5522_v32  ;;  %2087 = vmatprep.subr.bf16.mxu1 %v5523_v53  ;;  %v5533_v32 = vld [vmem:[#allocation32_spill] sm:$0xff]  ;;  %v5534_v53 = vld [vmem:[#allocation33_spill] sm:$0xff] }
 0x5fe   :  { %2047 = vmatpush1.bf16.msra.mxu0 %v5524_v52  ;;  %2088 = vmatpush1.bf16.msra.mxu1 %v5525_v20  ;;  %v5535_v52 = vld [vmem:[#allocation34_spill] sm:$0xff]  ;;  %v5536_v20 = vld [vmem:[#allocation35_spill] sm:$0xff] }
 0x5ff   :  { %2048 = vmatprep.subr.bf16.mxu0 %v5526_v45  ;;  %2089 = vmatprep.subr.bf16.mxu1 %v5527_v61  ;;  %v5537_v45 = vld [vmem:[#allocation36_spill] sm:$0xff]  ;;  %v5538_v61 = vld [vmem:[#allocation37_spill] sm:$0xff] }
 0x602   :  { %2049 = vmatpush1.bf16.msra.mxu0 %v5528_v30  ;;  %2090 = vmatpush1.bf16.msra.mxu1 %v5529_v41  ;;  %v5539_v30 = vld [vmem:[#allocation38_spill] sm:$0xff]  ;;  %v5540_v41 = vld [vmem:[#allocation39_spill] sm:$0xff] }
 0x603   :  { %2050 = vmatprep.subr.bf16.mxu0 %v5530_v59  ;;  %2091 = vmatprep.subr.bf16.mxu1 %v5531_v11  ;;  %v5541_v59 = vld [vmem:[#allocation40_spill] sm:$0xff]  ;;  %v5542_v11 = vld [vmem:[#allocation41_spill] sm:$0xff] }
 0x606   :  { %2051 = vmatpush1.bf16.msra.mxu0 %v5532_v58  ;;  %2092 = vmatpush1.bf16.msra.mxu1 %v5533_v32  ;;  %v5543_v58 = vld [vmem:[#allocation42_spill] sm:$0xff]  ;;  %v5544_v32 = vld [vmem:[#allocation43_spill] sm:$0xff] }
 0x607   :  { %2052 = vmatprep.subr.bf16.mxu0 %v5534_v53  ;;  %2093 = vmatprep.subr.bf16.mxu1 %v5535_v52  ;;  %v5545_v53 = vld [vmem:[#allocation44_spill] sm:$0xff]  ;;  %v5546_v52 = vld [vmem:[#allocation45_spill] sm:$0xff] }
 0x60a   :  { %2053 = vmatpush1.bf16.msra.mxu0 %v5536_v20  ;;  %2094 = vmatpush1.bf16.msra.mxu1 %v5537_v45  ;;  %v5547_v20 = vld [vmem:[#allocation46_spill] sm:$0xff]  ;;  %v5548_v45 = vld [vmem:[#allocation48_spill] sm:$0xff] }
 0x60b   :  { %2054 = vmatprep.subr.bf16.mxu0 %v5538_v61  ;;  %2095 = vmatprep.subr.bf16.mxu1 %v5539_v30  ;;  %v5549_v61 = vld [vmem:[#allocation49_spill] sm:$0xff]  ;;  %v5550_v30 = vld [vmem:[#allocation50_spill] sm:$0xff] }
 0x60e   :  { %2055 = vmatpush1.bf16.msra.mxu0 %v5540_v41  ;;  %2096 = vmatpush1.bf16.msra.mxu1 %v5541_v59  ;;  %v5551_v41 = vld [vmem:[#allocation51_spill] sm:$0xff]  ;;  %v5552_v59 = vld [vmem:[#allocation52_spill] sm:$0xff] }
 0x60f   :  { %2056 = vmatprep.subr.bf16.mxu0 %v5542_v11  ;;  %2097 = vmatprep.subr.bf16.mxu1 %v5543_v58  ;;  %v5553_v11 = vld [vmem:[#allocation53_spill] sm:$0xff]  ;;  %v5554_v58 = vld [vmem:[#allocation54_spill] sm:$0xff] }
 0x612   :  { %2057 = vmatpush1.bf16.msra.mxu0 %v5544_v32  ;;  %2098 = vmatpush1.bf16.msra.mxu1 %v5545_v53  ;;  %v5555_v32 = vld [vmem:[#allocation55_spill] sm:$0xff]  ;;  %v5556_v53 = vld [vmem:[#allocation56_spill] sm:$0xff] }
 0x613   :  { %2058 = vmatprep.subr.bf16.mxu0 %v5546_v52  ;;  %2099 = vmatprep.subr.bf16.mxu1 %v5547_v20  ;;  %v5557_v52 = vld [vmem:[#allocation57_spill] sm:$0xff]  ;;  %v5558_v20 = vld [vmem:[#allocation58_spill] sm:$0xff] }
 0x616   :  { %2059 = vmatpush1.bf16.msra.mxu0 %v5548_v45  ;;  %2100 = vmatpush1.bf16.msra.mxu1 %v5549_v61  ;;  %v5559_v45 = vld [vmem:[#allocation59_spill] sm:$0xff]  ;;  %v5560_v61 = vld [vmem:[#allocation60_spill] sm:$0xff] }
 0x617   :  { %2060 = vmatprep.subr.bf16.mxu0 %v5550_v30  ;;  %2101 = vmatprep.subr.bf16.mxu1 %v5551_v41  ;;  %v5561_v30 = vld [vmem:[#allocation61_spill] sm:$0xff]  ;;  %v5562_v41 = vld [vmem:[#allocation62_spill] sm:$0xff] }
 0x61a   :  { %2061 = vmatpush1.bf16.msra.mxu0 %v5552_v59  ;;  %2102 = vmatpush1.bf16.msra.mxu1 %v5553_v11  ;;  %v5563_v59 = vld [vmem:[#allocation63_spill] sm:$0xff]  ;;  %v5564_v11 = vld [vmem:[#allocation64_spill] sm:$0xff] }
 0x61b   :  { %2062 = vmatprep.subr.bf16.mxu0 %v5554_v58  ;;  %2103 = vmatprep.subr.bf16.mxu1 %v5555_v32  ;;  %v5565_v58 = vld [vmem:[#allocation65_spill] sm:$0xff]  ;;  %v5566_v32 = vld [vmem:[#allocation66_spill] sm:$0xff] }
 0x61e   :  { %2063 = vmatpush1.bf16.msra.mxu0 %v5556_v53  ;;  %2104 = vmatpush1.bf16.msra.mxu1 %v5557_v52  ;;  %v5567_v53 = vld [vmem:[#allocation67_spill] sm:$0xff]  ;;  %v5568_v52 = vld [vmem:[#allocation68_spill] sm:$0xff] }
 0x61f   :  { %2064 = vmatprep.subr.bf16.mxu0 %v5558_v20  ;;  %2105 = vmatprep.subr.bf16.mxu1 %v5559_v45  ;;  %v5569_v20 = vld [vmem:[#allocation69_spill] sm:$0xff]  ;;  %v5570_v45 = vld [vmem:[#allocation70_spill] sm:$0xff] }
 0x622   :  { %2065 = vmatpush1.bf16.msra.mxu0 %v5560_v61  ;;  %2106 = vmatpush1.bf16.msra.mxu1 %v5561_v30  ;;  %v5571_v61 = vld [vmem:[#allocation71_spill] sm:$0xff]  ;;  %v2004_v30 = vpop.permute.xlu1 %2003 }
 0x623   :  { %2066 = vmatprep.subr.bf16.mxu0 %v5562_v41  ;;  %2107 = vmatprep.subr.bf16.mxu1 %v5563_v59  ;;  %v5572_v41 = vld [vmem:[#allocation75_spill] sm:$0xff]  ;;  %v5573_v59 = vld [vmem:[#allocation76_spill] sm:$0xff] }
 0x624   :  { %v2006_v28 = vmul.f32 %v2004_v30, %v5572_v41  ;;  %v2007_v42 = vmul.f32 %v2004_v30, %v5573_v59 }
 0x626   :  { %2067 = vmatpush1.bf16.msra.mxu0 %v5564_v11  ;;  %2108 = vmatpush1.bf16.msra.mxu1 %v5565_v58  ;;  %v5574_v11 = vld [vmem:[#allocation79_spill] sm:$0xff]  ;;  %v5575_v58 = vld [vmem:[#allocation78_spill] sm:$0xff] }
 0x627   :  { %2068 = vmatprep.subr.bf16.mxu0 %v5566_v32  ;;  %2109 = vmatprep.subr.bf16.mxu1 %v5567_v53  ;;  %v2010_v9 = vadd.f32 %v2006_v28, %v5574_v11  ;;  %v2008_v8 = vmul.f32 %v2004_v30, %v5575_v58  ;;  %v5576_v53 = vld [vmem:[#allocation80_spill] sm:$0xff] }
 0x628   :  { %v2011_v40 = vadd.f32 %v2007_v42, %v5576_v53 }
 0x629   :  { %v2012_v29 = vadd.f32 %v2008_v8, %v5374_v19 }
 0x62a   :  { %2069 = vmatpush1.bf16.msra.mxu0 %v5568_v52  ;;  %2110 = vmatpush1.bf16.msra.mxu1 %v5569_v20 }
 0x62b   :  { %2120 = vmatprep.subr.bf16.mxu0 %v5570_v45  ;;  %2161 = vmatprep.subr.bf16.mxu1 %v5571_v61 }
 0x680   :  { %v1847_v32 = vpop.f32.mrb[32].mxu0  ;;  %v1888_v55 = vpop.f32.mrb[32].mxu1 }
 0x681   :  { %v2014_v52 = vadd.f32 %v2010_v9, %v1847_v32  ;;  %v1849_v48 = vpop.f32.mrb[33].mxu0  ;;  %v1890_v20 = vpop.f32.mrb[33].mxu1  ;;  %v2016_v28 = vadd.f32 %v2012_v29, %v1888_v55  ;;  %v2009_v55 = vmul.f32 %v2004_v30, %v5175_v6 }
 0x682   :  { %v2015_v1 = vadd.f32 %v2011_v40, %v1849_v48  ;;  %v1851_v45 = vpop.f32.mrb[34].mxu0  ;;  %v1892_v12 = vpop.f32.mrb[34].mxu1 }
 0x683   :  { %v2018_v61 = vmul.f32 0.5, %v2014_v52  ;;  %v1852_v41 = vpop.f32.mrb[35].mxu0  ;;  %v1893_v60 = vpop.f32.mrb[35].mxu1 }
 0x684   :  { %v2022_v59 = vmul.f32 0.5, %v2015_v1 }
 0x685   :  { %2990 = vtanh.f32 %v2018_v61 }
 0x686   :  { %2992 = vtanh.f32 %v2022_v59 }
 0x687   :  { %2994 = vtanh.f32 %v2016_v28 }
 0x68f   :  { %v2991_v11 = vpop.eup %2990 }
 0x690   :  { %v2993_v58 = vpop.eup %2992  ;;  %v2020_v37 = vmul.f32 0.5, %v2991_v11 }
 0x691   :  { %v2024_v42 = vmul.f32 0.5, %v2993_v58  ;;  %v2995_v32 = vpop.eup %2994 }
 0x692   :  { %v2021_v9 = vadd.f32 0.5, %v2020_v37 }
 0x693   :  { %v2025_v53 = vadd.f32 0.5, %v2024_v42 }
 0x694   :  { %v2032_v48 = vmul.f32 %v2995_v32, %v2021_v9 }
 0x695   :  { %v2031_v12 = vmul.f32 %v2025_v53, %v4175_v25  ;;  %v2013_v53 = vadd.f32 %v2009_v55, %v5178_v21 }
 0x697   :  { %v4329_v40 = vadd.f32 %v2032_v48, %v2031_v12  ;;  %v2017_v28 = vadd.f32 %v2013_v53, %v1890_v20 }
 0x699   :  { %v2027_v9 = vmul.f32 0.5, %v2017_v28 }
 0x6c0   :  { %v1929_v8 = vpop.f32.mrb[36].mxu0  ;;  %v1970_v52 = vpop.f32.mrb[36].mxu1 }
 0x6c1   :  { %v1977_v60 = vadd.f32 %v1929_v8, %v5274_v16  ;;  %v1931_v1 = vpop.f32.mrb[37].mxu0  ;;  %v1972_v29 = vpop.f32.mrb[37].mxu1  ;;  %v1979_v25 = vadd.f32 %v1970_v52, %v3712_v3 }
 0x6c2   :  { %v1978_v59 = vadd.f32 %v1931_v1, %v3708_v54  ;;  %v1933_v11 = vpop.f32.mrb[38].mxu0  ;;  %v1974_v58 = vpop.f32.mrb[38].mxu1  ;;  %v1980_v42 = vadd.f32 %v1972_v29, %v3718_v4 }
 0x6c3   :  { %v1981_v37 = vmul.f32 0.5, %v1977_v60  ;;  %v1934_v45 = vpop.f32.mrb[39].mxu0  ;;  %v1975_v61 = vpop.f32.mrb[39].mxu1 }
 0x6c4   :  { %v1985_v41 = vmul.f32 0.5, %v1978_v59  ;;  %v1990_v30 = vmul.f32 0.5, %v1980_v42 }
 0x6c5   :  { %2996 = vtanh.f32 %v1981_v37 }
 0x6c6   :  { %2998 = vtanh.f32 %v1985_v41 }
 0x6c7   :  { %3000 = vtanh.f32 %v1979_v25 }
 0x6c8   :  { %3002 = vtanh.f32 %v2027_v9 }
 0x6c9   :  { %3004 = vtanh.f32 %v1990_v30  ;;  %v5578_v30 = vld [vmem:[#allocation116_spill] sm:$0xff] }
 0x6ca   :  { %3006 = vtanh.f32 %v4329_v40 }
 0x6cf   :  { %v2997_v32 = vpop.eup %2996 }
 0x6d0   :  { %v2999_v48 = vpop.eup %2998  ;;  %v1983_v12 = vmul.f32 0.5, %v2997_v32  ;;  %v5579_v32 = vld [vmem:[#allocation117_spill] sm:$0xff] }
 0x6d1   :  { %v1987_v8 = vmul.f32 0.5, %v2999_v48  ;;  %v3001_v1 = vpop.eup %3000  ;;  %v5580_v48 = vld [vmem:[#allocation118_spill] sm:$0xff] }
 0x6d2   :  { %v1984_v60 = vadd.f32 0.5, %v1983_v12  ;;  %v3003_v29 = vpop.eup %3002  ;;  %v5581_v12 = vld [vmem:[#allocation119_spill] sm:$0xff] }
 0x6d3   :  { %v1988_v59 = vadd.f32 0.5, %v1987_v8  ;;  %v3005_v55 = vpop.eup %3004  ;;  %v2029_v58 = vmul.f32 0.5, %v3003_v29  ;;  %v5582_v8 = vld [vmem:[#allocation120_spill] sm:$0xff]  ;;  %v5588_v29 = vld [vmem:[#allocation126_spill] sm:$0xff] }
 0x6d4   :  { %v1995_v11 = vmul.f32 %v3001_v1, %v1984_v60  ;;  %v1992_v37 = vmul.f32 0.5, %v3005_v55  ;;  %v3007_v45 = vpop.eup %3006  ;;  %v5583_v60 = vld [vmem:[#allocation121_spill] sm:$0xff]  ;;  %v5584_v1 = vld [vmem:[#allocation122_spill] sm:$0xff]  ;;  %v5589_v55 = vld [vmem:[#allocation127_spill] sm:$0xff] }
 0x6d5   :  { %v1994_v52 = vmul.f32 %v1988_v59, %v4185_v7  ;;  %v2030_v61 = vadd.f32 0.5, %v2029_v58  ;;  %v5577_v7 = vld [vmem:[#allocation115_spill] sm:$0xff]  ;;  %v5590_v58 = vld [vmem:[#allocation128_spill] sm:$0xff] }
 0x6d6   :  { %v1993_v41 = vadd.f32 0.5, %v1992_v37  ;;  %v5585_v59 = vld [vmem:[#allocation123_spill] sm:$0xff]  ;;  %v5591_v37 = vld [vmem:[#allocation129_spill] sm:$0xff] }
 0x6d7   :  { %v4339_v20 = vadd.f32 %v1995_v11, %v1994_v52  ;;  %v2035_v53 = vmul.f32 %v3007_v45, %v2030_v61  ;;  %v5586_v11 = vld [vmem:[#allocation124_spill] sm:$0xff]  ;;  %v5587_v52 = vld [vmem:[#allocation125_spill] sm:$0xff]  ;;  %v5592_v45 = vld [vmem:[#allocation130_spill] sm:$0xff] }
 0x6d8   :  { %v5593_v61 = vld [vmem:[#allocation131_spill] sm:$0xff] }
 0x6d9   :  { %3008 = vtanh.f32 %v4339_v20  ;;  %v4342_v9 = vpack.c.bf16 %v2035_v53, %v2035_v53  ;;  %v5596_v53 = vld [vmem:[#allocation134_spill] sm:$0xff] }
 0x6e3   :  { %v3009_v25 = vpop.eup %3008 }
 0x6e4   :  { %v1998_v28 = vmul.f32 %v3009_v25, %v1993_v41  ;;  %v5594_v41 = vld [vmem:[#allocation132_spill] sm:$0xff]  ;;  %v5595_v25 = vld [vmem:[#allocation133_spill] sm:$0xff] }
 0x6e6   :  { %v2037_v42 = vpack.c.bf16 %v1998_v28, %v1998_v28  ;;  %v5597_v28 = vld [vmem:[#allocation135_spill] sm:$0xff] }
 0x6e8   :  { %2070 = vmatprep.mubr.bf16.mxu0 %v2037_v42  ;;  %2111 = vmatprep.mubr.bf16.mxu1 %v2037_v42 }
 0x6e9   :  { %2071 = vmatmul.mubr.bf16.vlgmr.msra.gmra.mrb[40].mxu0 %v4342_v9  ;;  %2112 = vmatmul.mubr.bf16.vlgmr.msra.gmra.mrb[40].mxu1 %v4342_v9 }
 0x6ea   :  { %2121 = vmatpush1.bf16.msra.mxu0 %v3289_v62  ;;  %2162 = vmatpush1.bf16.msra.mxu1 %v5179_v17 }
 0x6eb   :  { %2152 = vmatprep.mubr.bf16.mxu0 %v2037_v42  ;;  %2193 = vmatprep.mubr.bf16.mxu1 %v2037_v42  ;;  %v5598_v42 = vld [vmem:[#allocation136_spill] sm:$0xff] }
 0x6ec   :  { %2122 = vmatprep.subr.bf16.mxu0 %v5180_v2  ;;  %2163 = vmatprep.subr.bf16.mxu1 %v5181_v46 }
 0x6ee   :  { %2123 = vmatpush1.bf16.msra.mxu0 %v5182_v13  ;;  %2164 = vmatpush1.bf16.msra.mxu1 %v5183_v18 }
 0x6ef   :  { %2124 = vmatprep.subr.bf16.mxu0 %v5184_v26  ;;  %2165 = vmatprep.subr.bf16.mxu1 %v5275_v14 }
 0x6f2   :  { %2125 = vmatpush1.bf16.msra.mxu0 %v5276_v33  ;;  %2166 = vmatpush1.bf16.msra.mxu1 %v5277_v24 }
 0x6f3   :  { %2126 = vmatprep.subr.bf16.mxu0 %v5278_v15  ;;  %2167 = vmatprep.subr.bf16.mxu1 %v5279_v31 }
 0x6f6   :  { %2127 = vmatpush1.bf16.msra.mxu0 %v5280_v47  ;;  %2168 = vmatpush1.bf16.msra.mxu1 %v5281_v56 }
 0x6f7   :  { %2128 = vmatprep.subr.bf16.mxu0 %v5282_v22  ;;  %2169 = vmatprep.subr.bf16.mxu1 %v5283_v50 }
 0x6fa   :  { %2129 = vmatpush1.bf16.msra.mxu0 %v5284_v57  ;;  %2170 = vmatpush1.bf16.msra.mxu1 %v5375_v49 }
 0x6fb   :  { %2130 = vmatprep.subr.bf16.mxu0 %v5376_v44  ;;  %2171 = vmatprep.subr.bf16.mxu1 %v5377_v43 }
 0x6fe   :  { %2131 = vmatpush1.bf16.msra.mxu0 %v5378_v36  ;;  %2172 = vmatpush1.bf16.msra.mxu1 %v5379_v5 }
 0x6ff   :  { %2132 = vmatprep.subr.bf16.mxu0 %v5380_v38  ;;  %2173 = vmatprep.subr.bf16.mxu1 %v5381_v35 }
 0x702   :  { %2133 = vmatpush1.bf16.msra.mxu0 %v5382_v10  ;;  %2174 = vmatpush1.bf16.msra.mxu1 %v5383_v27 }
 0x703   :  { %2134 = vmatprep.subr.bf16.mxu0 %v5294_v39  ;;  %2175 = vmatprep.subr.bf16.mxu1 %v5295_v34 }
 0x706   :  { %2135 = vmatpush1.bf16.msra.mxu0 %v5296_v23  ;;  %2176 = vmatpush1.bf16.msra.mxu1 %v5384_v51 }
 0x707   :  { %2136 = vmatprep.subr.bf16.mxu0 %v5385_v63  ;;  %2177 = vmatprep.subr.bf16.mxu1 %v5299_v0 }
 0x70a   :  { %2137 = vmatpush1.bf16.msra.mxu0 %v5577_v7  ;;  %2178 = vmatpush1.bf16.msra.mxu1 %v5578_v30 }
 0x70b   :  { %2138 = vmatprep.subr.bf16.mxu0 %v5579_v32  ;;  %2179 = vmatprep.subr.bf16.mxu1 %v5580_v48 }
 0x70e   :  { %2139 = vmatpush1.bf16.msra.mxu0 %v5581_v12  ;;  %2180 = vmatpush1.bf16.msra.mxu1 %v5582_v8 }
 0x70f   :  { %2140 = vmatprep.subr.bf16.mxu0 %v5583_v60  ;;  %2181 = vmatprep.subr.bf16.mxu1 %v5584_v1 }
 0x712   :  { %2141 = vmatpush1.bf16.msra.mxu0 %v5585_v59  ;;  %2182 = vmatpush1.bf16.msra.mxu1 %v5586_v11 }
 0x713   :  { %2142 = vmatprep.subr.bf16.mxu0 %v5587_v52  ;;  %2183 = vmatprep.subr.bf16.mxu1 %v5588_v29  ;;  %v5599_v29 = vld [vmem:[#allocation137_spill] sm:$0xff] }
 0x716   :  { %2143 = vmatpush1.bf16.msra.mxu0 %v5589_v55  ;;  %2184 = vmatpush1.bf16.msra.mxu1 %v5590_v58  ;;  %v5600_v55 = vld [vmem:[#allocation138_spill] sm:$0xff]  ;;  %v5601_v58 = vld [vmem:[#allocation139_spill] sm:$0xff] }
 0x717   :  { %2144 = vmatprep.subr.bf16.mxu0 %v5591_v37  ;;  %2185 = vmatprep.subr.bf16.mxu1 %v5592_v45  ;;  %v5602_v37 = vld [vmem:[#allocation140_spill] sm:$0xff]  ;;  %v5603_v45 = vld [vmem:[#allocation141_spill] sm:$0xff] }
 0x71a   :  { %2145 = vmatpush1.bf16.msra.mxu0 %v5593_v61  ;;  %2186 = vmatpush1.bf16.msra.mxu1 %v5594_v41  ;;  %v5604_v61 = vld [vmem:[#allocation142_spill] sm:$0xff]  ;;  %v5605_v41 = vld [vmem:[#allocation143_spill] sm:$0xff] }
 0x71b   :  { %2146 = vmatprep.subr.bf16.mxu0 %v5595_v25  ;;  %2187 = vmatprep.subr.bf16.mxu1 %v5596_v53  ;;  %v5606_v25 = vld [vmem:[#allocation144_spill] sm:$0xff]  ;;  %v5607_v53 = vld [vmem:[#allocation5_spill] sm:$0xff] }
 0x71e   :  { %2147 = vmatpush1.bf16.msra.mxu0 %v5597_v28  ;;  %2188 = vmatpush1.bf16.msra.mxu1 %v5598_v42  ;;  %v5608_v28 = vld [vmem:[#allocation7_spill] sm:$0xff] }
 0x71f   :  { %2148 = vmatprep.subr.bf16.mxu0 %v5599_v29  ;;  %2189 = vmatprep.subr.bf16.mxu1 %v5600_v55  ;;  %v5609_v55 = vld [vmem:[#allocation6_spill] sm:$0xff]  ;;  %v5618_v29 = vld [vmem:[#allocation16_spill] sm:$0xff] }
 0x722   :  { %2149 = vmatpush1.bf16.msra.mxu0 %v5601_v58  ;;  %2190 = vmatpush1.bf16.msra.mxu1 %v5602_v37  ;;  %v5610_v58 = vld [vmem:[#allocation8_spill] sm:$0xff]  ;;  %v5611_v37 = vld [vmem:[#allocation9_spill] sm:$0xff] }
 0x723   :  { %2150 = vmatprep.subr.bf16.mxu0 %v5603_v45  ;;  %2191 = vmatprep.subr.bf16.mxu1 %v5604_v61  ;;  %v5612_v45 = vld [vmem:[#allocation10_spill] sm:$0xff]  ;;  %v5613_v61 = vld [vmem:[#allocation11_spill] sm:$0xff] }
 0x726   :  { %2151 = vmatpush1.bf16.msra.mxu0 %v5605_v41  ;;  %2192 = vmatpush1.bf16.msra.mxu1 %v5606_v25  ;;  %v5614_v41 = vld [vmem:[#allocation12_spill] sm:$0xff]  ;;  %v5615_v25 = vld [vmem:[#allocation13_spill] sm:$0xff] }
 0x727   :  { %2263 = vmatprep.subr.bf16.mxu0 %v5607_v53  ;;  %2304 = vmatprep.subr.bf16.mxu1 %v5608_v28  ;;  %v5616_v53 = vld [vmem:[#allocation14_spill] sm:$0xff]  ;;  %v5617_v28 = vld [vmem:[#allocation15_spill] sm:$0xff] }
 0x729   :  { %2153 = vmatmul.mubr.bf16.vlgmr.msra.gmra.mrb[44].mxu0 %v4342_v9  ;;  %2194 = vmatmul.mubr.bf16.vlgmr.msra.gmra.mrb[44].mxu1 %v4342_v9  ;;  %v5619_v9 = vld [vmem:[#allocation17_spill] sm:$0xff] }
 0x72a   :  { %2264 = vmatpush1.bf16.msra.mxu0 %v5609_v55  ;;  %2305 = vmatpush1.bf16.msra.mxu1 %v5610_v58  ;;  %v5620_v55 = vld [vmem:[#allocation18_spill] sm:$0xff]  ;;  %v5621_v58 = vld [vmem:[#allocation19_spill] sm:$0xff] }
 0x72b   :  { %2265 = vmatprep.subr.bf16.mxu0 %v5611_v37  ;;  %2306 = vmatprep.subr.bf16.mxu1 %v5612_v45  ;;  %v5622_v37 = vld [vmem:[#allocation20_spill] sm:$0xff]  ;;  %v5623_v45 = vld [vmem:[#allocation21_spill] sm:$0xff] }
 0x72e   :  { %2266 = vmatpush1.bf16.msra.mxu0 %v5613_v61  ;;  %2307 = vmatpush1.bf16.msra.mxu1 %v5614_v41  ;;  %v5624_v61 = vld [vmem:[#allocation22_spill] sm:$0xff]  ;;  %v5625_v41 = vld [vmem:[#allocation23_spill] sm:$0xff] }
 0x72f   :  { %2267 = vmatprep.subr.bf16.mxu0 %v5615_v25  ;;  %2308 = vmatprep.subr.bf16.mxu1 %v5616_v53  ;;  %v5626_v25 = vld [vmem:[#allocation24_spill] sm:$0xff]  ;;  %v5627_v53 = vld [vmem:[#allocation25_spill] sm:$0xff] }
 0x732   :  { %2268 = vmatpush1.bf16.msra.mxu0 %v5617_v28  ;;  %2309 = vmatpush1.bf16.msra.mxu1 %v5618_v29  ;;  %v5628_v28 = vld [vmem:[#allocation26_spill] sm:$0xff]  ;;  %v5629_v29 = vld [vmem:[#allocation27_spill] sm:$0xff] }
 0x733   :  { %2269 = vmatprep.subr.bf16.mxu0 %v5619_v9  ;;  %2310 = vmatprep.subr.bf16.mxu1 %v5620_v55  ;;  %v5630_v9 = vld [vmem:[#allocation28_spill] sm:$0xff]  ;;  %v5631_v55 = vld [vmem:[#allocation29_spill] sm:$0xff] }
 0x736   :  { %2270 = vmatpush1.bf16.msra.mxu0 %v5621_v58  ;;  %2311 = vmatpush1.bf16.msra.mxu1 %v5622_v37  ;;  %v5632_v58 = vld [vmem:[#allocation30_spill] sm:$0xff]  ;;  %v5633_v37 = vld [vmem:[#allocation31_spill] sm:$0xff] }
 0x737   :  { %2271 = vmatprep.subr.bf16.mxu0 %v5623_v45  ;;  %2312 = vmatprep.subr.bf16.mxu1 %v5624_v61  ;;  %v5634_v45 = vld [vmem:[#allocation32_spill] sm:$0xff]  ;;  %v5635_v61 = vld [vmem:[#allocation33_spill] sm:$0xff] }
 0x73a   :  { %2272 = vmatpush1.bf16.msra.mxu0 %v5625_v41  ;;  %2313 = vmatpush1.bf16.msra.mxu1 %v5626_v25  ;;  %v5636_v41 = vld [vmem:[#allocation34_spill] sm:$0xff]  ;;  %v5637_v25 = vld [vmem:[#allocation35_spill] sm:$0xff] }
 0x73b   :  { %2273 = vmatprep.subr.bf16.mxu0 %v5627_v53  ;;  %2314 = vmatprep.subr.bf16.mxu1 %v5628_v28  ;;  %v5638_v53 = vld [vmem:[#allocation36_spill] sm:$0xff]  ;;  %v5639_v28 = vld [vmem:[#allocation37_spill] sm:$0xff] }
 0x73e   :  { %2274 = vmatpush1.bf16.msra.mxu0 %v5629_v29  ;;  %2315 = vmatpush1.bf16.msra.mxu1 %v5630_v9  ;;  %v5640_v29 = vld [vmem:[#allocation38_spill] sm:$0xff]  ;;  %v5641_v9 = vld [vmem:[#allocation39_spill] sm:$0xff] }
 0x73f   :  { %2275 = vmatprep.subr.bf16.mxu0 %v5631_v55  ;;  %2316 = vmatprep.subr.bf16.mxu1 %v5632_v58  ;;  %v5642_v55 = vld [vmem:[#allocation40_spill] sm:$0xff]  ;;  %v5643_v58 = vld [vmem:[#allocation41_spill] sm:$0xff] }
 0x742   :  { %2276 = vmatpush1.bf16.msra.mxu0 %v5633_v37  ;;  %2317 = vmatpush1.bf16.msra.mxu1 %v5634_v45  ;;  %v5644_v37 = vld [vmem:[#allocation42_spill] sm:$0xff]  ;;  %v5645_v45 = vld [vmem:[#allocation43_spill] sm:$0xff] }
 0x743   :  { %2277 = vmatprep.subr.bf16.mxu0 %v5635_v61  ;;  %2318 = vmatprep.subr.bf16.mxu1 %v5636_v41  ;;  %v5646_v61 = vld [vmem:[#allocation44_spill] sm:$0xff]  ;;  %v5647_v41 = vld [vmem:[#allocation45_spill] sm:$0xff] }
 0x746   :  { %2278 = vmatpush1.bf16.msra.mxu0 %v5637_v25  ;;  %2319 = vmatpush1.bf16.msra.mxu1 %v5638_v53  ;;  %v5648_v25 = vld [vmem:[#allocation46_spill] sm:$0xff]  ;;  %v5649_v53 = vld [vmem:[#allocation48_spill] sm:$0xff] }
 0x747   :  { %2279 = vmatprep.subr.bf16.mxu0 %v5639_v28  ;;  %2320 = vmatprep.subr.bf16.mxu1 %v5640_v29  ;;  %v5650_v28 = vld [vmem:[#allocation49_spill] sm:$0xff]  ;;  %v5651_v29 = vld [vmem:[#allocation50_spill] sm:$0xff] }
 0x74a   :  { %2280 = vmatpush1.bf16.msra.mxu0 %v5641_v9  ;;  %2321 = vmatpush1.bf16.msra.mxu1 %v5642_v55  ;;  %v5652_v9 = vld [vmem:[#allocation51_spill] sm:$0xff]  ;;  %v5653_v55 = vld [vmem:[#allocation52_spill] sm:$0xff] }
 0x74b   :  { %2281 = vmatprep.subr.bf16.mxu0 %v5643_v58  ;;  %2322 = vmatprep.subr.bf16.mxu1 %v5644_v37  ;;  %v5654_v58 = vld [vmem:[#allocation53_spill] sm:$0xff]  ;;  %v5655_v37 = vld [vmem:[#allocation54_spill] sm:$0xff] }
 0x74e   :  { %2282 = vmatpush1.bf16.msra.mxu0 %v5645_v45  ;;  %2323 = vmatpush1.bf16.msra.mxu1 %v5646_v61  ;;  %v5656_v45 = vld [vmem:[#allocation55_spill] sm:$0xff]  ;;  %v5657_v61 = vld [vmem:[#allocation56_spill] sm:$0xff] }
 0x74f   :  { %2283 = vmatprep.subr.bf16.mxu0 %v5647_v41  ;;  %2324 = vmatprep.subr.bf16.mxu1 %v5648_v25  ;;  %v5658_v41 = vld [vmem:[#allocation57_spill] sm:$0xff]  ;;  %v5659_v25 = vld [vmem:[#allocation58_spill] sm:$0xff] }
 0x752   :  { %2284 = vmatpush1.bf16.msra.mxu0 %v5649_v53  ;;  %2325 = vmatpush1.bf16.msra.mxu1 %v5650_v28  ;;  %v5660_v53 = vld [vmem:[#allocation59_spill] sm:$0xff]  ;;  %v5661_v28 = vld [vmem:[#allocation60_spill] sm:$0xff] }
 0x753   :  { %2285 = vmatprep.subr.bf16.mxu0 %v5651_v29  ;;  %2326 = vmatprep.subr.bf16.mxu1 %v5652_v9  ;;  %v5662_v29 = vld [vmem:[#allocation61_spill] sm:$0xff]  ;;  %v5663_v9 = vld [vmem:[#allocation62_spill] sm:$0xff] }
 0x756   :  { %2286 = vmatpush1.bf16.msra.mxu0 %v5653_v55  ;;  %2327 = vmatpush1.bf16.msra.mxu1 %v5654_v58  ;;  %v5664_v55 = vld [vmem:[#allocation63_spill] sm:$0xff]  ;;  %v5665_v58 = vld [vmem:[#allocation64_spill] sm:$0xff] }
 0x757   :  { %2287 = vmatprep.subr.bf16.mxu0 %v5655_v37  ;;  %2328 = vmatprep.subr.bf16.mxu1 %v5656_v45  ;;  %v5666_v37 = vld [vmem:[#allocation65_spill] sm:$0xff]  ;;  %v5667_v45 = vld [vmem:[#allocation66_spill] sm:$0xff] }
 0x75a   :  { %2288 = vmatpush1.bf16.msra.mxu0 %v5657_v61  ;;  %2329 = vmatpush1.bf16.msra.mxu1 %v5658_v41  ;;  %v5668_v61 = vld [vmem:[#allocation67_spill] sm:$0xff]  ;;  %v5669_v41 = vld [vmem:[#allocation68_spill] sm:$0xff] }
 0x75b   :  { %2289 = vmatprep.subr.bf16.mxu0 %v5659_v25  ;;  %2330 = vmatprep.subr.bf16.mxu1 %v5660_v53  ;;  %v5670_v25 = vld [vmem:[#allocation69_spill] sm:$0xff]  ;;  %v5671_v53 = vld [vmem:[#allocation70_spill] sm:$0xff] }
 0x75e   :  { %2290 = vmatpush1.bf16.msra.mxu0 %v5661_v28  ;;  %2331 = vmatpush1.bf16.msra.mxu1 %v5662_v29  ;;  %v5672_v28 = vld [vmem:[#allocation71_spill] sm:$0xff]  ;;  %v2229_v29 = vpop.permute.xlu0 %2228 }
 0x75f   :  { %2291 = vmatprep.subr.bf16.mxu0 %v5663_v9  ;;  %2332 = vmatprep.subr.bf16.mxu1 %v5664_v55  ;;  %v5673_v9 = vld [vmem:[#allocation75_spill] sm:$0xff]  ;;  %v5674_v55 = vld [vmem:[#allocation76_spill] sm:$0xff] }
 0x760   :  { %v2231_v42 = vmul.f32 %v2229_v29, %v5673_v9  ;;  %v2232_v52 = vmul.f32 %v2229_v29, %v5674_v55 }
 0x762   :  { %2292 = vmatpush1.bf16.msra.mxu0 %v5665_v58  ;;  %2333 = vmatpush1.bf16.msra.mxu1 %v5666_v37  ;;  %v5675_v58 = vld [vmem:[#allocation78_spill] sm:$0xff]  ;;  %v5676_v37 = vld [vmem:[#allocation79_spill] sm:$0xff] }
 0x763   :  { %2293 = vmatprep.subr.bf16.mxu0 %v5667_v45  ;;  %2334 = vmatprep.subr.bf16.mxu1 %v5668_v61  ;;  %v2233_v11 = vmul.f32 %v2229_v29, %v5675_v58  ;;  %v2235_v59 = vadd.f32 %v2231_v42, %v5676_v37  ;;  %v5677_v61 = vld [vmem:[#allocation80_spill] sm:$0xff] }
 0x764   :  { %v2236_v60 = vadd.f32 %v2232_v52, %v5677_v61 }
 0x765   :  { %v2237_v32 = vadd.f32 %v2233_v11, %v5374_v19  ;;  %v5709_v19 = vld [vmem:[#allocation144_spill] sm:$0xff] }
 0x766   :  { %2294 = vmatpush1.bf16.msra.mxu0 %v5669_v41  ;;  %2335 = vmatpush1.bf16.msra.mxu1 %v5670_v25 }
 0x767   :  { %2345 = vmatprep.subr.bf16.mxu0 %v5671_v53  ;;  %2386 = vmatprep.subr.bf16.mxu1 %v5672_v28 }
 0x7bc   :  { %v2072_v45 = vpop.f32.mrb[40].mxu0  ;;  %v2113_v1 = vpop.f32.mrb[40].mxu1 }
 0x7bd   :  { %v2239_v41 = vadd.f32 %v2235_v59, %v2072_v45  ;;  %v2074_v8 = vpop.f32.mrb[41].mxu0  ;;  %v2115_v25 = vpop.f32.mrb[41].mxu1  ;;  %v2241_v58 = vadd.f32 %v2237_v32, %v2113_v1  ;;  %v2234_v1 = vmul.f32 %v2229_v29, %v5175_v6  ;;  %v5710_v6 = vld [vmem:[#allocation70_spill] sm:$0xff] }
 0x7be   :  { %v2240_v12 = vadd.f32 %v2236_v60, %v2074_v8  ;;  %v2076_v53 = vpop.f32.mrb[42].mxu0  ;;  %v2117_v48 = vpop.f32.mrb[42].mxu1 }
 0x7bf   :  { %v2243_v28 = vmul.f32 0.5, %v2239_v41  ;;  %v2077_v9 = vpop.f32.mrb[43].mxu0  ;;  %v2118_v30 = vpop.f32.mrb[43].mxu1 }
 0x7c0   :  { %v2247_v55 = vmul.f32 0.5, %v2240_v12 }
 0x7c1   :  { %3010 = vtanh.f32 %v2243_v28 }
 0x7c2   :  { %3012 = vtanh.f32 %v2247_v55 }
 0x7c3   :  { %3014 = vtanh.f32 %v2241_v58 }
 0x7cb   :  { %v3011_v42 = vpop.eup %3010 }
 0x7cc   :  { %v3013_v37 = vpop.eup %3012  ;;  %v2245_v7 = vmul.f32 0.5, %v3011_v42 }
 0x7cd   :  { %v2249_v52 = vmul.f32 0.5, %v3013_v37  ;;  %v3015_v45 = vpop.eup %3014 }
 0x7ce   :  { %v2246_v59 = vadd.f32 0.5, %v2245_v7 }
 0x7cf   :  { %v2250_v61 = vadd.f32 0.5, %v2249_v52 }
 0x7d0   :  { %v2257_v8 = vmul.f32 %v3015_v45, %v2246_v59 }
 0x7d1   :  { %v2256_v48 = vmul.f32 %v2250_v61, %v4329_v40  ;;  %v2238_v61 = vadd.f32 %v2234_v1, %v5178_v21  ;;  %v5708_v21 = vld [vmem:[#allocation143_spill] sm:$0xff] }
 0x7d3   :  { %v4483_v60 = vadd.f32 %v2257_v8, %v2256_v48  ;;  %v2242_v42 = vadd.f32 %v2238_v61, %v2115_v25 }
 0x7d5   :  { %5678 = vst [vmem:[#allocation77_spill] sm:$0xff] %v4483_v60  ;;  %v2252_v59 = vmul.f32 0.5, %v2242_v42 }
 0x7fc   :  { %v2154_v11 = vpop.f32.mrb[44].mxu0  ;;  %v2195_v53 = vpop.f32.mrb[44].mxu1 }
 0x7fd   :  { %v2202_v30 = vadd.f32 %v2154_v11, %v5274_v16  ;;  %v2156_v12 = vpop.f32.mrb[45].mxu0  ;;  %v2197_v32 = vpop.f32.mrb[45].mxu1  ;;  %v2204_v40 = vadd.f32 %v2195_v53, %v3712_v3  ;;  %v5704_v3 = vld [vmem:[#allocation139_spill] sm:$0xff]  ;;  %v5706_v16 = vld [vmem:[#allocation141_spill] sm:$0xff] }
 0x7fe   :  { %v2203_v28 = vadd.f32 %v2156_v12, %v3708_v54  ;;  %v2158_v9 = vpop.f32.mrb[46].mxu0  ;;  %v2199_v55 = vpop.f32.mrb[46].mxu1  ;;  %v2205_v52 = vadd.f32 %v2197_v32, %v3718_v4  ;;  %v5703_v4 = vld [vmem:[#allocation138_spill] sm:$0xff]  ;;  %v5705_v54 = vld [vmem:[#allocation140_spill] sm:$0xff] }
 0x7ff   :  { %v2206_v7 = vmul.f32 0.5, %v2202_v30  ;;  %v2159_v58 = vpop.f32.mrb[47].mxu0  ;;  %v2200_v37 = vpop.f32.mrb[47].mxu1 }
 0x800   :  { %v2210_v41 = vmul.f32 0.5, %v2203_v28  ;;  %v2215_v29 = vmul.f32 0.5, %v2205_v52 }
 0x801   :  { %3016 = vtanh.f32 %v2206_v7 }
 0x802   :  { %3018 = vtanh.f32 %v2210_v41 }
 0x803   :  { %3020 = vtanh.f32 %v2204_v40 }
 0x804   :  { %3022 = vtanh.f32 %v2252_v59 }
 0x805   :  { %3024 = vtanh.f32 %v2215_v29  ;;  %v5681_v29 = vld [vmem:[#allocation116_spill] sm:$0xff] }
 0x806   :  { %3026 = vtanh.f32 %v4483_v60  ;;  %v5707_v60 = vld [vmem:[#allocation142_spill] sm:$0xff] }
 0x80b   :  { %v3017_v45 = vpop.eup %3016 }
 0x80c   :  { %v3019_v8 = vpop.eup %3018  ;;  %v2208_v48 = vmul.f32 0.5, %v3017_v45  ;;  %v5682_v45 = vld [vmem:[#allocation117_spill] sm:$0xff] }
 0x80d   :  { %v2212_v11 = vmul.f32 0.5, %v3019_v8  ;;  %v3021_v12 = vpop.eup %3020  ;;  %v5683_v8 = vld [vmem:[#allocation118_spill] sm:$0xff] }
 0x80e   :  { %v2209_v30 = vadd.f32 0.5, %v2208_v48  ;;  %v3023_v32 = vpop.eup %3022  ;;  %v5684_v48 = vld [vmem:[#allocation119_spill] sm:$0xff] }
 0x80f   :  { %v2213_v28 = vadd.f32 0.5, %v2212_v11  ;;  %v3025_v1 = vpop.eup %3024  ;;  %v2254_v55 = vmul.f32 0.5, %v3023_v32  ;;  %v5685_v11 = vld [vmem:[#allocation120_spill] sm:$0xff]  ;;  %v5691_v32 = vld [vmem:[#allocation126_spill] sm:$0xff] }
 0x810   :  { %v2220_v9 = vmul.f32 %v3021_v12, %v2209_v30  ;;  %v2217_v7 = vmul.f32 0.5, %v3025_v1  ;;  %v3027_v58 = vpop.eup %3026  ;;  %v5686_v30 = vld [vmem:[#allocation121_spill] sm:$0xff]  ;;  %v5687_v12 = vld [vmem:[#allocation122_spill] sm:$0xff]  ;;  %v5692_v1 = vld [vmem:[#allocation127_spill] sm:$0xff] }
 0x811   :  { %v2219_v53 = vmul.f32 %v2213_v28, %v4339_v20  ;;  %v2255_v37 = vadd.f32 0.5, %v2254_v55  ;;  %v5680_v20 = vld [vmem:[#allocation115_spill] sm:$0xff]  ;;  %v5693_v55 = vld [vmem:[#allocation128_spill] sm:$0xff] }
 0x812   :  { %v2218_v41 = vadd.f32 0.5, %v2217_v7  ;;  %v5688_v28 = vld [vmem:[#allocation123_spill] sm:$0xff]  ;;  %v5694_v7 = vld [vmem:[#allocation129_spill] sm:$0xff] }
 0x813   :  { %v4493_v25 = vadd.f32 %v2220_v9, %v2219_v53  ;;  %v2260_v61 = vmul.f32 %v3027_v58, %v2255_v37  ;;  %v5689_v9 = vld [vmem:[#allocation124_spill] sm:$0xff]  ;;  %v5690_v53 = vld [vmem:[#allocation125_spill] sm:$0xff]  ;;  %v5695_v58 = vld [vmem:[#allocation130_spill] sm:$0xff] }
 0x814   :  { %v5696_v37 = vld [vmem:[#allocation131_spill] sm:$0xff] }
 0x815   :  { %5679 = vst [vmem:[#allocation47_spill] sm:$0xff] %v4493_v25  ;;  %3028 = vtanh.f32 %v4493_v25  ;;  %v4496_v59 = vpack.c.bf16 %v2260_v61, %v2260_v61  ;;  %v5699_v61 = vld [vmem:[#allocation134_spill] sm:$0xff]  ;;  %v5702_v25 = vld [vmem:[#allocation137_spill] sm:$0xff] }
 0x81f   :  { %v3029_v40 = vpop.eup %3028 }
 0x820   :  { %v2223_v42 = vmul.f32 %v3029_v40, %v2218_v41  ;;  %v5697_v41 = vld [vmem:[#allocation132_spill] sm:$0xff]  ;;  %v5698_v40 = vld [vmem:[#allocation133_spill] sm:$0xff] }
 0x822   :  { %v2262_v52 = vpack.c.bf16 %v2223_v42, %v2223_v42  ;;  %v5700_v42 = vld [vmem:[#allocation135_spill] sm:$0xff] }
 0x824   :  { %2295 = vmatprep.mubr.bf16.mxu0 %v2262_v52  ;;  %2336 = vmatprep.mubr.bf16.mxu1 %v2262_v52 }
 0x825   :  { %2296 = vmatmul.mubr.bf16.vlgmr.msra.gmra.mrb[48].mxu0 %v4496_v59  ;;  %2337 = vmatmul.mubr.bf16.vlgmr.msra.gmra.mrb[48].mxu1 %v4496_v59 }
 0x826   :  { %2346 = vmatpush1.bf16.msra.mxu0 %v3289_v62  ;;  %2387 = vmatpush1.bf16.msra.mxu1 %v5179_v17 }
 0x827   :  { %2377 = vmatprep.mubr.bf16.mxu0 %v2262_v52  ;;  %2418 = vmatprep.mubr.bf16.mxu1 %v2262_v52  ;;  %v5701_v52 = vld [vmem:[#allocation136_spill] sm:$0xff] }
 0x828   :  { %2347 = vmatprep.subr.bf16.mxu0 %v5180_v2  ;;  %2388 = vmatprep.subr.bf16.mxu1 %v5181_v46 }
 0x82a   :  { %2348 = vmatpush1.bf16.msra.mxu0 %v5182_v13  ;;  %2389 = vmatpush1.bf16.msra.mxu1 %v5183_v18 }
 0x82b   :  { %2349 = vmatprep.subr.bf16.mxu0 %v5184_v26  ;;  %2390 = vmatprep.subr.bf16.mxu1 %v5275_v14 }
 0x82e   :  { %2350 = vmatpush1.bf16.msra.mxu0 %v5276_v33  ;;  %2391 = vmatpush1.bf16.msra.mxu1 %v5277_v24 }
 0x82f   :  { %2351 = vmatprep.subr.bf16.mxu0 %v5278_v15  ;;  %2392 = vmatprep.subr.bf16.mxu1 %v5279_v31 }
 0x832   :  { %2352 = vmatpush1.bf16.msra.mxu0 %v5280_v47  ;;  %2393 = vmatpush1.bf16.msra.mxu1 %v5281_v56 }
 0x833   :  { %2353 = vmatprep.subr.bf16.mxu0 %v5282_v22  ;;  %2394 = vmatprep.subr.bf16.mxu1 %v5283_v50 }
 0x836   :  { %2354 = vmatpush1.bf16.msra.mxu0 %v5284_v57  ;;  %2395 = vmatpush1.bf16.msra.mxu1 %v5375_v49 }
 0x837   :  { %2355 = vmatprep.subr.bf16.mxu0 %v5376_v44  ;;  %2396 = vmatprep.subr.bf16.mxu1 %v5377_v43 }
 0x83a   :  { %2356 = vmatpush1.bf16.msra.mxu0 %v5378_v36  ;;  %2397 = vmatpush1.bf16.msra.mxu1 %v5379_v5 }
 0x83b   :  { %2357 = vmatprep.subr.bf16.mxu0 %v5380_v38  ;;  %2398 = vmatprep.subr.bf16.mxu1 %v5381_v35 }
 0x83e   :  { %2358 = vmatpush1.bf16.msra.mxu0 %v5382_v10  ;;  %2399 = vmatpush1.bf16.msra.mxu1 %v5383_v27 }
 0x83f   :  { %2359 = vmatprep.subr.bf16.mxu0 %v5294_v39  ;;  %2400 = vmatprep.subr.bf16.mxu1 %v5295_v34 }
 0x842   :  { %2360 = vmatpush1.bf16.msra.mxu0 %v5296_v23  ;;  %2401 = vmatpush1.bf16.msra.mxu1 %v5384_v51 }
 0x843   :  { %2361 = vmatprep.subr.bf16.mxu0 %v5385_v63  ;;  %2402 = vmatprep.subr.bf16.mxu1 %v5299_v0 }
 0x846   :  { %2362 = vmatpush1.bf16.msra.mxu0 %v5680_v20  ;;  %2403 = vmatpush1.bf16.msra.mxu1 %v5681_v29 }
 0x847   :  { %2363 = vmatprep.subr.bf16.mxu0 %v5682_v45  ;;  %2404 = vmatprep.subr.bf16.mxu1 %v5683_v8 }
 0x84a   :  { %2364 = vmatpush1.bf16.msra.mxu0 %v5684_v48  ;;  %2405 = vmatpush1.bf16.msra.mxu1 %v5685_v11 }
 0x84b   :  { %2365 = vmatprep.subr.bf16.mxu0 %v5686_v30  ;;  %2406 = vmatprep.subr.bf16.mxu1 %v5687_v12 }
 0x84e   :  { %2366 = vmatpush1.bf16.msra.mxu0 %v5688_v28  ;;  %2407 = vmatpush1.bf16.msra.mxu1 %v5689_v9 }
 0x84f   :  { %2367 = vmatprep.subr.bf16.mxu0 %v5690_v53  ;;  %2408 = vmatprep.subr.bf16.mxu1 %v5691_v32 }
 0x852   :  { %2368 = vmatpush1.bf16.msra.mxu0 %v5692_v1  ;;  %2409 = vmatpush1.bf16.msra.mxu1 %v5693_v55 }
 0x853   :  { %2369 = vmatprep.subr.bf16.mxu0 %v5694_v7  ;;  %2410 = vmatprep.subr.bf16.mxu1 %v5695_v58 }
 0x856   :  { %2370 = vmatpush1.bf16.msra.mxu0 %v5696_v37  ;;  %2411 = vmatpush1.bf16.msra.mxu1 %v5697_v41 }
 0x857   :  { %2371 = vmatprep.subr.bf16.mxu0 %v5698_v40  ;;  %2412 = vmatprep.subr.bf16.mxu1 %v5699_v61 }
 0x85a   :  { %2372 = vmatpush1.bf16.msra.mxu0 %v5700_v42  ;;  %2413 = vmatpush1.bf16.msra.mxu1 %v5701_v52  ;;  %v5711_v42 = vld [vmem:[#allocation71_spill] sm:$0xff] }
 0x85b   :  { %2373 = vmatprep.subr.bf16.mxu0 %v5702_v25  ;;  %2414 = vmatprep.subr.bf16.mxu1 %v5703_v4 }
 0x85e   :  { %2374 = vmatpush1.bf16.msra.mxu0 %v5704_v3  ;;  %2415 = vmatpush1.bf16.msra.mxu1 %v5705_v54 }
 0x85f   :  { %2375 = vmatprep.subr.bf16.mxu0 %v5706_v16  ;;  %2416 = vmatprep.subr.bf16.mxu1 %v5707_v60 }
 0x862   :  { %2376 = vmatpush1.bf16.msra.mxu0 %v5708_v21  ;;  %2417 = vmatpush1.bf16.msra.mxu1 %v5709_v19 }
 0x863   :  { %2488 = vmatprep.subr.bf16.mxu0 %v5710_v6  ;;  %2529 = vmatprep.subr.bf16.mxu1 %v5711_v42  ;;  %v2454_v6 = vpop.permute.xlu1 %2453 }
 0x865   :  { %2378 = vmatmul.mubr.bf16.vlgmr.msra.gmra.mrb[52].mxu0 %v4496_v59  ;;  %2419 = vmatmul.mubr.bf16.vlgmr.msra.gmra.mrb[52].mxu1 %v4496_v59  ;;  %v5721_v59 = vld [vmem:[#allocation77_spill] sm:$0xff] }
 0x866   :  { %2489 = vmatpush1.bf16.msra.mxu0 %v3289_v62  ;;  %2530 = vmatpush1.bf16.msra.mxu1 %v5179_v17  ;;  %v5712_v62 = vld [vmem:[#allocation135_spill] sm:$0xff] }
 0x867   :  { %2490 = vmatprep.subr.bf16.mxu0 %v5180_v2  ;;  %2531 = vmatprep.subr.bf16.mxu1 %v5181_v46  ;;  %v5713_v17 = vld [vmem:[#allocation75_spill] sm:$0xff]  ;;  %v5714_v46 = vld [vmem:[#allocation76_spill] sm:$0xff] }
 0x868   :  { %v2456_v2 = vmul.f32 %v2454_v6, %v5713_v17 }
 0x86a   :  { %2491 = vmatpush1.bf16.msra.mxu0 %v5182_v13  ;;  %2532 = vmatpush1.bf16.msra.mxu1 %v5183_v18  ;;  %v2457_v13 = vmul.f32 %v2454_v6, %v5714_v46  ;;  %v5715_v18 = vld [vmem:[#allocation78_spill] sm:$0xff] }
 0x86b   :  { %2492 = vmatprep.subr.bf16.mxu0 %v5184_v26  ;;  %2533 = vmatprep.subr.bf16.mxu1 %v5275_v14  ;;  %v2458_v26 = vmul.f32 %v2454_v6, %v5715_v18 }
 0x86e   :  { %2493 = vmatpush1.bf16.msra.mxu0 %v5276_v33  ;;  %2534 = vmatpush1.bf16.msra.mxu1 %v5277_v24 }
 0x86f   :  { %2494 = vmatprep.subr.bf16.mxu0 %v5278_v15  ;;  %2535 = vmatprep.subr.bf16.mxu1 %v5279_v31 }
 0x872   :  { %2495 = vmatpush1.bf16.msra.mxu0 %v5280_v47  ;;  %2536 = vmatpush1.bf16.msra.mxu1 %v5281_v56 }
 0x873   :  { %2496 = vmatprep.subr.bf16.mxu0 %v5282_v22  ;;  %2537 = vmatprep.subr.bf16.mxu1 %v5283_v50 }
 0x876   :  { %2497 = vmatpush1.bf16.msra.mxu0 %v5284_v57  ;;  %2538 = vmatpush1.bf16.msra.mxu1 %v5375_v49  ;;  %v5719_v57 = vld [vmem:[#allocation82_spill] sm:$0xff] }
 0x877   :  { %2498 = vmatprep.subr.bf16.mxu0 %v5376_v44  ;;  %2539 = vmatprep.subr.bf16.mxu1 %v5377_v43  ;;  %v5720_v44 = vld [vmem:[#allocation83_spill] sm:$0xff] }
 0x87a   :  { %2499 = vmatpush1.bf16.msra.mxu0 %v5378_v36  ;;  %2540 = vmatpush1.bf16.msra.mxu1 %v5379_v5 }
 0x87b   :  { %2500 = vmatprep.subr.bf16.mxu0 %v5380_v38  ;;  %2541 = vmatprep.subr.bf16.mxu1 %v5381_v35 }
 0x87e   :  { %2501 = vmatpush1.bf16.msra.mxu0 %v5382_v10  ;;  %2542 = vmatpush1.bf16.msra.mxu1 %v5383_v27 }
 0x87f   :  { %2502 = vmatprep.subr.bf16.mxu0 %v5294_v39  ;;  %2543 = vmatprep.subr.bf16.mxu1 %v5295_v34 }
 0x882   :  { %2503 = vmatpush1.bf16.msra.mxu0 %v5296_v23  ;;  %2544 = vmatpush1.bf16.msra.mxu1 %v5384_v51  ;;  %v2462_v23 = vadd.f32 %v2458_v26, %v5719_v57  ;;  %v3089_v57 = vmov 0.0  }
 0x883   :  { %2504 = vmatprep.subr.bf16.mxu0 %v5385_v63  ;;  %2545 = vmatprep.subr.bf16.mxu1 %v5299_v0 }
 0x886   :  { %2505 = vmatpush1.bf16.msra.mxu0 %v5680_v20  ;;  %2546 = vmatpush1.bf16.msra.mxu1 %v5681_v29 }
 0x887   :  { %2506 = vmatprep.subr.bf16.mxu0 %v5682_v45  ;;  %2547 = vmatprep.subr.bf16.mxu1 %v5683_v8 }
 0x88a   :  { %2507 = vmatpush1.bf16.msra.mxu0 %v5684_v48  ;;  %2548 = vmatpush1.bf16.msra.mxu1 %v5685_v11 }
 0x88b   :  { %2508 = vmatprep.subr.bf16.mxu0 %v5686_v30  ;;  %2549 = vmatprep.subr.bf16.mxu1 %v5687_v12 }
 0x88e   :  { %2509 = vmatpush1.bf16.msra.mxu0 %v5688_v28  ;;  %2550 = vmatpush1.bf16.msra.mxu1 %v5689_v9  ;;  %v5722_v9 = vld [vmem:[#allocation84_spill] sm:$0xff] }
 0x88f   :  { %2510 = vmatprep.subr.bf16.mxu0 %v5690_v53  ;;  %2551 = vmatprep.subr.bf16.mxu1 %v5691_v32 }
 0x892   :  { %2511 = vmatpush1.bf16.msra.mxu0 %v5692_v1  ;;  %2552 = vmatpush1.bf16.msra.mxu1 %v5693_v55  ;;  %v5723_v55 = vld [vmem:[#allocation72_spill] sm:$0xff] }
 0x893   :  { %2512 = vmatprep.subr.bf16.mxu0 %v5694_v7  ;;  %2553 = vmatprep.subr.bf16.mxu1 %v5695_v58 }
 0x896   :  { %2513 = vmatpush1.bf16.msra.mxu0 %v5696_v37  ;;  %2554 = vmatpush1.bf16.msra.mxu1 %v5697_v41 }
 0x897   :  { %2514 = vmatprep.subr.bf16.mxu0 %v5698_v40  ;;  %2555 = vmatprep.subr.bf16.mxu1 %v5699_v61 }
 0x89a   :  { %2515 = vmatpush1.bf16.msra.mxu0 %v5712_v62  ;;  %2556 = vmatpush1.bf16.msra.mxu1 %v5701_v52  ;;  %v5724_v52 = vld [vmem:[#allocation73_spill] sm:$0xff] }
 0x89b   :  { %2516 = vmatprep.subr.bf16.mxu0 %v5702_v25  ;;  %2557 = vmatprep.subr.bf16.mxu1 %v5703_v4  ;;  %v5716_v4 = vld [vmem:[#allocation79_spill] sm:$0xff] }
 0x89c   :  { %v2460_v14 = vadd.f32 %v2456_v2, %v5716_v4 }
 0x89e   :  { %2517 = vmatpush1.bf16.msra.mxu0 %v5704_v3  ;;  %2558 = vmatpush1.bf16.msra.mxu1 %v5705_v54  ;;  %v5717_v54 = vld [vmem:[#allocation80_spill] sm:$0xff] }
 0x89f   :  { %2518 = vmatprep.subr.bf16.mxu0 %v5706_v16  ;;  %2559 = vmatprep.subr.bf16.mxu1 %v5707_v60  ;;  %v2461_v24 = vadd.f32 %v2457_v13, %v5717_v54  ;;  %v5726_v54 = vld [vmem:[#allocation47_spill] sm:$0xff] }
 0x8a2   :  { %2519 = vmatpush1.bf16.msra.mxu0 %v5708_v21  ;;  %2560 = vmatpush1.bf16.msra.mxu1 %v5709_v19  ;;  %v5718_v19 = vld [vmem:[#allocation81_spill] sm:$0xff] }
 0x8a3   :  { %v2459_v22 = vmul.f32 %v2454_v6, %v5718_v19  ;;  %v5725_v6 = vld [vmem:[#allocation74_spill] sm:$0xff]  ;;  %2863 = vmatprep.subr.bf16.mxu0 %v3089_v57 }
 0x8a5   :  { %v2463_v43 = vadd.f32 %v2459_v22, %v5720_v44  ;;  %v2898_v44 = vld [vmem:[%s4685_s5 + $0x30] sm:$0xff]  }
 0x8f8   :  { %v2297_v3 = vpop.f32.mrb[48].mxu0  ;;  %v2338_v33 = vpop.f32.mrb[48].mxu1 }
 0x8f9   :  { %v2464_v16 = vadd.f32 %v2460_v14, %v2297_v3  ;;  %v2299_v15 = vpop.f32.mrb[49].mxu0  ;;  %v2340_v31 = vpop.f32.mrb[49].mxu1  ;;  %v2466_v49 = vadd.f32 %v2462_v23, %v2338_v33  ;;  %v2893_v23 = vld [vmem:[%s4685_s5 + $0x8] sm:$0xff]  }
 0x8fa   :  { %v2465_v47 = vadd.f32 %v2461_v24, %v2299_v15  ;;  %v2301_v21 = vpop.f32.mrb[50].mxu0  ;;  %v2342_v56 = vpop.f32.mrb[50].mxu1  ;;  %v2467_v36 = vadd.f32 %v2463_v43, %v2340_v31  ;;  %v2899_v43 = vld [vmem:[%s4685_s5 + $0x38] sm:$0xff]  }
 0x8fb   :  { %v2468_v50 = vmul.f32 0.5, %v2464_v16  ;;  %v2302_v0 = vpop.f32.mrb[51].mxu0  ;;  %v2343_v39 = vpop.f32.mrb[51].mxu1 }
 0x8fc   :  { %v2472_v34 = vmul.f32 0.5, %v2465_v47  ;;  %v2477_v5 = vmul.f32 0.5, %v2467_v36  ;;  %v2894_v0 = vld [vmem:[%s4685_s5 + $0x10] sm:$0xff]   ;;  %v2895_v39 = vld [vmem:[%s4685_s5 + $0x18] sm:$0xff]  }
 0x8fd   :  { %3030 = vtanh.f32 %v2468_v50  ;;  %v2892_v50 = vld [vmem:[%s4685_s5] sm:$0xff]  }
 0x8fe   :  { %3032 = vtanh.f32 %v2472_v34  ;;  %v2896_v34 = vld [vmem:[%s4685_s5 + $0x20] sm:$0xff]  }
 0x8ff   :  { %3034 = vtanh.f32 %v2466_v49  ;;  %v2897_v49 = vld [vmem:[%s4685_s5 + $0x28] sm:$0xff]  }
 0x900   :  { %3036 = vtanh.f32 %v2477_v5 }
 0x907   :  { %v3031_v38 = vpop.eup %3030 }
 0x908   :  { %v3033_v35 = vpop.eup %3032  ;;  %v2470_v10 = vmul.f32 0.5, %v3031_v38 }
 0x909   :  { %v2474_v27 = vmul.f32 0.5, %v3033_v35  ;;  %v3035_v63 = vpop.eup %3034 }
 0x90a   :  { %v2471_v51 = vadd.f32 0.5, %v2470_v10  ;;  %v3037_v45 = vpop.eup %3036 }
 0x90b   :  { %v2475_v60 = vadd.f32 0.5, %v2474_v27  ;;  %v2479_v8 = vmul.f32 0.5, %v3037_v45 }
 0x90c   :  { %v2482_v25 = vmul.f32 %v3035_v63, %v2471_v51 }
 0x90d   :  { %v2481_v20 = vmul.f32 %v2475_v60, %v5721_v59  ;;  %v2480_v48 = vadd.f32 0.5, %v2479_v8 }
 0x90f   :  { %v2483_v29 = vadd.f32 %v2482_v25, %v2481_v20 }
 0x911   :  { %3038 = vtanh.f32 %v2483_v29 }
 0x91b   :  { %v3039_v11 = vpop.eup %3038 }
 0x91c   :  { %v2485_v30 = vmul.f32 %v3039_v11, %v2480_v48 }
 0x91e   :  { %v2486_v22 = vpack.c.bf16 %v2485_v30, %v2485_v30 }
 0x938   :  { %v2379_v12 = vpop.f32.mrb[52].mxu0  ;;  %v2420_v28 = vpop.f32.mrb[52].mxu1 }
 0x939   :  { %v2427_v53 = vadd.f32 %v2379_v12, %v5722_v9  ;;  %v2381_v32 = vpop.f32.mrb[53].mxu0  ;;  %v2422_v1 = vpop.f32.mrb[53].mxu1  ;;  %v2429_v62 = vadd.f32 %v2420_v28, %v5724_v52 }
 0x93a   :  { %v2428_v7 = vadd.f32 %v2381_v32, %v5723_v55  ;;  %v2383_v58 = vpop.f32.mrb[54].mxu0  ;;  %v2424_v37 = vpop.f32.mrb[54].mxu1  ;;  %v2430_v17 = vadd.f32 %v2422_v1, %v5725_v6 }
 0x93b   :  { %v2431_v41 = vmul.f32 0.5, %v2427_v53  ;;  %v2384_v40 = vpop.f32.mrb[55].mxu0  ;;  %v2425_v61 = vpop.f32.mrb[55].mxu1 }
 0x93c   :  { %v2435_v42 = vmul.f32 0.5, %v2428_v7  ;;  %v2440_v2 = vmul.f32 0.5, %v2430_v17 }
 0x93d   :  { %3040 = vtanh.f32 %v2431_v41 }
 0x93e   :  { %3042 = vtanh.f32 %v2435_v42  ;;  %v2845_v42 = vld [vmem:[%s4686_s6] ss:$0 sm:$0xff] }
 0x93f   :  { %3044 = vtanh.f32 %v2429_v62 }
 0x940   :  { %3046 = vtanh.f32 %v2440_v2 }
 0x947   :  { %v3041_v46 = vpop.eup %3040 }
 0x948   :  { %v3043_v13 = vpop.eup %3042  ;;  %v2433_v18 = vmul.f32 0.5, %v3041_v46 }
 0x949   :  { %v2437_v26 = vmul.f32 0.5, %v3043_v13  ;;  %v3045_v14 = vpop.eup %3044 }
 0x94a   :  { %v2434_v4 = vadd.f32 0.5, %v2433_v18  ;;  %v3047_v15 = vpop.eup %3046 }
 0x94b   :  { %v2438_v3 = vadd.f32 0.5, %v2437_v26  ;;  %v2442_v31 = vmul.f32 0.5, %v3047_v15 }
 0x94c   :  { %v2445_v33 = vmul.f32 %v3045_v14, %v2434_v4 }
 0x94d   :  { %v2444_v24 = vmul.f32 %v2438_v3, %v5726_v54  ;;  %v2443_v47 = vadd.f32 0.5, %v2442_v31 }
 0x94f   :  { %v4642_v16 = vadd.f32 %v2445_v33, %v2444_v24 }
 0x951   :  { %3048 = vtanh.f32 %v4642_v16 }
 0x95b   :  { %v3049_v21 = vpop.eup %3048 }
 0x95c   :  { %v2448_v56 = vmul.f32 %v3049_v21, %v2443_v47 }
 0x95e   :  { %v2487_v19 = vpack.c.bf16 %v2448_v56, %v2448_v56 }
 0x960   :  { %2520 = vmatprep.mubr.bf16.mxu0 %v2487_v19  ;;  %2561 = vmatprep.mubr.bf16.mxu1 %v2487_v19 }
 0x961   :  { %2521 = vmatmul.mubr.bf16.vlgmr.msra.gmra.mrb[56].mxu0 %v2486_v22  ;;  %2562 = vmatmul.mubr.bf16.vlgmr.msra.gmra.mrb[56].mxu1 %v2486_v22 }
 0x962   :  { %2864 = vmatpush3.bf16.msra.mxu0 %v2892_v50  ;;  %2879 = vmatprep.mubr.msk.bf16.mxu0 %vm3090_vm0, %v3089_v57 }
 0x963   :  { %2865 = vmatprep.subr.bf16.mxu0 %v3089_v57 }
 0x966   :  { %2866 = vmatpush3.bf16.msra.mxu0 %v2893_v23 }
 0x967   :  { %2867 = vmatprep.subr.bf16.mxu0 %v3089_v57 }
 0x96a   :  { %2868 = vmatpush3.bf16.msra.mxu0 %v2894_v0 }
 0x96b   :  { %2869 = vmatprep.subr.bf16.mxu0 %v3089_v57 }
 0x96e   :  { %2870 = vmatpush3.bf16.msra.mxu0 %v2895_v39 }
 0x96f   :  { %2871 = vmatprep.subr.bf16.mxu0 %v3089_v57 }
 0x972   :  { %2872 = vmatpush3.bf16.msra.mxu0 %v2896_v34 }
 0x973   :  { %2873 = vmatprep.subr.bf16.mxu0 %v3089_v57 }
 0x976   :  { %2874 = vmatpush3.bf16.msra.mxu0 %v2897_v49 }
 0x977   :  { %2875 = vmatprep.subr.bf16.mxu0 %v3089_v57 }
 0x97a   :  { %2876 = vmatpush3.bf16.msra.mxu0 %v2898_v44 }
 0x97b   :  { %2877 = vmatprep.subr.bf16.mxu0 %v3089_v57 }
 0x97e   :  { %2878 = vmatpush3.bf16.msra.mxu0 %v2899_v43 }
 0xa34   :  { %v2522_v36 = vpop.f32.mrb[56].mxu0  ;;  %v2563_v5 = vpop.f32.mrb[56].mxu1 }
 0xa35   :  { %v2570_v38 = vadd.f32 %v2522_v36, %v5722_v9  ;;  %v2524_v35 = vpop.f32.mrb[57].mxu0  ;;  %v2565_v10 = vpop.f32.mrb[57].mxu1  ;;  %v2572_v29 = vadd.f32 %v2563_v5, %v5724_v52 }
 0xa36   :  { %v2571_v27 = vadd.f32 %v2524_v35, %v5723_v55  ;;  %v2526_v51 = vpop.f32.mrb[58].mxu0  ;;  %v2567_v63 = vpop.f32.mrb[58].mxu1  ;;  %v2573_v45 = vadd.f32 %v2565_v10, %v5725_v6 }
 0xa37   :  { %v2574_v60 = vmul.f32 0.5, %v2570_v38  ;;  %v2527_v25 = vpop.f32.mrb[59].mxu0  ;;  %v2568_v59 = vpop.f32.mrb[59].mxu1 }
 0xa38   :  { %v2578_v20 = vmul.f32 0.5, %v2571_v27  ;;  %v2583_v8 = vmul.f32 0.5, %v2573_v45 }
 0xa39   :  { %3050 = vtanh.f32 %v2574_v60 }
 0xa3a   :  { %3052 = vtanh.f32 %v2578_v20 }
 0xa3b   :  { %3054 = vtanh.f32 %v2572_v29 }
 0xa3c   :  { %3056 = vtanh.f32 %v2583_v8 }
 0xa43   :  { %v3051_v48 = vpop.eup %3050 }
 0xa44   :  { %v3053_v11 = vpop.eup %3052  ;;  %v2576_v30 = vmul.f32 0.5, %v3051_v48 }
 0xa45   :  { %v2580_v12 = vmul.f32 0.5, %v3053_v11  ;;  %v3055_v9 = vpop.eup %3054 }
 0xa46   :  { %v2577_v28 = vadd.f32 0.5, %v2576_v30  ;;  %v3057_v7 = vpop.eup %3056 }
 0xa47   :  { %v2581_v53 = vadd.f32 0.5, %v2580_v12  ;;  %v2585_v58 = vmul.f32 0.5, %v3057_v7 }
 0xa48   :  { %v2588_v32 = vmul.f32 %v3055_v9, %v2577_v28 }
 0xa49   :  { %v2587_v1 = vmul.f32 %v2581_v53, %v4642_v16  ;;  %v2586_v37 = vadd.f32 0.5, %v2585_v58 }
 0xa4b   :  { %v2589_v55 = vadd.f32 %v2588_v32, %v2587_v1 }
 0xa4d   :  { %3058 = vtanh.f32 %v2589_v55 }
 0xa57   :  { %v3059_v41 = vpop.eup %3058 }
 0xa58   :  { %v2591_v40 = vmul.f32 %v3059_v41, %v2586_v37 }
 0xa5a   :  { %v2592_v61 = vpack.c.bf16 %v2591_v40, %v2591_v40 }
 0xa5c   :  { %2880 = vmatmul.mubr.bf16.vlgmr.msra.gmra.mrb[60].mxu0 %v2592_v61 }
 0xb2f   :  { %v2698_v52 = vpop.f32.mrb[60].mxu0 }
 0xb30   :  { %v2699_v62 = vadd.f32 %v2845_v42, %v2698_v52  ;;  %v2881_v6 = vpop.f32.mrb[61].mxu0 }
 0xb31   :  { %v2701_v17 = vpop.f32.mrb[62].mxu0 }
 0xb32   :  { %2704 = vst [vmem:[%s4687_s7] sm:$0xff] %v2699_v62  ;;  %v2882_v2 = vpop.f32.mrb[63].mxu0 }
 0xb33   :  { %2709 = vsyncpa [#allocation3], 1 }

</bundles_post_ra>
